<compile_context>
chip_gen: v6e
topology: v6e:2x2x1
jax: 0.10.0
libtpu: 0.0.40
codegen_flags: <defaults>
</compile_context>

<pallas_src>
import functools
import random

import numpy as np
import jax
import jax.numpy as jnp
from jax.experimental import pallas as pl
from jax.experimental.pallas import tpu as pltpu


# ----------------------------------------------------------------------------
# Model constants ("Complexity A", image_size=8 => depth=3)
# ----------------------------------------------------------------------------
Z_DIM, CLUSTERS, HIDDEN = 99, 3, 128
GROUP = Z_DIM // CLUSTERS          # 33
Z_PAD = 128                        # 99 padded to one lane tile
IMG, CH, DENSITY = 8, 3, 64
ENC_SP = 4                         # encoder feature map is 4x4
FLAT_IMG = IMG * IMG * CH          # 192  (NHWC-flattened 8x8x3 image)
FLAT_FEAT = ENC_SP * ENC_SP * DENSITY   # 1024 (NHWC-flattened 4x4x64 feature map)
DEC_PAD = 256                      # decoded image 192 lanes -> 256
CLS_PAD = 128                      # class(16)+domain(5) logits -> 128 lanes
DISC_PAD = 128                     # discriminator scalar -> 128 lanes
BN_EPS = 1e-5
N_STREAMS = 4
N_DEC = 6                          # 4 stream decodes + 2 recombined decodes


# ----------------------------------------------------------------------------
# The single fused kernel
# ----------------------------------------------------------------------------

def _gan_kernel(x_ref, eps_ref,
                w_enc1_ref, w_head_ref, b_head_ref,
                w_clst_ref, w_clsb_ref, b_cls_ref,
                sel_a_ref, sel_b_ref, mix_ref,
                w_dec1_ref, g_oh_ref, g_ex_ref,
                p_pool_ref, p_bcast_ref, gamma_ref, beta_ref,
                w_dec2_ref, w_disc1_ref, w_disc2_ref,
                mulv_ref, z_ref, cls_ref, dec_ref, disc_ref,
                *, batch):
    f32, bf16 = jnp.float32, jnp.bfloat16

    def mm(a, w_ref):
        # bf16 operands (MXU-native on v5e/v6e/v7x), f32 accumulation.
        return jnp.dot(a.astype(bf16), w_ref[...], preferred_element_type=f32)

    def fmm(a, b):
        # small exact f32 matmuls (BN statistics / selection matrices).
        return jnp.dot(a, b, preferred_element_type=f32)

    def leaky(v):
        return jnp.maximum(v, 0.2 * v)

    # --- encoder: input conv (dense-unrolled) + LeakyReLU --------------------
    x = x_ref[...]                                   # (4B, 192)  NHWC-flat images
    h1 = leaky(mm(x, w_enc1_ref))                    # (4B, 1024) lanes = (y*4+x)*64+c

    # --- fused conv_mean / conv_logvar head + VAE reparameterization ---------
    mulv = mm(h1, w_head_ref) + b_head_ref[...]      # (4B, 256)  [mu | pad | logvar | pad]
    mulv_ref[...] = mulv
    mu = mulv[:, 0:Z_PAD]
    lv = mulv[:, Z_PAD:2 * Z_PAD]
    z = eps_ref[...] * jnp.exp(0.5 * lv) + mu        # (4B, 128)  pad lanes stay 0
    z_ref[...] = z

    # --- RelationPrediction (affine chain pre-collapsed at pack time) --------
    z0 = z[0:batch, :]
    z1 = z[batch:2 * batch, :]
    cls_ref[...] = mm(z0, w_clst_ref) + mm(z1, w_clsb_ref) + b_cls_ref[...]

    # --- recombination + stacking of the 6 decoder batches -------------------
    # z_dec row r = mix[r] * (sel_a[r] . z)  +  (1 - mix[r]) * (sel_b[r] . z)
    m = mix_ref[...]                                 # (6B, 128)
    z_dec = m * fmm(sel_a_ref[...], z) + (1.0 - m) * fmm(sel_b_ref[...], z)   # (6B, 128)

    # --- decoder ConvTranspose2d(99->64, 4, 1, 0) as one matmul --------------
    h = mm(z_dec, w_dec1_ref)                        # (6B, 1024) lanes = (y*4+x)*64+c

    # --- per-decoder-call BatchNorm (training-mode batch stats) + LeakyReLU --
    n_per = float(batch * ENC_SP * ENC_SP)           # B*4*4 elements per channel/call
    g_oh = g_oh_ref[...]                             # (6, 6B) one-hot group rows
    s_lane = fmm(g_oh, h)                            # (6, 1024) per-group per-lane sums
    q_lane = fmm(g_oh, h * h)
    s_ch = fmm(s_lane, p_pool_ref[...])              # (6, 64)  per-group per-channel sums
    q_ch = fmm(q_lane, p_pool_ref[...])
    mean_c = s_ch / n_per
    var_c = q_ch / n_per - mean_c * mean_c           # biased variance (BN training mode)
    inv_c = jax.lax.rsqrt(var_c + BN_EPS)
    scale_l = fmm(inv_c, p_bcast_ref[...]) * gamma_ref[...]       # (6, 1024)
    mean_l = fmm(mean_c, p_bcast_ref[...])
    shift_l = beta_ref[...] - mean_l * scale_l
    scale_r = fmm(g_ex_ref[...], scale_l)            # (6B, 1024) broadcast to rows
    shift_r = fmm(g_ex_ref[...], shift_l)
    y = leaky(h * scale_r + shift_r)

    # --- decoder ConvTranspose2d(64->3, 4, 2, 1) (dense-unrolled) + tanh -----
    dec = jnp.tanh(mm(y, w_dec2_ref))                # (6B, 256) lanes 0..191 real
    dec_ref[...] = dec

    # --- discriminator on the 4 stream reconstructions -----------------------
    d_in = dec[0:N_STREAMS * batch, :]               # (4B, 256) pad lanes are exactly 0
    d1 = leaky(mm(d_in, w_disc1_ref))                # (4B, 1024)
    logits = mm(d1, w_disc2_ref)                     # (4B, 128) lane 0 real
    disc_ref[...] = 1.0 / (1.0 + jnp.exp(-logits))   # exact sigmoid (f32 EUP/VPU)


# ----------------------------------------------------------------------------
# Parameter packing (runs ONCE, outside jit)
# ----------------------------------------------------------------------------

def _np(a):
    return np.asarray(jax.device_get(a), dtype=np.float32)


def _unroll_conv_s2p1(w, in_hw, out_hw):
    """Dense-unrolled Conv2d(k=4, stride=2, pad=1): NHWC-flat in -> NHWC-flat out.

    w: (O, Ci, 4, 4).  Returns (in_hw*in_hw*Ci, out_hw*out_hw*O)."""
    O, Ci, KH, KW = w.shape
    Wd = np.zeros((in_hw * in_hw * Ci, out_hw * out_hw * O), np.float32)
    for oy in range(out_hw):
        for ox in range(out_hw):
            for ky in range(KH):
                for kx in range(KW):
                    iy, ix = 2 * oy - 1 + ky, 2 * ox - 1 + kx
                    if 0 <= iy < in_hw and 0 <= ix < in_hw:
                        ib = (iy * in_hw + ix) * Ci
                        ob = (oy * out_hw + ox) * O
                        Wd[ib:ib + Ci, ob:ob + O] += w[:, :, ky, kx].T
    return Wd


def _unroll_convT_s2p1(w, in_hw, out_hw, out_pad):
    """Dense-unrolled ConvTranspose2d(k=4, stride=2, pad=1).

    w: (Ci, O, 4, 4).  Returns (in_hw*in_hw*Ci, out_pad); real output occupies
    lanes [0, out_hw*out_hw*O)."""
    Ci, O, KH, KW = w.shape
    Wd = np.zeros((in_hw * in_hw * Ci, out_pad), np.float32)
    for iy in range(in_hw):
        for ix in range(in_hw):
            for ky in range(KH):
                for kx in range(KW):
                    Y, X = 2 * iy - 1 + ky, 2 * ix - 1 + kx
                    if 0 <= Y < out_hw and 0 <= X < out_hw:
                        ib = (iy * in_hw + ix) * Ci
                        ob = (Y * out_hw + X) * O
                        Wd[ib:ib + Ci, ob:ob + O] += w[:, :, ky, kx]
    return Wd


def pack_params(p, batch):
    f32, bf16 = np.float32, jnp.bfloat16
    B, S, G = batch, N_STREAMS, N_DEC
    q = {}

    # ---- encoder input conv (bias-free), dense-unrolled ----------------------
    q["w_enc1"] = jnp.asarray(_unroll_conv_s2p1(_np(p["enc_conv1_w"]), IMG, ENC_SP), bf16)

    # ---- fused conv_mean / conv_logvar head: mu -> lanes [0,99), lv -> [128,227)
    wm = _np(p["enc_mean_w"]).transpose(2, 3, 1, 0).reshape(FLAT_FEAT, Z_DIM)
    wl = _np(p["enc_logvar_w"]).transpose(2, 3, 1, 0).reshape(FLAT_FEAT, Z_DIM)
    wh = np.zeros((FLAT_FEAT, 2 * Z_PAD), f32)
    wh[:, 0:Z_DIM] = wm
    wh[:, Z_PAD:Z_PAD + Z_DIM] = wl
    q["w_head"] = jnp.asarray(wh, bf16)
    bh = np.zeros((1, 2 * Z_PAD), f32)
    bh[0, 0:Z_DIM] = _np(p["enc_mean_b"])
    bh[0, Z_PAD:Z_PAD + Z_DIM] = _np(p["enc_logvar_b"])
    q["b_head"] = jnp.asarray(bh)

    # ---- decoder ConvTranspose 1 (1x1 -> 4x4): plain matmul, rows padded 99->128
    wd1 = _np(p["dec_convt1_w"]).transpose(0, 2, 3, 1).reshape(Z_DIM, FLAT_FEAT)
    wd1 = np.concatenate([wd1, np.zeros((Z_PAD - Z_DIM, FLAT_FEAT), f32)], axis=0)
    q["w_dec1"] = jnp.asarray(wd1, bf16)

    # ---- decoder BatchNorm helpers -------------------------------------------
    q["gamma_t"] = jnp.asarray(np.tile(_np(p["dec_bn1_g"]), ENC_SP * ENC_SP).reshape(1, FLAT_FEAT))
    q["beta_t"] = jnp.asarray(np.tile(_np(p["dec_bn1_b"]), ENC_SP * ENC_SP).reshape(1, FLAT_FEAT))
    p_pool = np.tile(np.eye(DENSITY, dtype=f32), (ENC_SP * ENC_SP, 1))   # (1024, 64)
    q["p_pool"] = jnp.asarray(p_pool)
    q["p_bcast"] = jnp.asarray(np.ascontiguousarray(p_pool.T))           # (64, 1024)
    g_oh = np.zeros((G, G * B), f32)
    for g in range(G):
        g_oh[g, g * B:(g + 1) * B] = 1.0
    q["g_onehot"] = jnp.asarray(g_oh)
    q["g_expand"] = jnp.asarray(np.ascontiguousarray(g_oh.T))

    # ---- decoder ConvTranspose 2 (4x4 -> 8x8), dense-unrolled, 256-lane padded
    q["w_dec2"] = jnp.asarray(
        _unroll_convT_s2p1(_np(p["dec_convt2_w"]), ENC_SP, IMG, DEC_PAD), bf16)

    # ---- discriminator --------------------------------------------------------
    wdisc1 = _unroll_conv_s2p1(_np(p["disc_conv1_w"]), IMG, ENC_SP)      # (192, 1024)
    wdisc1 = np.concatenate([wdisc1, np.zeros((DEC_PAD - FLAT_IMG, FLAT_FEAT), f32)], axis=0)
    q["w_disc1"] = jnp.asarray(wdisc1, bf16)                             # (256, 1024)
    wdisc2 = _np(p["disc_conv2_w"]).transpose(2, 3, 1, 0).reshape(FLAT_FEAT, 1)
    wdisc2p = np.zeros((FLAT_FEAT, DISC_PAD), f32)
    wdisc2p[:, 0:1] = wdisc2
    q["w_disc2"] = jnp.asarray(wdisc2p, bf16)

    # ---- RelationPrediction: collapse the purely-affine Linear chains ---------
    # (the reference nn.Sequential has no nonlinearity between the Linears)
    w1, b1 = _np(p["fc1_w"]), _np(p["fc1_b"])
    w2, b2 = _np(p["fc2_w"]), _np(p["fc2_b"])
    w3, b3 = _np(p["fc3_w"]), _np(p["fc3_b"])
    Wc = w1 @ w2 @ w3                                   # (198, 16)
    bc = (b1 @ w2 + b2) @ w3 + b3                       # (16,)
    v1, c1 = _np(p["fcd1_w"]), _np(p["fcd1_b"])
    v2, c2 = _np(p["fcd2_w"]), _np(p["fcd2_b"])
    v3, c3 = _np(p["fcd3_w"]), _np(p["fcd3_b"])
    Wd = v1 @ v2 @ v3                                   # (198, 5)
    bd = (c1 @ v2 + c2) @ v3 + c3                       # (5,)
    top = np.zeros((Z_PAD, CLS_PAD), f32)               # acts on z of stream 0
    bot = np.zeros((Z_PAD, CLS_PAD), f32)               # acts on z of stream 1
    top[0:Z_DIM, 0:16] = Wc[0:Z_DIM]
    top[0:Z_DIM, 16:21] = Wd[0:Z_DIM]
    bot[0:Z_DIM, 0:16] = Wc[Z_DIM:2 * Z_DIM]
    bot[0:Z_DIM, 16:21] = Wd[Z_DIM:2 * Z_DIM]
    q["w_cls_top"] = jnp.asarray(top, bf16)
    q["w_cls_bot"] = jnp.asarray(bot, bf16)
    bcl = np.zeros((1, CLS_PAD), f32)
    bcl[0, 0:16] = bc
    bcl[0, 16:21] = bd
    q["b_cls"] = jnp.asarray(bcl)

    # ---- recombination: selection matrices + lane mask ------------------------
    # TODO(synk): the reference draws random.randint at every forward call; here
    # the two cluster choices are fixed at pack time (trace-time constants).
    random.seed(0)
    rc0 = random.randint(0, CLUSTERS)   # inclusive upper bound, as in the reference
    rc1 = random.randint(0, CLUSTERS)
    sel_a = np.zeros((G * B, S * B), f32)
    sel_b = np.zeros((G * B, S * B), f32)
    mix = np.zeros((G * B, Z_PAD), f32)
    for r in range(S * B):              # the 4 plain stream decodes
        sel_a[r, r] = 1.0
        sel_b[r, r] = 1.0
        mix[r, :] = 1.0
    for i in range(B):                  # recombined #1: pair=stream0, random=stream2
        sel_a[S * B + i, 0 * B + i] = 1.0
        sel_b[S * B + i, 2 * B + i] = 1.0
        # recombined #2: pair=stream1, random=stream3
        sel_a[S * B + B + i, 1 * B + i] = 1.0
        sel_b[S * B + B + i, 3 * B + i] = 1.0
    for l in range(Z_DIM):
        if (l // GROUP) == rc0:
            mix[S * B:S * B + B, l] = 1.0
        if (l // GROUP) == rc1:
            mix[S * B + B:S * B + 2 * B, l] = 1.0
    q["sel_a"] = jnp.asarray(sel_a)
    q["sel_b"] = jnp.asarray(sel_b)
    q["mix"] = jnp.asarray(mix)
    return q


# ----------------------------------------------------------------------------
# Full forward (FaceVAEMixture + FaceDiscriminator) — one pallas_call
# ----------------------------------------------------------------------------

def recombined_gan_forward(q, datums, eps_key, *, batch):
    B, S, G = batch, N_STREAMS, N_DEC

    # flatten the 4 NCHW streams into one (4B, 192) NHWC-flat slab
    x_all = jnp.stack(datums, axis=0).reshape(S * B, CH, IMG, IMG)
    x_flat = x_all.transpose(0, 2, 3, 1).reshape(S * B, FLAT_IMG).astype(jnp.float32)

    eps = jax.random.normal(eps_key, (S * B, Z_DIM), jnp.float32)
    eps = jnp.pad(eps, ((0, 0), (0, Z_PAD - Z_DIM)))           # keep pad lanes of z at 0

    ins = [x_flat, eps,
           q["w_enc1"], q["w_head"], q["b_head"],
           q["w_cls_top"], q["w_cls_bot"], q["b_cls"],
           q["sel_a"], q["sel_b"], q["mix"],
           q["w_dec1"], q["g_onehot"], q["g_expand"],
           q["p_pool"], q["p_bcast"], q["gamma_t"], q["beta_t"],
           q["w_dec2"], q["w_disc1"], q["w_disc2"]]
    in_specs = [pl.BlockSpec(a.shape, lambda i: (0, 0)) for a in ins]

    out_shape = (jax.ShapeDtypeStruct((S * B, 2 * Z_PAD), jnp.float32),   # mu|logvar
                 jax.ShapeDtypeStruct((S * B, Z_PAD), jnp.float32),       # z samples
                 jax.ShapeDtypeStruct((B, CLS_PAD), jnp.float32),         # class|domain
                 jax.ShapeDtypeStruct((G * B, DEC_PAD), jnp.float32),     # decoded images
                 jax.ShapeDtypeStruct((S * B, DISC_PAD), jnp.float32))    # disc probs
    out_specs = tuple(pl.BlockSpec(s.shape, lambda i: (0, 0)) for s in out_shape)

    # TODO(synk): if B is ever scaled up, add an M-tiled parallel grid axis so
    # v7x's second TensorCore is used and the per-block VMEM stays bounded.
    mulv, z, cls_dom, dec, disc = pl.pallas_call(
        functools.partial(_gan_kernel, batch=B),
        out_shape=out_shape,
        grid=(1,),
        in_specs=in_specs,
        out_specs=out_specs,
        compiler_params=pltpu.CompilerParams(dimension_semantics=("arbitrary",)),
    )(*ins)

    # ---- unpack to the reference output structure (pure slicing / reshapes) --
    mu_all = mulv[:, :Z_DIM].reshape(S, B, Z_DIM)
    lv_all = mulv[:, Z_PAD:Z_PAD + Z_DIM].reshape(S, B, Z_DIM)
    z_all = z[:, :Z_DIM].reshape(S, B, Z_DIM)

    mu_lists = [[mu_all[s, :, c * GROUP:(c + 1) * GROUP] for c in range(CLUSTERS)]
                for s in range(S)]
    logvar_lists = [[lv_all[s, :, c * GROUP:(c + 1) * GROUP] for c in range(CLUSTERS)]
                    for s in range(S)]
    z_sample_lists = [[z_all[s, :, c * GROUP:(c + 1) * GROUP] for c in range(CLUSTERS)]
                      for s in range(S)]

    dec_img = dec[:, :FLAT_IMG].reshape(G * B, IMG, IMG, CH).transpose(0, 3, 1, 2)
    stream_outputs = [dec_img[s * B:(s + 1) * B] for s in range(S)]
    rec = [dec_img[(S + r) * B:(S + r + 1) * B] for r in range(2)]

    cls = cls_dom[:, :16]
    dom = cls_dom[:, 16:21]
    disc_preds = [disc[s * B:(s + 1) * B, 0:1] for s in range(S)]

    vae_out = (stream_outputs, list(datums), rec, mu_lists, logvar_lists,
               z_sample_lists, cls, dom)
    return vae_out, disc_preds


# ----------------------------------------------------------------------------
# Deterministic parameter init (shapes follow the PyTorch module __init__;
# Linear weights stored in x @ W orientation)
# ----------------------------------------------------------------------------

def init_params(key, channels=3):
    ks = jax.random.split(key, 16)

    def nrm(k, shape):
        return (0.02 * jax.random.normal(k, shape)).astype(jnp.float32)

    z0 = lambda *s: jnp.zeros(s, jnp.float32)
    p = {
        # encoder (density=64, depth=3)
        "enc_conv1_w": nrm(ks[0], (64, channels, 4, 4)),
        "enc_mean_w": nrm(ks[1], (99, 64, 4, 4)),   "enc_mean_b": z0(99),
        "enc_logvar_w": nrm(ks[2], (99, 64, 4, 4)), "enc_logvar_b": z0(99),
        # decoder (density=64, depth=3)
        "dec_convt1_w": nrm(ks[3], (99, 64, 4, 4)),
        "dec_bn1_g": jnp.ones((64,), jnp.float32), "dec_bn1_b": z0(64),
        "dec_convt2_w": nrm(ks[4], (64, channels, 4, 4)),
        # discriminator (density=64, depth=3)
        "disc_conv1_w": nrm(ks[5], (64, channels, 4, 4)),
        "disc_conv2_w": nrm(ks[6], (1, 64, 4, 4)),
        # RelationPrediction: Linear(198->128->128->16) and (198->128->128->5)
        "fc1_w": nrm(ks[7], (198, 128)),  "fc1_b": z0(128),
        "fc2_w": nrm(ks[8], (128, 128)),  "fc2_b": z0(128),
        "fc3_w": nrm(ks[9], (128, 16)),   "fc3_b": z0(16),
        "fcd1_w": nrm(ks[10], (198, 128)), "fcd1_b": z0(128),
        "fcd2_w": nrm(ks[11], (128, 128)), "fcd2_b": z0(128),
        "fcd3_w": nrm(ks[12], (128, 5)),   "fcd3_b": z0(5),
    }
    return p


# ----------------------------------------------------------------------------
if __name__ == "__main__":
    B = 2                                        # small batch; image_size=8 => depth=3

    root = jax.random.PRNGKey(0)
    k_param, k_data, k_eps = jax.random.split(root, 3)

    params = init_params(k_param, channels=CH)
    q = pack_params(params, batch=B)             # packed ONCE, outside jit

    data_keys = jax.random.split(k_data, N_STREAMS)
    datums = [jax.random.normal(data_keys[s], (B, CH, IMG, IMG), jnp.float32)
              for s in range(N_STREAMS)]

    fwd = jax.jit(functools.partial(recombined_gan_forward, batch=B))
    vae_out, disc_preds = fwd(q, datums, k_eps)
    jax.block_until_ready((vae_out, disc_preds))

    # light shape sanity checks
    assert vae_out[0][0].shape == (B, CH, IMG, IMG)   # stream reconstructions
    assert vae_out[2][0].shape == (B, CH, IMG, IMG)   # recombined reconstructions
    assert vae_out[3][0][0].shape == (B, GROUP)       # per-cluster mu
    assert vae_out[6].shape == (B, 16)                # class prediction
    assert vae_out[7].shape == (B, 5)                 # domain prediction
    assert disc_preds[0].shape == (B, 1)              # discriminator output

    print("KERNEL_OK")
</pallas_src>

<mosaic_0001>
module attributes {stable_mosaic.version = 11 : i64} {
  func.func @_gan_kernel(%arg0: i32, %arg1: memref<8x192xf32, #tpu.memory_space<vmem>>, %arg2: memref<8x128xf32, #tpu.memory_space<vmem>>, %arg3: memref<192x1024xbf16, #tpu.memory_space<vmem>>, %arg4: memref<1024x256xbf16, #tpu.memory_space<vmem>>, %arg5: memref<1x256xf32, #tpu.memory_space<vmem>>, %arg6: memref<128x128xbf16, #tpu.memory_space<vmem>>, %arg7: memref<128x128xbf16, #tpu.memory_space<vmem>>, %arg8: memref<1x128xf32, #tpu.memory_space<vmem>>, %arg9: memref<12x8xf32, #tpu.memory_space<vmem>>, %arg10: memref<12x8xf32, #tpu.memory_space<vmem>>, %arg11: memref<12x128xf32, #tpu.memory_space<vmem>>, %arg12: memref<128x1024xbf16, #tpu.memory_space<vmem>>, %arg13: memref<6x12xf32, #tpu.memory_space<vmem>>, %arg14: memref<12x6xf32, #tpu.memory_space<vmem>>, %arg15: memref<1024x64xf32, #tpu.memory_space<vmem>>, %arg16: memref<64x1024xf32, #tpu.memory_space<vmem>>, %arg17: memref<1x1024xf32, #tpu.memory_space<vmem>>, %arg18: memref<1x1024xf32, #tpu.memory_space<vmem>>, %arg19: memref<1024x256xbf16, #tpu.memory_space<vmem>>, %arg20: memref<256x1024xbf16, #tpu.memory_space<vmem>>, %arg21: memref<1024x128xbf16, #tpu.memory_space<vmem>>, %arg22: memref<8x256xf32, #tpu.memory_space<vmem>>, %arg23: memref<8x128xf32, #tpu.memory_space<vmem>>, %arg24: memref<2x128xf32, #tpu.memory_space<vmem>>, %arg25: memref<12x256xf32, #tpu.memory_space<vmem>>, %arg26: memref<8x128xf32, #tpu.memory_space<vmem>>) attributes {dimension_semantics = [#tpu.dimension_semantics<arbitrary>], iteration_bounds = array<i64: 1>, scalar_prefetch = 0 : i64, scratch_operands = 0 : i64, tpu.core_type = #tpu.core_type<tc>, window_params = [{pipeline_mode = #tpu.pipeline_mode<synchronous>, transform_indices = @transform_0, window_bounds = array<i64: 8, 192>}, {pipeline_mode = #tpu.pipeline_mode<synchronous>, transform_indices = @transform_1, window_bounds = array<i64: 8, 128>}, {pipeline_mode = #tpu.pipeline_mode<synchronous>, transform_indices = @transform_2, window_bounds = array<i64: 192, 1024>}, {pipeline_mode = #tpu.pipeline_mode<synchronous>, transform_indices = @transform_3, window_bounds = array<i64: 1024, 256>}, {pipeline_mode = #tpu.pipeline_mode<synchronous>, transform_indices = @transform_4, window_bounds = array<i64: 1, 256>}, {pipeline_mode = #tpu.pipeline_mode<synchronous>, transform_indices = @transform_5, window_bounds = array<i64: 128, 128>}, {pipeline_mode = #tpu.pipeline_mode<synchronous>, transform_indices = @transform_6, window_bounds = array<i64: 128, 128>}, {pipeline_mode = #tpu.pipeline_mode<synchronous>, transform_indices = @transform_7, window_bounds = array<i64: 1, 128>}, {pipeline_mode = #tpu.pipeline_mode<synchronous>, transform_indices = @transform_8, window_bounds = array<i64: 12, 8>}, {pipeline_mode = #tpu.pipeline_mode<synchronous>, transform_indices = @transform_9, window_bounds = array<i64: 12, 8>}, {pipeline_mode = #tpu.pipeline_mode<synchronous>, transform_indices = @transform_10, window_bounds = array<i64: 12, 128>}, {pipeline_mode = #tpu.pipeline_mode<synchronous>, transform_indices = @transform_11, window_bounds = array<i64: 128, 1024>}, {pipeline_mode = #tpu.pipeline_mode<synchronous>, transform_indices = @transform_12, window_bounds = array<i64: 6, 12>}, {pipeline_mode = #tpu.pipeline_mode<synchronous>, transform_indices = @transform_13, window_bounds = array<i64: 12, 6>}, {pipeline_mode = #tpu.pipeline_mode<synchronous>, transform_indices = @transform_14, window_bounds = array<i64: 1024, 64>}, {pipeline_mode = #tpu.pipeline_mode<synchronous>, transform_indices = @transform_15, window_bounds = array<i64: 64, 1024>}, {pipeline_mode = #tpu.pipeline_mode<synchronous>, transform_indices = @transform_16, window_bounds = array<i64: 1, 1024>}, {pipeline_mode = #tpu.pipeline_mode<synchronous>, transform_indices = @transform_17, window_bounds = array<i64: 1, 1024>}, {pipeline_mode = #tpu.pipeline_mode<synchronous>, transform_indices = @transform_18, window_bounds = array<i64: 1024, 256>}, {pipeline_mode = #tpu.pipeline_mode<synchronous>, transform_indices = @transform_19, window_bounds = array<i64: 256, 1024>}, {pipeline_mode = #tpu.pipeline_mode<synchronous>, transform_indices = @transform_20, window_bounds = array<i64: 1024, 128>}, {pipeline_mode = #tpu.pipeline_mode<synchronous>, transform_indices = @transform_21, window_bounds = array<i64: 8, 256>}, {pipeline_mode = #tpu.pipeline_mode<synchronous>, transform_indices = @transform_22, window_bounds = array<i64: 8, 128>}, {pipeline_mode = #tpu.pipeline_mode<synchronous>, transform_indices = @transform_23, window_bounds = array<i64: 2, 128>}, {pipeline_mode = #tpu.pipeline_mode<synchronous>, transform_indices = @transform_24, window_bounds = array<i64: 12, 256>}, {pipeline_mode = #tpu.pipeline_mode<synchronous>, transform_indices = @transform_25, window_bounds = array<i64: 8, 128>}]} {
    %c0 = arith.constant 0 : index
    %c0_0 = arith.constant 0 : index
    %0 = vector.load %arg1[%c0, %c0_0] : memref<8x192xf32, #tpu.memory_space<vmem>>, vector<8x192xf32>
    %1 = arith.truncf %0 : vector<8x192xf32> to vector<8x192xbf16>
    %c0_1 = arith.constant 0 : index
    %c0_2 = arith.constant 0 : index
    %2 = vector.load %arg3[%c0_1, %c0_2] : memref<192x1024xbf16, #tpu.memory_space<vmem>>, vector<192x1024xbf16>
    %cst = arith.constant dense<0.000000e+00> : vector<8x1024xf32>
    %3 = tpu.matmul %1, %2, %cst {dimension_numbers = #tpu.dot_dimension_numbers<[1], [0], [0], [1], [0, 0, 1, 1], [], []>} : vector<8x192xbf16>, vector<192x1024xbf16>, vector<8x1024xf32> -> vector<8x1024xf32>
    %cst_3 = arith.constant 2.000000e-01 : f32
    %4 = vector.broadcast %cst_3 : f32 to vector<8x1024xf32>
    %5 = arith.mulf %4, %3 : vector<8x1024xf32>
    %6 = arith.maximumf %3, %5 : vector<8x1024xf32>
    %7 = arith.truncf %6 : vector<8x1024xf32> to vector<8x1024xbf16>
    %c0_4 = arith.constant 0 : index
    %c0_5 = arith.constant 0 : index
    %8 = vector.load %arg4[%c0_4, %c0_5] : memref<1024x256xbf16, #tpu.memory_space<vmem>>, vector<1024x256xbf16>
    %cst_6 = arith.constant dense<0.000000e+00> : vector<8x256xf32>
    %9 = tpu.matmul %7, %8, %cst_6 {dimension_numbers = #tpu.dot_dimension_numbers<[1], [0], [0], [1], [0, 0, 1, 1], [], []>} : vector<8x1024xbf16>, vector<1024x256xbf16>, vector<8x256xf32> -> vector<8x256xf32>
    %c0_7 = arith.constant 0 : index
    %c0_8 = arith.constant 0 : index
    %10 = vector.load %arg5[%c0_7, %c0_8] : memref<1x256xf32, #tpu.memory_space<vmem>>, vector<1x256xf32>
    %11 = vector.broadcast %10 : vector<1x256xf32> to vector<8x256xf32>
    %12 = arith.addf %9, %11 : vector<8x256xf32>
    %c0_9 = arith.constant 0 : index
    %c0_10 = arith.constant 0 : index
    %13 = vector.load %arg22[%c0_9, %c0_10] : memref<8x256xf32, #tpu.memory_space<vmem>>, vector<8x256xf32>
    tpu.vector_store %arg22[%c0_9, %c0_10], %12 {strides = array<i32>} : memref<8x256xf32, #tpu.memory_space<vmem>>, vector<8x256xf32>,
    %14 = vector.extract_strided_slice %12 {offsets = [0, 0], sizes = [8, 128], strides = [1, 1]} : vector<8x256xf32> to vector<8x128xf32>
    %15 = vector.extract_strided_slice %12 {offsets = [0, 128], sizes = [8, 128], strides = [1, 1]} : vector<8x256xf32> to vector<8x128xf32>
    %c0_11 = arith.constant 0 : index
    %c0_12 = arith.constant 0 : index
    %16 = vector.load %arg2[%c0_11, %c0_12] : memref<8x128xf32, #tpu.memory_space<vmem>>, vector<8x128xf32>
    %cst_13 = arith.constant 5.000000e-01 : f32
    %17 = vector.broadcast %cst_13 : f32 to vector<8x128xf32>
    %18 = arith.mulf %17, %15 : vector<8x128xf32>
    %19 = math.exp %18 : vector<8x128xf32>
    %20 = arith.mulf %16, %19 : vector<8x128xf32>
    %21 = arith.addf %20, %14 : vector<8x128xf32>
    %c0_14 = arith.constant 0 : index
    %c0_15 = arith.constant 0 : index
    %22 = vector.load %arg23[%c0_14, %c0_15] : memref<8x128xf32, #tpu.memory_space<vmem>>, vector<8x128xf32>
    tpu.vector_store %arg23[%c0_14, %c0_15], %21 {strides = array<i32>} : memref<8x128xf32, #tpu.memory_space<vmem>>, vector<8x128xf32>,
    %23 = vector.extract_strided_slice %21 {offsets = [0, 0], sizes = [2, 128], strides = [1, 1]} : vector<8x128xf32> to vector<2x128xf32>
    %24 = vector.extract_strided_slice %21 {offsets = [2, 0], sizes = [2, 128], strides = [1, 1]} : vector<8x128xf32> to vector<2x128xf32>
    %25 = arith.truncf %23 : vector<2x128xf32> to vector<2x128xbf16>
    %c0_16 = arith.constant 0 : index
    %c0_17 = arith.constant 0 : index
    %26 = vector.load %arg6[%c0_16, %c0_17] : memref<128x128xbf16, #tpu.memory_space<vmem>>, vector<128x128xbf16>
    %cst_18 = arith.constant dense<0.000000e+00> : vector<2x128xf32>
    %27 = tpu.matmul %25, %26, %cst_18 {dimension_numbers = #tpu.dot_dimension_numbers<[1], [0], [0], [1], [0, 0, 1, 1], [], []>} : vector<2x128xbf16>, vector<128x128xbf16>, vector<2x128xf32> -> vector<2x128xf32>
    %28 = arith.truncf %24 : vector<2x128xf32> to vector<2x128xbf16>
    %c0_19 = arith.constant 0 : index
    %c0_20 = arith.constant 0 : index
    %29 = vector.load %arg7[%c0_19, %c0_20] : memref<128x128xbf16, #tpu.memory_space<vmem>>, vector<128x128xbf16>
    %cst_21 = arith.constant dense<0.000000e+00> : vector<2x128xf32>
    %30 = tpu.matmul %28, %29, %cst_21 {dimension_numbers = #tpu.dot_dimension_numbers<[1], [0], [0], [1], [0, 0, 1, 1], [], []>} : vector<2x128xbf16>, vector<128x128xbf16>, vector<2x128xf32> -> vector<2x128xf32>
    %31 = arith.addf %27, %30 : vector<2x128xf32>
    %c0_22 = arith.constant 0 : index
    %c0_23 = arith.constant 0 : index
    %32 = vector.load %arg8[%c0_22, %c0_23] : memref<1x128xf32, #tpu.memory_space<vmem>>, vector<1x128xf32>
    %33 = vector.broadcast %32 : vector<1x128xf32> to vector<2x128xf32>
    %34 = arith.addf %31, %33 : vector<2x128xf32>
    %c0_24 = arith.constant 0 : index
    %c0_25 = arith.constant 0 : index
    %35 = vector.load %arg24[%c0_24, %c0_25] : memref<2x128xf32, #tpu.memory_space<vmem>>, vector<2x128xf32>
    tpu.vector_store %arg24[%c0_24, %c0_25], %34 {strides = array<i32>} : memref<2x128xf32, #tpu.memory_space<vmem>>, vector<2x128xf32>,
    %c0_26 = arith.constant 0 : index
    %c0_27 = arith.constant 0 : index
    %36 = vector.load %arg11[%c0_26, %c0_27] : memref<12x128xf32, #tpu.memory_space<vmem>>, vector<12x128xf32>
    %c0_28 = arith.constant 0 : index
    %c0_29 = arith.constant 0 : index
    %37 = vector.load %arg9[%c0_28, %c0_29] : memref<12x8xf32, #tpu.memory_space<vmem>>, vector<12x8xf32>
    %cst_30 = arith.constant dense<0.000000e+00> : vector<12x128xf32>
    %38 = tpu.matmul %37, %21, %cst_30 {dimension_numbers = #tpu.dot_dimension_numbers<[1], [0], [0], [1], [0, 0, 1, 1], [], []>} : vector<12x8xf32>, vector<8x128xf32>, vector<12x128xf32> -> vector<12x128xf32>
    %39 = arith.mulf %36, %38 : vector<12x128xf32>
    %cst_31 = arith.constant 1.000000e+00 : f32
    %40 = vector.broadcast %cst_31 : f32 to vector<12x128xf32>
    %41 = arith.subf %40, %36 : vector<12x128xf32>
    %c0_32 = arith.constant 0 : index
    %c0_33 = arith.constant 0 : index
    %42 = vector.load %arg10[%c0_32, %c0_33] : memref<12x8xf32, #tpu.memory_space<vmem>>, vector<12x8xf32>
    %cst_34 = arith.constant dense<0.000000e+00> : vector<12x128xf32>
    %43 = tpu.matmul %42, %21, %cst_34 {dimension_numbers = #tpu.dot_dimension_numbers<[1], [0], [0], [1], [0, 0, 1, 1], [], []>} : vector<12x8xf32>, vector<8x128xf32>, vector<12x128xf32> -> vector<12x128xf32>
    %44 = arith.mulf %41, %43 : vector<12x128xf32>
    %45 = arith.addf %39, %44 : vector<12x128xf32>
    %46 = arith.truncf %45 : vector<12x128xf32> to vector<12x128xbf16>
    %c0_35 = arith.constant 0 : index
    %c0_36 = arith.constant 0 : index
    %47 = vector.load %arg12[%c0_35, %c0_36] : memref<128x1024xbf16, #tpu.memory_space<vmem>>, vector<128x1024xbf16>
    %cst_37 = arith.constant dense<0.000000e+00> : vector<12x1024xf32>
    %48 = tpu.matmul %46, %47, %cst_37 {dimension_numbers = #tpu.dot_dimension_numbers<[1], [0], [0], [1], [0, 0, 1, 1], [], []>} : vector<12x128xbf16>, vector<128x1024xbf16>, vector<12x1024xf32> -> vector<12x1024xf32>
    %c0_38 = arith.constant 0 : index
    %c0_39 = arith.constant 0 : index
    %49 = vector.load %arg13[%c0_38, %c0_39] : memref<6x12xf32, #tpu.memory_space<vmem>>, vector<6x12xf32>
    %cst_40 = arith.constant dense<0.000000e+00> : vector<6x1024xf32>
    %50 = tpu.matmul %49, %48, %cst_40 {dimension_numbers = #tpu.dot_dimension_numbers<[1], [0], [0], [1], [0, 0, 1, 1], [], []>} : vector<6x12xf32>, vector<12x1024xf32>, vector<6x1024xf32> -> vector<6x1024xf32>
    %51 = arith.mulf %48, %48 : vector<12x1024xf32>
    %cst_41 = arith.constant dense<0.000000e+00> : vector<6x1024xf32>
    %52 = tpu.matmul %49, %51, %cst_41 {dimension_numbers = #tpu.dot_dimension_numbers<[1], [0], [0], [1], [0, 0, 1, 1], [], []>} : vector<6x12xf32>, vector<12x1024xf32>, vector<6x1024xf32> -> vector<6x1024xf32>
    %c0_42 = arith.constant 0 : index
    %c0_43 = arith.constant 0 : index
    %53 = vector.load %arg15[%c0_42, %c0_43] : memref<1024x64xf32, #tpu.memory_space<vmem>>, vector<1024x64xf32>
    %cst_44 = arith.constant dense<0.000000e+00> : vector<6x64xf32>
    %54 = tpu.matmul %50, %53, %cst_44 {dimension_numbers = #tpu.dot_dimension_numbers<[1], [0], [0], [1], [0, 0, 1, 1], [], []>} : vector<6x1024xf32>, vector<1024x64xf32>, vector<6x64xf32> -> vector<6x64xf32>
    %c0_45 = arith.constant 0 : index
    %c0_46 = arith.constant 0 : index
    %55 = vector.load %arg15[%c0_45, %c0_46] : memref<1024x64xf32, #tpu.memory_space<vmem>>, vector<1024x64xf32>
    %cst_47 = arith.constant dense<0.000000e+00> : vector<6x64xf32>
    %56 = tpu.matmul %52, %55, %cst_47 {dimension_numbers = #tpu.dot_dimension_numbers<[1], [0], [0], [1], [0, 0, 1, 1], [], []>} : vector<6x1024xf32>, vector<1024x64xf32>, vector<6x64xf32> -> vector<6x64xf32>
    %cst_48 = arith.constant 3.200000e+01 : f32
    %57 = vector.broadcast %cst_48 : f32 to vector<6x64xf32>
    %58 = arith.divf %54, %57 : vector<6x64xf32>
    %cst_49 = arith.constant 3.200000e+01 : f32
    %59 = vector.broadcast %cst_49 : f32 to vector<6x64xf32>
    %60 = arith.divf %56, %59 : vector<6x64xf32>
    %61 = arith.mulf %58, %58 : vector<6x64xf32>
    %62 = arith.subf %60, %61 : vector<6x64xf32>
    %cst_50 = arith.constant 9.99999974E-6 : f32
    %63 = vector.broadcast %cst_50 : f32 to vector<6x64xf32>
    %64 = arith.addf %62, %63 : vector<6x64xf32>
    %65 = math.rsqrt %64 : vector<6x64xf32>
    %c0_51 = arith.constant 0 : index
    %c0_52 = arith.constant 0 : index
    %66 = vector.load %arg16[%c0_51, %c0_52] : memref<64x1024xf32, #tpu.memory_space<vmem>>, vector<64x1024xf32>
    %cst_53 = arith.constant dense<0.000000e+00> : vector<6x1024xf32>
    %67 = tpu.matmul %65, %66, %cst_53 {dimension_numbers = #tpu.dot_dimension_numbers<[1], [0], [0], [1], [0, 0, 1, 1], [], []>} : vector<6x64xf32>, vector<64x1024xf32>, vector<6x1024xf32> -> vector<6x1024xf32>
    %c0_54 = arith.constant 0 : index
    %c0_55 = arith.constant 0 : index
    %68 = vector.load %arg17[%c0_54, %c0_55] : memref<1x1024xf32, #tpu.memory_space<vmem>>, vector<1x1024xf32>
    %69 = vector.broadcast %68 : vector<1x1024xf32> to vector<6x1024xf32>
    %70 = arith.mulf %67, %69 : vector<6x1024xf32>
    %c0_56 = arith.constant 0 : index
    %c0_57 = arith.constant 0 : index
    %71 = vector.load %arg16[%c0_56, %c0_57] : memref<64x1024xf32, #tpu.memory_space<vmem>>, vector<64x1024xf32>
    %cst_58 = arith.constant dense<0.000000e+00> : vector<6x1024xf32>
    %72 = tpu.matmul %58, %71, %cst_58 {dimension_numbers = #tpu.dot_dimension_numbers<[1], [0], [0], [1], [0, 0, 1, 1], [], []>} : vector<6x64xf32>, vector<64x1024xf32>, vector<6x1024xf32> -> vector<6x1024xf32>
    %c0_59 = arith.constant 0 : index
    %c0_60 = arith.constant 0 : index
    %73 = vector.load %arg18[%c0_59, %c0_60] : memref<1x1024xf32, #tpu.memory_space<vmem>>, vector<1x1024xf32>
    %74 = arith.mulf %72, %70 : vector<6x1024xf32>
    %75 = vector.broadcast %73 : vector<1x1024xf32> to vector<6x1024xf32>
    %76 = arith.subf %75, %74 : vector<6x1024xf32>
    %c0_61 = arith.constant 0 : index
    %c0_62 = arith.constant 0 : index
    %77 = vector.load %arg14[%c0_61, %c0_62] : memref<12x6xf32, #tpu.memory_space<vmem>>, vector<12x6xf32>
    %cst_63 = arith.constant dense<0.000000e+00> : vector<12x1024xf32>
    %78 = tpu.matmul %77, %70, %cst_63 {dimension_numbers = #tpu.dot_dimension_numbers<[1], [0], [0], [1], [0, 0, 1, 1], [], []>} : vector<12x6xf32>, vector<6x1024xf32>, vector<12x1024xf32> -> vector<12x1024xf32>
    %c0_64 = arith.constant 0 : index
    %c0_65 = arith.constant 0 : index
    %79 = vector.load %arg14[%c0_64, %c0_65] : memref<12x6xf32, #tpu.memory_space<vmem>>, vector<12x6xf32>
    %cst_66 = arith.constant dense<0.000000e+00> : vector<12x1024xf32>
    %80 = tpu.matmul %79, %76, %cst_66 {dimension_numbers = #tpu.dot_dimension_numbers<[1], [0], [0], [1], [0, 0, 1, 1], [], []>} : vector<12x6xf32>, vector<6x1024xf32>, vector<12x1024xf32> -> vector<12x1024xf32>
    %81 = arith.mulf %48, %78 : vector<12x1024xf32>
    %82 = arith.addf %81, %80 : vector<12x1024xf32>
    %cst_67 = arith.constant 2.000000e-01 : f32
    %83 = vector.broadcast %cst_67 : f32 to vector<12x1024xf32>
    %84 = arith.mulf %83, %82 : vector<12x1024xf32>
    %85 = arith.maximumf %82, %84 : vector<12x1024xf32>
    %86 = arith.truncf %85 : vector<12x1024xf32> to vector<12x1024xbf16>
    %c0_68 = arith.constant 0 : index
    %c0_69 = arith.constant 0 : index
    %87 = vector.load %arg19[%c0_68, %c0_69] : memref<1024x256xbf16, #tpu.memory_space<vmem>>, vector<1024x256xbf16>
    %cst_70 = arith.constant dense<0.000000e+00> : vector<12x256xf32>
    %88 = tpu.matmul %86, %87, %cst_70 {dimension_numbers = #tpu.dot_dimension_numbers<[1], [0], [0], [1], [0, 0, 1, 1], [], []>} : vector<12x1024xbf16>, vector<1024x256xbf16>, vector<12x256xf32> -> vector<12x256xf32>
    %89 = math.tanh %88 : vector<12x256xf32>
    %c0_71 = arith.constant 0 : index
    %c0_72 = arith.constant 0 : index
    %90 = vector.load %arg25[%c0_71, %c0_72] : memref<12x256xf32, #tpu.memory_space<vmem>>, vector<12x256xf32>
    tpu.vector_store %arg25[%c0_71, %c0_72], %89 {strides = array<i32>} : memref<12x256xf32, #tpu.memory_space<vmem>>, vector<12x256xf32>,
    %91 = vector.extract_strided_slice %89 {offsets = [0, 0], sizes = [8, 256], strides = [1, 1]} : vector<12x256xf32> to vector<8x256xf32>
    %92 = arith.truncf %91 : vector<8x256xf32> to vector<8x256xbf16>
    %c0_73 = arith.constant 0 : index
    %c0_74 = arith.constant 0 : index
    %93 = vector.load %arg20[%c0_73, %c0_74] : memref<256x1024xbf16, #tpu.memory_space<vmem>>, vector<256x1024xbf16>
    %cst_75 = arith.constant dense<0.000000e+00> : vector<8x1024xf32>
    %94 = tpu.matmul %92, %93, %cst_75 {dimension_numbers = #tpu.dot_dimension_numbers<[1], [0], [0], [1], [0, 0, 1, 1], [], []>} : vector<8x256xbf16>, vector<256x1024xbf16>, vector<8x1024xf32> -> vector<8x1024xf32>
    %cst_76 = arith.constant 2.000000e-01 : f32
    %95 = vector.broadcast %cst_76 : f32 to vector<8x1024xf32>
    %96 = arith.mulf %95, %94 : vector<8x1024xf32>
    %97 = arith.maximumf %94, %96 : vector<8x1024xf32>
    %98 = arith.truncf %97 : vector<8x1024xf32> to vector<8x1024xbf16>
    %c0_77 = arith.constant 0 : index
    %c0_78 = arith.constant 0 : index
    %99 = vector.load %arg21[%c0_77, %c0_78] : memref<1024x128xbf16, #tpu.memory_space<vmem>>, vector<1024x128xbf16>
    %cst_79 = arith.constant dense<0.000000e+00> : vector<8x128xf32>
    %100 = tpu.matmul %98, %99, %cst_79 {dimension_numbers = #tpu.dot_dimension_numbers<[1], [0], [0], [1], [0, 0, 1, 1], [], []>} : vector<8x1024xbf16>, vector<1024x128xbf16>, vector<8x128xf32> -> vector<8x128xf32>
    %cst_80 = arith.constant 0.000000e+00 : f32
    %101 = vector.broadcast %cst_80 : f32 to vector<8x128xf32>
    %102 = arith.subf %101, %100 : vector<8x128xf32>
    %103 = math.exp %102 : vector<8x128xf32>
    %cst_81 = arith.constant 1.000000e+00 : f32
    %104 = vector.broadcast %cst_81 : f32 to vector<8x128xf32>
    %105 = arith.addf %104, %103 : vector<8x128xf32>
    %cst_82 = arith.constant 1.000000e+00 : f32
    %106 = vector.broadcast %cst_82 : f32 to vector<8x128xf32>
    %107 = arith.divf %106, %105 : vector<8x128xf32>
    %c0_83 = arith.constant 0 : index
    %c0_84 = arith.constant 0 : index
    %108 = vector.load %arg26[%c0_83, %c0_84] : memref<8x128xf32, #tpu.memory_space<vmem>>, vector<8x128xf32>
    tpu.vector_store %arg26[%c0_83, %c0_84], %107 {strides = array<i32>} : memref<8x128xf32, #tpu.memory_space<vmem>>, vector<8x128xf32>,
    return
  }
  func.func @transform_0(%arg0: i32) -> (i32, i32) {
    %c0_i32 = arith.constant 0 : i32
    %c0_i32_0 = arith.constant 0 : i32
    %c0_i32_1 = arith.constant 0 : i32
    return %c0_i32, %c0_i32_0 : i32, i32
  }
  func.func @transform_1(%arg0: i32) -> (i32, i32) {
    %c0_i32 = arith.constant 0 : i32
    %c0_i32_0 = arith.constant 0 : i32
    %c0_i32_1 = arith.constant 0 : i32
    return %c0_i32, %c0_i32_0 : i32, i32
  }
  func.func @transform_2(%arg0: i32) -> (i32, i32) {
    %c0_i32 = arith.constant 0 : i32
    %c0_i32_0 = arith.constant 0 : i32
    %c0_i32_1 = arith.constant 0 : i32
    return %c0_i32, %c0_i32_0 : i32, i32
  }
  func.func @transform_3(%arg0: i32) -> (i32, i32) {
    %c0_i32 = arith.constant 0 : i32
    %c0_i32_0 = arith.constant 0 : i32
    %c0_i32_1 = arith.constant 0 : i32
    return %c0_i32, %c0_i32_0 : i32, i32
  }
  func.func @transform_4(%arg0: i32) -> (i32, i32) {
    %c0_i32 = arith.constant 0 : i32
    %c0_i32_0 = arith.constant 0 : i32
    %c0_i32_1 = arith.constant 0 : i32
    return %c0_i32, %c0_i32_0 : i32, i32
  }
  func.func @transform_5(%arg0: i32) -> (i32, i32) {
    %c0_i32 = arith.constant 0 : i32
    %c0_i32_0 = arith.constant 0 : i32
    %c0_i32_1 = arith.constant 0 : i32
    return %c0_i32, %c0_i32_0 : i32, i32
  }
  func.func @transform_6(%arg0: i32) -> (i32, i32) {
    %c0_i32 = arith.constant 0 : i32
    %c0_i32_0 = arith.constant 0 : i32
    %c0_i32_1 = arith.constant 0 : i32
    return %c0_i32, %c0_i32_0 : i32, i32
  }
  func.func @transform_7(%arg0: i32) -> (i32, i32) {
    %c0_i32 = arith.constant 0 : i32
    %c0_i32_0 = arith.constant 0 : i32
    %c0_i32_1 = arith.constant 0 : i32
    return %c0_i32, %c0_i32_0 : i32, i32
  }
  func.func @transform_8(%arg0: i32) -> (i32, i32) {
    %c0_i32 = arith.constant 0 : i32
    %c0_i32_0 = arith.constant 0 : i32
    %c0_i32_1 = arith.constant 0 : i32
    return %c0_i32, %c0_i32_0 : i32, i32
  }
  func.func @transform_9(%arg0: i32) -> (i32, i32) {
    %c0_i32 = arith.constant 0 : i32
    %c0_i32_0 = arith.constant 0 : i32
    %c0_i32_1 = arith.constant 0 : i32
    return %c0_i32, %c0_i32_0 : i32, i32
  }
  func.func @transform_10(%arg0: i32) -> (i32, i32) {
    %c0_i32 = arith.constant 0 : i32
    %c0_i32_0 = arith.constant 0 : i32
    %c0_i32_1 = arith.constant 0 : i32
    return %c0_i32, %c0_i32_0 : i32, i32
  }
  func.func @transform_11(%arg0: i32) -> (i32, i32) {
    %c0_i32 = arith.constant 0 : i32
    %c0_i32_0 = arith.constant 0 : i32
    %c0_i32_1 = arith.constant 0 : i32
    return %c0_i32, %c0_i32_0 : i32, i32
  }
  func.func @transform_12(%arg0: i32) -> (i32, i32) {
    %c0_i32 = arith.constant 0 : i32
    %c0_i32_0 = arith.constant 0 : i32
    %c0_i32_1 = arith.constant 0 : i32
    return %c0_i32, %c0_i32_0 : i32, i32
  }
  func.func @transform_13(%arg0: i32) -> (i32, i32) {
    %c0_i32 = arith.constant 0 : i32
    %c0_i32_0 = arith.constant 0 : i32
    %c0_i32_1 = arith.constant 0 : i32
    return %c0_i32, %c0_i32_0 : i32, i32
  }
  func.func @transform_14(%arg0: i32) -> (i32, i32) {
    %c0_i32 = arith.constant 0 : i32
    %c0_i32_0 = arith.constant 0 : i32
    %c0_i32_1 = arith.constant 0 : i32
    return %c0_i32, %c0_i32_0 : i32, i32
  }
  func.func @transform_15(%arg0: i32) -> (i32, i32) {
    %c0_i32 = arith.constant 0 : i32
    %c0_i32_0 = arith.constant 0 : i32
    %c0_i32_1 = arith.constant 0 : i32
    return %c0_i32, %c0_i32_0 : i32, i32
  }
  func.func @transform_16(%arg0: i32) -> (i32, i32) {
    %c0_i32 = arith.constant 0 : i32
    %c0_i32_0 = arith.constant 0 : i32
    %c0_i32_1 = arith.constant 0 : i32
    return %c0_i32, %c0_i32_0 : i32, i32
  }
  func.func @transform_17(%arg0: i32) -> (i32, i32) {
    %c0_i32 = arith.constant 0 : i32
    %c0_i32_0 = arith.constant 0 : i32
    %c0_i32_1 = arith.constant 0 : i32
    return %c0_i32, %c0_i32_0 : i32, i32
  }
  func.func @transform_18(%arg0: i32) -> (i32, i32) {
    %c0_i32 = arith.constant 0 : i32
    %c0_i32_0 = arith.constant 0 : i32
    %c0_i32_1 = arith.constant 0 : i32
    return %c0_i32, %c0_i32_0 : i32, i32
  }
  func.func @transform_19(%arg0: i32) -> (i32, i32) {
    %c0_i32 = arith.constant 0 : i32
    %c0_i32_0 = arith.constant 0 : i32
    %c0_i32_1 = arith.constant 0 : i32
    return %c0_i32, %c0_i32_0 : i32, i32
  }
  func.func @transform_20(%arg0: i32) -> (i32, i32) {
    %c0_i32 = arith.constant 0 : i32
    %c0_i32_0 = arith.constant 0 : i32
    %c0_i32_1 = arith.constant 0 : i32
    return %c0_i32, %c0_i32_0 : i32, i32
  }
  func.func @transform_21(%arg0: i32) -> (i32, i32) {
    %c0_i32 = arith.constant 0 : i32
    %c0_i32_0 = arith.constant 0 : i32
    %c0_i32_1 = arith.constant 0 : i32
    return %c0_i32, %c0_i32_0 : i32, i32
  }
  func.func @transform_22(%arg0: i32) -> (i32, i32) {
    %c0_i32 = arith.constant 0 : i32
    %c0_i32_0 = arith.constant 0 : i32
    %c0_i32_1 = arith.constant 0 : i32
    return %c0_i32, %c0_i32_0 : i32, i32
  }
  func.func @transform_23(%arg0: i32) -> (i32, i32) {
    %c0_i32 = arith.constant 0 : i32
    %c0_i32_0 = arith.constant 0 : i32
    %c0_i32_1 = arith.constant 0 : i32
    return %c0_i32, %c0_i32_0 : i32, i32
  }
  func.func @transform_24(%arg0: i32) -> (i32, i32) {
    %c0_i32 = arith.constant 0 : i32
    %c0_i32_0 = arith.constant 0 : i32
    %c0_i32_1 = arith.constant 0 : i32
    return %c0_i32, %c0_i32_0 : i32, i32
  }
  func.func @transform_25(%arg0: i32) -> (i32, i32) {
    %c0_i32 = arith.constant 0 : i32
    %c0_i32_0 = arith.constant 0 : i32
    %c0_i32_1 = arith.constant 0 : i32
    return %c0_i32, %c0_i32_0 : i32, i32
  }
}

</mosaic_0001>

<bundles_post_ra>
// kernel: recombined_gan_forward.1
= control target key start
LH: loop header
LB: loop body
LE: loop exit
PB: predicated region body
PF: predicated region fallthrough
CT: control target
= control target key end

     0   :  { %s13067_s0 = inlined_call_operand.vmem [shape: f32[8,192], index: 0, kind: input, shape index: {}]   ;;  %s13068_s1 = inlined_call_operand.vmem [shape: f32[8,128], index: 1, kind: input, shape index: {}]   ;;  %s13069_s2 = inlined_call_operand.hbm [shape: bf16[192,1024], index: 2, kind: input, shape index: {}]   ;;  %s13070_s3 = inlined_call_operand.vmem [shape: bf16[1024,256], index: 3, kind: input, shape index: {}]   ;;  %s13071_s4 = inlined_call_operand.vmem [shape: f32[1,256], index: 4, kind: input, shape index: {}]   ;;  %s13072_s5 = inlined_call_operand.vmem [shape: bf16[128,128], index: 5, kind: input, shape index: {}]   ;;  %s13073_s6 = inlined_call_operand.hbm [shape: bf16[128,128], index: 6, kind: input, shape index: {}]   ;;  %s13074_s7 = inlined_call_operand.hbm [shape: f32[1,128], index: 7, kind: input, shape index: {}]   ;;  %s13075_s8 = inlined_call_operand.vmem [shape: f32[12,8], index: 8, kind: input, shape index: {}]   ;;  %s13076_s9 = inlined_call_operand.vmem [shape: f32[12,8], index: 9, kind: input, shape index: {}]   ;;  %s13077_s10 = inlined_call_operand.vmem [shape: f32[12,128], index: 10, kind: input, shape index: {}]   ;;  %s13078_s11 = inlined_call_operand.hbm [shape: bf16[128,1024], index: 11, kind: input, shape index: {}]   ;;  %s13079_s12 = inlined_call_operand.hbm [shape: f32[6,12], index: 12, kind: input, shape index: {}]   ;;  %s13080_s13 = inlined_call_operand.vmem [shape: f32[12,6], index: 13, kind: input, shape index: {}]   ;;  %s13081_s14 = inlined_call_operand.vmem [shape: f32[1024,64], index: 14, kind: input, shape index: {}]   ;;  %s13082_s15 = inlined_call_operand.hbm [shape: f32[64,1024], index: 15, kind: input, shape index: {}]   ;;  %s13083_s16 = inlined_call_operand.hbm [shape: f32[1,1024], index: 16, kind: input, shape index: {}]   ;;  %s13084_s17 = inlined_call_operand.hbm [shape: f32[1,1024], index: 17, kind: input, shape index: {}]   ;;  %s13085_s18 = inlined_call_operand.vmem [shape: bf16[1024,256], index: 18, kind: input, shape index: {}]   ;;  %s13086_s19 = inlined_call_operand.vmem [shape: bf16[256,1024], index: 19, kind: input, shape index: {}]   ;;  %s13087_s20 = inlined_call_operand.hbm [shape: bf16[1024,128], index: 20, kind: input, shape index: {}]   ;;  %s13088_s21 = inlined_call_operand.vmem [shape: f32[8,256], index: 21, kind: output, shape index: {0}]   ;;  %s13089_s22 = inlined_call_operand.vmem [shape: f32[8,128], index: 22, kind: output, shape index: {1}]   ;;  %s13090_s23 = inlined_call_operand.vmem [shape: f32[2,128], index: 23, kind: output, shape index: {2}]   ;;  %s13091_s24 = inlined_call_operand.vmem [shape: f32[12,256], index: 24, kind: output, shape index: {3}]   ;;  %s13092_s25 = inlined_call_operand.vmem [shape: f32[8,128], index: 25, kind: output, shape index: {4}]  }
   0x1   :  { %13194 = sst [smem:[#allocation108_spill]] %s13067_s0 }
   0x2   :  { %13195 = sst [smem:[#allocation109_spill]] %s13068_s1 }
   0x3   :  { %13196 = sst [smem:[#allocation110_spill]] %s13069_s2 }
   0x4   :  { %13197 = sst [smem:[#allocation111_spill]] %s13070_s3 }
   0x5   :  { %13198 = sst [smem:[#allocation112_spill]] %s13071_s4 }
   0x6   :  { %13199 = sst [smem:[#allocation113_spill]] %s13072_s5 }
   0x7   :  { %13200 = sst [smem:[#allocation114_spill]] %s13073_s6 }
   0x8   :  { %13201 = sst [smem:[#allocation115_spill]] %s13074_s7 }
   0x9   :  { %13202 = sst [smem:[#allocation116_spill]] %s13075_s8 }
   0xa   :  { %13203 = sst [smem:[#allocation117_spill]] %s13076_s9 }
   0xb   :  { %31 = vsyncpa [#allocation3], 0 }
   0xc   :  { %32 = vsyncpa [#allocation5], 0 }
   0xd   :  { %33 = vsyncpa [#allocation8], 0 }
   0xe   :  { %34 = vsyncpa [#allocation11], 0 }
   0xf   :  { %35 = vsyncpa [#allocation14], 0  ;;  %s10129_s29 = smov [#allocation4]  }
  0x10   :  { %s63_s2 = sshll.u32 %s10129_s29, 4  ;;  %s64_s2 = int_to_ptr.vmem [resolvable:$true] %s63_s2 }
  0x11   :  { %s9947_s6 = scalar_lea.vmem %s64_s2, 1024  ;;  %p9952_p1 = scmp.lt.s32.totalorder %s64_s2, %s64_s2 }
  0x12   :  { %p9948_p0 = scmp.ne.s32.totalorder %s64_s2, %s9947_s6  ;;  %p9953_p2 = scmp.lt.s32.totalorder %s9947_s6, %s9947_s6 }
  0x14   :  { %p9954_p3 = por %p9953_p2, %p9952_p1 }
  0x16   :  { %p9955_p4 = pnand %p9954_p3, %p9948_p0 }
  0x18   :  { %9958 = shalt.err (!%p9955_p4)
}
  0x19   :  { %s10130_s30 = smov 64   ;;  %s13098_s7 = smov 4  }
  0x1a   :  { %s13204_s1 = sld [smem:[#allocation114_spill]]  ;;  %s10132_s8 = smov [#allocation7]  }
  0x1b   :  { %s91_s27 = sshll.u32 %s10132_s8, 4  ;;  %s10133_s4 = smov [#allocation10]   ;;  %s92_s27 = int_to_ptr.vmem [resolvable:$true] %s91_s27 }
  0x1c   :  { %s117_s28 = sshll.u32 %s10133_s4, 4  ;;  %s9967_s9 = scalar_lea.vmem %s92_s27, 8192  ;;  %s118_s28 = int_to_ptr.vmem [resolvable:$true] %s117_s28 }
  0x1d   :  { %p9968_p5 = scmp.ne.s32.totalorder %s92_s27, %s9967_s9  ;;  %p9972_p6 = scmp.lt.s32.totalorder %s92_s27, %s92_s27 }
  0x1e   :  { %p9973_p7 = scmp.lt.s32.totalorder %s9967_s9, %s9967_s9 }
  0x20   :  { %69 = dma.hbm_to_vmem [thread:$0]  %s13204_s1, 1024, %s64_s2, [#allocation5], %s10130_s30, %s10130_s30, %s13098_s7  }
  0x21   :  { %p9974_p8 = por %p9973_p7, %p9972_p6 }
  0x23   :  { %p9975_p9 = pnand %p9974_p8, %p9968_p5 }
  0x25   :  { %9978 = shalt.err (!%p9975_p9)
}
  0x26   :  { %s10134_s5 = smov 512   ;;  %s10135_s0 = smov 32  }
  0x27   :  { %97 = dma.hbm_to_vmem [thread:$0]  %s13078_s11, 8192, %s92_s27, [#allocation8], %s10134_s5, %s10134_s5, %s10135_s0  }
  0x28   :  { %s9987_s2 = scalar_lea.vmem %s118_s28, 8192  ;;  %p9992_p11 = scmp.lt.s32.totalorder %s118_s28, %s118_s28 }
  0x29   :  { %p9988_p10 = scmp.ne.s32.totalorder %s118_s28, %s9987_s2  ;;  %p9993_p12 = scmp.lt.s32.totalorder %s9987_s2, %s9987_s2 }
  0x2b   :  { %p9994_p13 = por %p9993_p12, %p9992_p11 }
  0x2d   :  { %p9995_p0 = pnand %p9994_p13, %p9988_p10 }
  0x2f   :  { %9998 = shalt.err (!%p9995_p0)
}
  0x30   :  { %s10136_s3 = smov 1024   ;;  %s10137_s8 = smov [#allocation13]  }
  0x31   :  { %123 = dma.hbm_to_vmem [thread:$0]  %s13082_s15, 8192, %s118_s28, [#allocation11], %s10136_s3, %s10136_s3, %s10130_s30  }
  0x32   :  { %s140_s4 = sshll.u32 %s10137_s8, 4  ;;  %s10138_s9 = smov [#allocation2]   ;;  %s141_s4 = int_to_ptr.vmem [resolvable:$true] %s140_s4 }
  0x33   :  { %s45_s7 = sshll.u32 %s10138_s9, 4  ;;  %s10007_s11 = scalar_lea.vmem %s141_s4, 128  ;;  %s46_s7 = int_to_ptr.vmem [resolvable:$true] %s45_s7 }
  0x34   :  { %p10008_p1 = scmp.ne.s32.totalorder %s141_s4, %s10007_s11  ;;  %p10012_p2 = scmp.lt.s32.totalorder %s141_s4, %s141_s4 }
  0x35   :  { %p10013_p3 = scmp.lt.s32.totalorder %s10007_s11, %s10007_s11 }
  0x37   :  { %p10014_p4 = por %p10013_p3, %p10012_p2 }
  0x39   :  { %p10015_p5 = pnand %p10014_p4, %p10008_p1 }
  0x3b   :  { %10018 = shalt.err (!%p10015_p5)
}
  0x3c   :  { %143 = dma.hbm_to_vmem [thread:$0]  %s13084_s17, 128, %s141_s4, [#allocation14]  }
  0x3d   :  { %s10027_s6 = scalar_lea.vmem %s46_s7, 12288  ;;  %p10032_p7 = scmp.lt.s32.totalorder %s46_s7, %s46_s7 }
  0x3e   :  { %p10028_p6 = scmp.ne.s32.totalorder %s46_s7, %s10027_s6  ;;  %p10033_p8 = scmp.lt.s32.totalorder %s10027_s6, %s10027_s6 }
  0x40   :  { %p10034_p9 = por %p10033_p8, %p10032_p7 }
  0x42   :  { %p10035_p10 = pnand %p10034_p9, %p10028_p6 }
  0x44   :  { %10038 = shalt.err (!%p10035_p10)
}
  0x45   :  { %s13205_s2 = sld [smem:[#allocation110_spill]]  ;;  %s10139_s3 = smov [#allocation6]  }
  0x46   :  { %s76_s26 = sshll.u32 %s10139_s3, 4  ;;  %s10140_s1 = smov [#allocation9]   ;;  %s77_s26 = int_to_ptr.vmem [resolvable:$true] %s76_s26 }
  0x47   :  { %s104_s8 = sshll.u32 %s10140_s1, 4  ;;  %s10047_s17 = scalar_lea.vmem %s77_s26, 16  ;;  %s105_s8 = int_to_ptr.vmem [resolvable:$true] %s104_s8 }
  0x48   :  { %p10048_p11 = scmp.ne.s32.totalorder %s77_s26, %s10047_s17  ;;  %s10051_s4 = scalar_lea.vmem %s77_s26, 32 }
  0x49   :  { %p10052_p12 = scmp.lt.s32.totalorder %s77_s26, %s77_s26  ;;  %p10053_p13 = scmp.lt.s32.totalorder %s10051_s4, %s10047_s17 }
  0x4b   :  { %51 = dma.hbm_to_vmem [thread:$0]  %s13205_s2, 12288, %s46_s7, [#allocation3], %s10134_s5, %s10134_s5, %s10135_s0  }
  0x4c   :  { %p10054_p0 = por %p10053_p13, %p10052_p12 }
  0x4e   :  { %p10055_p1 = pnand %p10054_p0, %p10048_p11 }
  0x50   :  { %10058 = shalt.err (!%p10055_p1)
}
  0x51   :  { %s13206_s27 = sld [smem:[#allocation115_spill]]  ;;  %s10067_s29 = scalar_lea.vmem %s105_s8, 128 }
  0x52   :  { %p10068_p2 = scmp.ne.s32.totalorder %s105_s8, %s10067_s29  ;;  %p10072_p3 = scmp.lt.s32.totalorder %s105_s8, %s105_s8 }
  0x53   :  { %p10073_p4 = scmp.lt.s32.totalorder %s10067_s29, %s10067_s29 }
  0x55   :  { %p10074_p5 = por %p10073_p4, %p10072_p3 }
  0x57   :  { %79 = dma.hbm_to_vmem [thread:$0]  %s13206_s27, 16, %s77_s26, [#allocation5]  }
  0x58   :  { %p10075_p6 = pnand %p10074_p5, %p10068_p2 }
  0x5a   :  { %10078 = shalt.err (!%p10075_p6)
}
  0x5b   :  { %107 = dma.hbm_to_vmem [thread:$0]  %s13079_s12, 128, %s105_s8, [#allocation8]  }
  0x5c   :  { %s10141_s0 = smov [#allocation12]   ;;  %s10142_s15 = smov [#allocation15]  }
  0x5d   :  { %s130_s6 = sshll.u32 %s10141_s0, 4  ;;  %s153_s28 = sshll.u32 %s10142_s15, 4  ;;  %s131_s6 = int_to_ptr.vmem [resolvable:$true] %s130_s6  ;;  %s154_s28 = int_to_ptr.vmem [resolvable:$true] %s153_s28 }
  0x5e   :  { %s10087_s2 = scalar_lea.vmem %s131_s6, 128  ;;  %p10092_p8 = scmp.lt.s32.totalorder %s131_s6, %s131_s6 }
  0x5f   :  { %p10088_p7 = scmp.ne.s32.totalorder %s131_s6, %s10087_s2  ;;  %p10093_p9 = scmp.lt.s32.totalorder %s10087_s2, %s10087_s2 }
  0x61   :  { %p10094_p10 = por %p10093_p9, %p10092_p8 }
  0x63   :  { %p10095_p11 = pnand %p10094_p10, %p10088_p7 }
  0x65   :  { %10098 = shalt.err (!%p10095_p11)
}
  0x66   :  { %133 = dma.hbm_to_vmem [thread:$0]  %s13083_s16, 128, %s131_s6, [#allocation11]  }
  0x67   :  { %s10107_s1 = scalar_lea.vmem %s154_s28, 8192  ;;  %p10112_p13 = scmp.lt.s32.totalorder %s154_s28, %s154_s28 }
  0x68   :  { %p10108_p12 = scmp.ne.s32.totalorder %s154_s28, %s10107_s1  ;;  %p10113_p0 = scmp.lt.s32.totalorder %s10107_s1, %s10107_s1 }
  0x6a   :  { %p10114_p1 = por %p10113_p0, %p10112_p13 }
  0x6c   :  { %p10115_p2 = pnand %p10114_p1, %p10108_p12 }
  0x6e   :  { %10118 = shalt.err (!%p10115_p2)
}
  0x6f   :  { %s13207_s12 = smov 4  }
  0x70   :  { %159 = dma.hbm_to_vmem [thread:$0]  %s13087_s20, 8192, %s154_s28, [#allocation14], %s10130_s30, %s10130_s30, %s13207_s12  }
  0x71   :  { %10119 = dma.done.wait [#allocation3], 12288  }
  0x72   :  { %10120 = vsyncadd [#allocation3], 4294955008 }
  0x73   :  { %10121 = dma.done.wait [#allocation5], 1040  }
  0x74   :  { %10122 = vsyncadd [#allocation5], 4294966256 }
  0x75   :  { %10123 = dma.done.wait [#allocation8], 8320  }
  0x76   :  { %10124 = vsyncadd [#allocation8], 4294958976 }
  0x77   :  { %10125 = dma.done.wait [#allocation11], 8320  }
  0x78   :  { %10126 = vsyncadd [#allocation11], 4294958976 }
  0x79   :  { %10127 = dma.done.wait [#allocation14], 8320  }
  0x7a   :  { %10128 = vsyncadd [#allocation14], 4294958976  ;;  %v248_v0 = vld [vmem:[#allocation2 + $0x1c0] sm:$0xff]  ;;  %v249_v2 = vld [vmem:[#allocation2 + $0x1c8] sm:$0xff]  ;;  %s13208_s30 = sld [smem:[#allocation108_spill]]  ;;  %vm768_vm0 = vcmask 523264  }
  0x7b   :  { %v252_v1 = vld [vmem:[#allocation2 + $0x1e0] sm:$0xff]  ;;  %v253_v4 = vld [vmem:[#allocation2 + $0x1e8] sm:$0xff]  ;;  %s13209_s29 = sld [smem:[#allocation111_spill]]  ;;  %vm10144_vm1 = vmmov 0   ;;  %vm2138_vm2 = vcmask 64512   ;;  %vm2873_vm3 = vcmask 1043456  }
  0x7c   :  { %v8360_v3 = vcombine.high %v248_v0, %v252_v1  ;;  %v8359_v5 = vcombine.low %v248_v0, %v252_v1  ;;  %v240_v6 = vld [vmem:[#allocation2 + $0x180] sm:$0xff]  ;;  %v8362_v8 = vcombine.high %v249_v2, %v253_v4  ;;  %v8361_v9 = vcombine.low %v249_v2, %v253_v4  ;;  %v241_v11 = vld [vmem:[#allocation2 + $0x188] sm:$0xff]  ;;  %s13210_s4 = sld [smem:[#allocation113_spill]] }
  0x7d   :  { %v244_v7 = vld [vmem:[#allocation2 + $0x1a0] sm:$0xff]  ;;  %v245_v12 = vld [vmem:[#allocation2 + $0x1a8] sm:$0xff]  ;;  %s13213_s17 = sld [smem:[#allocation112_spill]]  ;;  %vm2869_vm4 = vcmask 97280   ;;  %vm4956_vm5 = vcmask 1045504   ;;  %vm4949_vm6 = vcmask 48128  }
  0x7e   :  { %v8352_v10 = vcombine.high %v240_v6, %v244_v7  ;;  %v232_v13 = vld [vmem:[#allocation2 + $0x140] sm:$0xff]  ;;  %772 = vmatprep.subr.bf16.mxu0 %v8360_v3  ;;  %v8354_v14 = vcombine.high %v241_v11, %v245_v12  ;;  %v233_v16 = vld [vmem:[#allocation2 + $0x148] sm:$0xff]  ;;  %813 = vmatprep.subr.bf16.mxu1 %v8362_v8  ;;  %v8351_v18 = vcombine.low %v240_v6, %v244_v7  ;;  %s13215_s11 = sld [smem:[#allocation109_spill]] }
  0x7f   :  { %v236_v15 = vld [vmem:[#allocation2 + $0x160] sm:$0xff]  ;;  %v237_v17 = vld [vmem:[#allocation2 + $0x168] sm:$0xff]  ;;  %773 = vmatpush1.bf16.msra.mxu0 %v8359_v5  ;;  %814 = vmatpush1.bf16.msra.mxu1 %v8361_v9  ;;  %v8353_v19 = vcombine.low %v241_v11, %v245_v12  ;;  %s13216_s0 = sld [smem:[#allocation117_spill]] }
  0x80   :  { %774 = vmatprep.subr.bf16.mxu0 %v8352_v10  ;;  %v8344_v20 = vcombine.high %v232_v13, %v236_v15  ;;  %815 = vmatprep.subr.bf16.mxu1 %v8354_v14  ;;  %v8346_v21 = vcombine.high %v233_v16, %v237_v17  ;;  %v224_v22 = vld [vmem:[#allocation2 + $0x100] sm:$0xff]  ;;  %v225_v24 = vld [vmem:[#allocation2 + $0x108] sm:$0xff]  ;;  %v8343_v26 = vcombine.low %v232_v13, %v236_v15  ;;  %s13217_s28 = sld [smem:[#allocation116_spill]] }
  0x81   :  { %v228_v23 = vld [vmem:[#allocation2 + $0x120] sm:$0xff]  ;;  %v229_v25 = vld [vmem:[#allocation2 + $0x128] sm:$0xff]  ;;  %v8345_v27 = vcombine.low %v233_v16, %v237_v17 }
  0x82   :  { %v8336_v28 = vcombine.high %v224_v22, %v228_v23  ;;  %v8338_v29 = vcombine.high %v225_v24, %v229_v25  ;;  %v216_v30 = vld [vmem:[#allocation2 + $0xc0] sm:$0xff]  ;;  %v217_v32 = vld [vmem:[#allocation2 + $0xc8] sm:$0xff]  ;;  %v8335_v34 = vcombine.low %v224_v22, %v228_v23  ;;  %v8337_v35 = vcombine.low %v225_v24, %v229_v25 }
  0x83   :  { %775 = vmatpush1.bf16.msra.mxu0 %v8351_v18  ;;  %816 = vmatpush1.bf16.msra.mxu1 %v8353_v19  ;;  %v220_v31 = vld [vmem:[#allocation2 + $0xe0] sm:$0xff]  ;;  %v221_v33 = vld [vmem:[#allocation2 + $0xe8] sm:$0xff] }
  0x84   :  { %776 = vmatprep.subr.bf16.mxu0 %v8344_v20  ;;  %817 = vmatprep.subr.bf16.mxu1 %v8346_v21  ;;  %v8328_v36 = vcombine.high %v216_v30, %v220_v31  ;;  %v8330_v37 = vcombine.high %v217_v32, %v221_v33  ;;  %v208_v38 = vld [vmem:[#allocation2 + $0x80] sm:$0xff]  ;;  %v209_v40 = vld [vmem:[#allocation2 + $0x88] sm:$0xff]  ;;  %v8327_v42 = vcombine.low %v216_v30, %v220_v31  ;;  %v250_v31 = vld [vmem:[#allocation2 + $0x1d0] sm:$0xff] }
  0x85   :  { %v212_v39 = vld [vmem:[#allocation2 + $0xa0] sm:$0xff]  ;;  %v213_v41 = vld [vmem:[#allocation2 + $0xa8] sm:$0xff]  ;;  %v8329_v44 = vcombine.low %v217_v32, %v221_v33  ;;  %v254_v32 = vld [vmem:[#allocation2 + $0x1f0] sm:$0xff] }
  0x86   :  { %v189_v43 = vld [vmem:[%s13208_s30 + $0x8] sm:$0xff]  ;;  %v8320_v45 = vcombine.high %v208_v38, %v212_v39  ;;  %v8322_v47 = vcombine.high %v209_v40, %v213_v41  ;;  %v200_v48 = vld [vmem:[#allocation2 + $0x40] sm:$0xff]  ;;  %v8319_v52 = vcombine.low %v208_v38, %v212_v39  ;;  %v8321_v53 = vcombine.low %v209_v40, %v213_v41  ;;  %v242_v40 = vld [vmem:[#allocation2 + $0x190] sm:$0xff] }
  0x87   :  { %777 = vmatpush1.bf16.msra.mxu0 %v8343_v26  ;;  %818 = vmatpush1.bf16.msra.mxu1 %v8345_v27  ;;  %v10319_v46 = vpack.c.bf16 %v189_v43, %v189_v43  ;;  %v204_v49 = vld [vmem:[#allocation2 + $0x60] sm:$0xff]  ;;  %v201_v50 = vld [vmem:[#allocation2 + $0x48] sm:$0xff]  ;;  %v8364_v39 = vcombine.high %v250_v31, %v254_v32  ;;  %v246_v41 = vld [vmem:[#allocation2 + $0x1b0] sm:$0xff] }
  0x88   :  { %778 = vmatprep.subr.bf16.mxu0 %v8336_v28  ;;  %819 = vmatprep.subr.bf16.mxu1 %v8338_v29  ;;  %v205_v51 = vld [vmem:[#allocation2 + $0x68] sm:$0xff]  ;;  %v8312_v54 = vcombine.high %v200_v48, %v204_v49  ;;  %v192_v56 = vld [vmem:[#allocation2] sm:$0xff]  ;;  %v8311_v60 = vcombine.low %v200_v48, %v204_v49  ;;  %v243_v43 = vld [vmem:[#allocation2 + $0x198] sm:$0xff]  ;;  %v8356_v49 = vcombine.high %v242_v40, %v246_v41 }
  0x89   :  { %8399 = vmatprep.mubr.msk.bf16.mxu0 %vm768_vm0, %v10319_v46  ;;  %8400 = vmatprep.mubr.msk.bf16.mxu1 %vm768_vm0, %v10319_v46  ;;  %v8314_v55 = vcombine.high %v201_v50, %v205_v51  ;;  %v196_v57 = vld [vmem:[#allocation2 + $0x20] sm:$0xff]  ;;  %v193_v58 = vld [vmem:[#allocation2 + $0x8] sm:$0xff]  ;;  %v8313_v61 = vcombine.low %v201_v50, %v205_v51  ;;  %v234_v50 = vld [vmem:[#allocation2 + $0x150] sm:$0xff] }
  0x8a   :  { %v197_v59 = vld [vmem:[#allocation2 + $0x28] sm:$0xff]  ;;  %v8304_v62 = vcombine.high %v192_v56, %v196_v57  ;;  %v280_v0 = vld [vmem:[#allocation2 + $0x2c0] sm:$0xff]  ;;  %v8303_v4 = vcombine.low %v192_v56, %v196_v57  ;;  %v238_v51 = vld [vmem:[#allocation2 + $0x170] sm:$0xff] }
  0x8b   :  { %779 = vmatpush1.bf16.msra.mxu0 %v8335_v34  ;;  %820 = vmatpush1.bf16.msra.mxu1 %v8337_v35  ;;  %v8306_v63 = vcombine.high %v193_v58, %v197_v59  ;;  %v284_v1 = vld [vmem:[#allocation2 + $0x2e0] sm:$0xff]  ;;  %v281_v2 = vld [vmem:[#allocation2 + $0x2c8] sm:$0xff]  ;;  %v8305_v5 = vcombine.low %v193_v58, %v197_v59  ;;  %v251_v34 = vld [vmem:[#allocation2 + $0x1d8] sm:$0xff]  ;;  %v8348_v57 = vcombine.high %v234_v50, %v238_v51 }
  0x8c   :  { %780 = vmatprep.subr.bf16.mxu0 %v8328_v36  ;;  %821 = vmatprep.subr.bf16.mxu1 %v8330_v37  ;;  %v285_v3 = vld [vmem:[#allocation2 + $0x2e8] sm:$0xff]  ;;  %v8392_v6 = vcombine.high %v280_v0, %v284_v1  ;;  %v272_v8 = vld [vmem:[#allocation2 + $0x280] sm:$0xff]  ;;  %v8391_v12 = vcombine.low %v280_v0, %v284_v1  ;;  %v255_v35 = vld [vmem:[#allocation2 + $0x1f8] sm:$0xff] }
  0x8d   :  { %v8394_v7 = vcombine.high %v281_v2, %v285_v3  ;;  %v276_v9 = vld [vmem:[#allocation2 + $0x2a0] sm:$0xff]  ;;  %v273_v10 = vld [vmem:[#allocation2 + $0x288] sm:$0xff]  ;;  %v8393_v13 = vcombine.low %v281_v2, %v285_v3  ;;  %v8365_v48 = vcombine.low %v251_v34, %v255_v35  ;;  %v226_v58 = vld [vmem:[#allocation2 + $0x110] sm:$0xff] }
  0x8e   :  { %v277_v11 = vld [vmem:[#allocation2 + $0x2a8] sm:$0xff]  ;;  %v8384_v14 = vcombine.high %v272_v8, %v276_v9  ;;  %v264_v15 = vld [vmem:[#allocation2 + $0x240] sm:$0xff]  ;;  %v8383_v20 = vcombine.low %v272_v8, %v276_v9  ;;  %v230_v59 = vld [vmem:[#allocation2 + $0x130] sm:$0xff] }
  0x8f   :  { %781 = vmatpush1.bf16.msra.mxu0 %v8327_v42  ;;  %822 = vmatpush1.bf16.msra.mxu1 %v8329_v44  ;;  %v268_v16 = vld [vmem:[#allocation2 + $0x260] sm:$0xff]  ;;  %v8386_v17 = vcombine.high %v273_v10, %v277_v11  ;;  %v265_v18 = vld [vmem:[#allocation2 + $0x248] sm:$0xff]  ;;  %v8385_v21 = vcombine.low %v273_v10, %v277_v11  ;;  %v8366_v42 = vcombine.high %v251_v34, %v255_v35  ;;  %v218_v2 = vld [vmem:[#allocation2 + $0xd0] sm:$0xff] }
  0x90   :  { %782 = vmatprep.subr.bf16.mxu0 %v8320_v45  ;;  %823 = vmatprep.subr.bf16.mxu1 %v8322_v47  ;;  %v269_v19 = vld [vmem:[#allocation2 + $0x268] sm:$0xff]  ;;  %v8376_v22 = vcombine.high %v264_v15, %v268_v16  ;;  %v256_v23 = vld [vmem:[#allocation2 + $0x200] sm:$0xff]  ;;  %v8375_v28 = vcombine.low %v264_v15, %v268_v16  ;;  %v247_v45 = vld [vmem:[#allocation2 + $0x1b8] sm:$0xff]  ;;  %v8363_v47 = vcombine.low %v250_v31, %v254_v32 }
  0x91   :  { %v260_v24 = vld [vmem:[#allocation2 + $0x220] sm:$0xff]  ;;  %v8378_v25 = vcombine.high %v265_v18, %v269_v19  ;;  %v257_v26 = vld [vmem:[#allocation2 + $0x208] sm:$0xff]  ;;  %v8377_v29 = vcombine.low %v265_v18, %v269_v19  ;;  %v8357_v56 = vcombine.low %v243_v43, %v247_v45  ;;  %v8340_v1 = vcombine.high %v226_v58, %v230_v59  ;;  %v222_v3 = vld [vmem:[#allocation2 + $0xf0] sm:$0xff] }
  0x92   :  { %v261_v27 = vld [vmem:[#allocation2 + $0x228] sm:$0xff]  ;;  %v8368_v30 = vcombine.high %v256_v23, %v260_v24  ;;  %v8367_v36 = vcombine.low %v256_v23, %v260_v24  ;;  %v188_v37 = vld [vmem:[%s13208_s30] sm:$0xff]  ;;  %v8332_v9 = vcombine.high %v218_v2, %v222_v3  ;;  %v210_v10 = vld [vmem:[#allocation2 + $0x90] sm:$0xff] }
  0x93   :  { %783 = vmatpush1.bf16.msra.mxu0 %v8319_v52  ;;  %824 = vmatpush1.bf16.msra.mxu1 %v8321_v53  ;;  %v8370_v33 = vcombine.high %v257_v26, %v261_v27  ;;  %v8369_v38 = vcombine.low %v257_v26, %v261_v27  ;;  %v10328_v44 = vpack.c.bf16 %v188_v37, %v188_v37  ;;  %v235_v53 = vld [vmem:[#allocation2 + $0x158] sm:$0xff]  ;;  %v206_v18 = vld [vmem:[#allocation2 + $0x70] sm:$0xff] }
  0x94   :  { %784 = vmatprep.subr.bf16.mxu0 %v8312_v54  ;;  %825 = vmatprep.subr.bf16.mxu1 %v8314_v55  ;;  %v8358_v52 = vcombine.high %v243_v43, %v247_v45  ;;  %v239_v54 = vld [vmem:[#allocation2 + $0x178] sm:$0xff]  ;;  %v8355_v55 = vcombine.low %v242_v40, %v246_v41  ;;  %v194_v23 = vld [vmem:[#allocation2 + $0x10] sm:$0xff] }
  0x95   :  { %v8349_v0 = vcombine.low %v235_v53, %v239_v54  ;;  %v198_v24 = vld [vmem:[#allocation2 + $0x30] sm:$0xff]  ;;  %v195_v27 = vld [vmem:[#allocation2 + $0x18] sm:$0xff] }
  0x96   :  { %v282_v31 = vld [vmem:[#allocation2 + $0x2d0] sm:$0xff]  ;;  %v8308_v34 = vcombine.high %v194_v23, %v198_v24  ;;  %v283_v35 = vld [vmem:[#allocation2 + $0x2d8] sm:$0xff] }
  0x97   :  { %785 = vmatpush1.bf16.msra.mxu0 %v8311_v60  ;;  %826 = vmatpush1.bf16.msra.mxu1 %v8313_v61  ;;  %v8350_v60 = vcombine.high %v235_v53, %v239_v54  ;;  %v227_v61 = vld [vmem:[#allocation2 + $0x118] sm:$0xff]  ;;  %v286_v32 = vld [vmem:[#allocation2 + $0x2f0] sm:$0xff] }
  0x98   :  { %786 = vmatprep.subr.bf16.mxu0 %v8304_v62  ;;  %827 = vmatprep.subr.bf16.mxu1 %v8306_v63  ;;  %v231_v62 = vld [vmem:[#allocation2 + $0x138] sm:$0xff]  ;;  %v8347_v63 = vcombine.low %v234_v50, %v238_v51  ;;  %v278_v40 = vld [vmem:[#allocation2 + $0x2b0] sm:$0xff] }
  0x99   :  { %v8341_v8 = vcombine.low %v227_v61, %v231_v62  ;;  %v275_v43 = vld [vmem:[#allocation2 + $0x298] sm:$0xff]  ;;  %v270_v50 = vld [vmem:[#allocation2 + $0x270] sm:$0xff] }
  0x9a   :  { %v279_v45 = vld [vmem:[#allocation2 + $0x2b8] sm:$0xff] }
  0x9b   :  { %787 = vmatpush1.bf16.msra.mxu0 %v8303_v4  ;;  %828 = vmatpush1.bf16.msra.mxu1 %v8305_v5  ;;  %v8342_v4 = vcombine.high %v227_v61, %v231_v62  ;;  %v219_v5 = vld [vmem:[#allocation2 + $0xd8] sm:$0xff] }
  0x9c   :  { %796 = vmatprep.subr.bf16.mxu0 %v8392_v6  ;;  %837 = vmatprep.subr.bf16.mxu1 %v8394_v7  ;;  %v223_v6 = vld [vmem:[#allocation2 + $0xf8] sm:$0xff]  ;;  %v8339_v7 = vcombine.low %v226_v58, %v230_v59  ;;  %v262_v58 = vld [vmem:[#allocation2 + $0x230] sm:$0xff]  ;;  %v8389_v59 = vcombine.low %v275_v43, %v279_v45 }
  0x9d   :  { %v8334_v11 = vcombine.high %v219_v5, %v223_v6  ;;  %v8333_v15 = vcombine.low %v219_v5, %v223_v6  ;;  %v267_v53 = vld [vmem:[#allocation2 + $0x258] sm:$0xff] }
  0x9e   :  { %v271_v54 = vld [vmem:[#allocation2 + $0x278] sm:$0xff] }
  0x9f   :  { %797 = vmatpush2.bf16.msra.mxu0 %v8391_v12  ;;  %838 = vmatpush2.bf16.msra.mxu1 %v8393_v13  ;;  %v211_v12 = vld [vmem:[#allocation2 + $0x98] sm:$0xff] }
  0xa0   :  { %798 = vmatprep.subr.bf16.mxu0 %v8384_v14  ;;  %839 = vmatprep.subr.bf16.mxu1 %v8386_v17  ;;  %v215_v13 = vld [vmem:[#allocation2 + $0xb8] sm:$0xff]  ;;  %v8331_v14 = vcombine.low %v218_v2, %v222_v3  ;;  %v202_v17 = vld [vmem:[#allocation2 + $0x50] sm:$0xff] }
  0xa1   :  { %v8326_v19 = vcombine.high %v211_v12, %v215_v13  ;;  %v8316_v26 = vcombine.high %v202_v17, %v206_v18  ;;  %v259_v61 = vld [vmem:[#allocation2 + $0x218] sm:$0xff] }
  0xa2   :  { %v263_v62 = vld [vmem:[#allocation2 + $0x238] sm:$0xff] }
  0xa3   :  { %799 = vmatpush2.bf16.msra.mxu0 %v8383_v20  ;;  %840 = vmatpush2.bf16.msra.mxu1 %v8385_v21  ;;  %v203_v20 = vld [vmem:[#allocation2 + $0x58] sm:$0xff]  ;;  %v8374_v3 = vcombine.high %v259_v61, %v263_v62 }
  0xa4   :  { %800 = vmatprep.subr.bf16.mxu0 %v8376_v22  ;;  %841 = vmatprep.subr.bf16.mxu1 %v8378_v25  ;;  %v207_v21 = vld [vmem:[#allocation2 + $0x78] sm:$0xff]  ;;  %v8325_v25 = vcombine.low %v211_v12, %v215_v13  ;;  %v9468_v12 = vld [vmem:[%s13209_s29 + $0x160] ss:$8 sps:$4 sm:$0xff]  }
  0xa5   :  { %v9464_v6 = vld [vmem:[%s13209_s29 + $0x174] ss:$8 sps:$4 sm:$0xff]  }
  0xa6   :  { %v9473_v13 = vld [vmem:[%s13209_s29 + $0x54] ss:$8 sps:$4 sm:$0xff]  }
  0xa7   :  { %801 = vmatpush2.bf16.msra.mxu0 %v8375_v28  ;;  %842 = vmatpush2.bf16.msra.mxu1 %v8377_v29  ;;  %v199_v28 = vld [vmem:[#allocation2 + $0x38] sm:$0xff]  ;;  %v8318_v29 = vcombine.high %v203_v20, %v207_v21 }
  0xa8   :  { %802 = vmatprep.subr.bf16.mxu0 %v8368_v30  ;;  %843 = vmatprep.subr.bf16.mxu1 %v8370_v33  ;;  %v8315_v30 = vcombine.low %v202_v17, %v206_v18  ;;  %v8317_v33 = vcombine.low %v203_v20, %v207_v21  ;;  %v8310_v37 = vcombine.high %v195_v27, %v199_v28  ;;  %v9482_v17 = vld [vmem:[%s13209_s29 + $0x144] ss:$8 sps:$4 sm:$0xff]   ;;  %v9477_v18 = vld [vmem:[%s13209_s29 + $0x40] ss:$8 sps:$4 sm:$0xff]   ;;  %v9485_v20 = vld [vmem:[%s13209_s29 + $0x34] ss:$8 sps:$4 sm:$0xff]  }
  0xa9   :  { %v8309_v41 = vcombine.low %v195_v27, %v199_v28  ;;  %v9488_v21 = vld [vmem:[%s13209_s29 + $0x134] ss:$8 sps:$4 sm:$0xff]   ;;  %v9492_v27 = vld [vmem:[%s13209_s29 + $0x120] ss:$8 sps:$4 sm:$0xff]  }
  0xaa   :  { %v9497_v28 = vld [vmem:[%s13209_s29 + $0x14] ss:$8 sps:$4 sm:$0xff]  }
  0xab   :  { %803 = vmatpush2.bf16.msra.mxu0 %v8367_v36  ;;  %844 = vmatpush2.bf16.msra.mxu1 %v8369_v38  ;;  %v287_v36 = vld [vmem:[#allocation2 + $0x2f8] sm:$0xff]  ;;  %v8307_v38 = vcombine.low %v194_v23, %v198_v24  ;;  %v9491_v24 = vld [vmem:[%s13209_s29 + $0x24] ss:$8 sps:$4 sm:$0xff]  }
  0xac   :  { %854 = vmatprep.subr.bf16.mxu0 %v8364_v39  ;;  %895 = vmatprep.subr.bf16.mxu1 %v8366_v42  ;;  %v274_v39 = vld [vmem:[#allocation2 + $0x290] sm:$0xff]  ;;  %v8396_v42 = vcombine.high %v282_v31, %v286_v32  ;;  %v8397_v51 = vcombine.low %v283_v35, %v287_v36 }
  0xad   :  { %v9486_v23 = vld [vmem:[%s13209_s29 + $0x130] ss:$8 sps:$4 sm:$0xff]  }
  0xae   :  { %805 = vmatmul.mubr.bf16.vlgmr.msra.gmra.mxu0 %v10328_v44  ;;  %846 = vmatmul.mubr.bf16.vlgmr.msra.gmra.mxu1 %v10328_v44 }
  0xaf   :  { %855 = vmatpush1.bf16.msra.mxu0 %v8363_v47  ;;  %896 = vmatpush1.bf16.msra.mxu1 %v8365_v48  ;;  %v8398_v47 = vcombine.high %v283_v35, %v287_v36  ;;  %v8395_v48 = vcombine.low %v282_v31, %v286_v32  ;;  %v9498_v31 = vld [vmem:[%s13209_s29 + $0x110] ss:$8 sps:$4 sm:$0xff]   ;;  %v9503_v32 = vld [vmem:[%s13209_s29 + $0x4] ss:$8 sps:$4 sm:$0xff]   ;;  %v9504_v35 = vld [vmem:[%s13209_s29 + $0x100] ss:$8 sps:$4 sm:$0xff]  }
  0xb0   :  { %856 = vmatprep.subr.bf16.mxu0 %v8356_v49  ;;  %897 = vmatprep.subr.bf16.mxu1 %v8358_v52  ;;  %v266_v49 = vld [vmem:[#allocation2 + $0x250] sm:$0xff]  ;;  %v8388_v52 = vcombine.high %v274_v39, %v278_v40 }
  0xb1   :  { %8401 = vmatprep.mubr.msk.bf16.mxu0 %vm768_vm0, %v10319_v46  ;;  %8402 = vmatprep.mubr.msk.bf16.mxu1 %vm768_vm0, %v10319_v46  ;;  %v214_v46 = vld [vmem:[#allocation2 + $0xb0] sm:$0xff] }
  0xb2   :  { %v8324_v16 = vcombine.high %v210_v10, %v214_v46  ;;  %v8323_v22 = vcombine.low %v210_v10, %v214_v46  ;;  %v9467_v10 = vld [vmem:[%s13209_s29 + $0x64] ss:$8 sps:$4 sm:$0xff]   ;;  %v9509_v36 = vld [vmem:[%s13209_s29 + $0xf4] ss:$8 sps:$4 sm:$0xff]  }
  0xb3   :  { %857 = vmatpush1.bf16.msra.mxu0 %v8355_v55  ;;  %898 = vmatpush1.bf16.msra.mxu1 %v8357_v56  ;;  %v8390_v55 = vcombine.high %v275_v43, %v279_v45  ;;  %v8387_v56 = vcombine.low %v274_v39, %v278_v40  ;;  %v9470_v46 = vld [vmem:[%s13209_s29 + $0x164] ss:$8 sps:$4 sm:$0xff]   ;;  %v9510_v39 = vld [vmem:[%s13209_s29 + $0x1f0] ss:$8 sps:$4 sm:$0xff]   ;;  %v9516_v43 = vld [vmem:[%s13209_s29 + $0x1e0] ss:$8 sps:$4 sm:$0xff]  }
  0xb4   :  { %858 = vmatprep.subr.bf16.mxu0 %v8348_v57  ;;  %899 = vmatprep.subr.bf16.mxu1 %v8350_v60  ;;  %v258_v57 = vld [vmem:[#allocation2 + $0x210] sm:$0xff]  ;;  %v8380_v60 = vcombine.high %v266_v49, %v270_v50  ;;  %v9515_v40 = vld [vmem:[%s13209_s29 + $0xe4] ss:$8 sps:$4 sm:$0xff]  }
  0xb5   :  { %v8372_v2 = vcombine.high %v258_v57, %v262_v58  ;;  %v8371_v5 = vcombine.low %v258_v57, %v262_v58  ;;  %v9521_v45 = vld [vmem:[%s13209_s29 + $0xd4] ss:$8 sps:$4 sm:$0xff]   ;;  %v9534_v57 = vld [vmem:[%s13209_s29 + $0x1b0] ss:$8 sps:$4 sm:$0xff]   ;;  %v9539_v58 = vld [vmem:[%s13209_s29 + $0xa4] ss:$8 sps:$4 sm:$0xff]  }
  0xb7   :  { %859 = vmatpush1.bf16.msra.mxu0 %v8347_v63  ;;  %900 = vmatpush1.bf16.msra.mxu1 %v8349_v0  ;;  %v8382_v63 = vcombine.high %v267_v53, %v271_v54  ;;  %v8379_v0 = vcombine.low %v266_v49, %v270_v50  ;;  %v9522_v49 = vld [vmem:[%s13209_s29 + $0x1d0] ss:$8 sps:$4 sm:$0xff]   ;;  %v9527_v50 = vld [vmem:[%s13209_s29 + $0xc4] ss:$8 sps:$4 sm:$0xff]  }
  0xb8   :  { %860 = vmatprep.subr.bf16.mxu0 %v8340_v1  ;;  %901 = vmatprep.subr.bf16.mxu1 %v8342_v4  ;;  %v8381_v1 = vcombine.low %v267_v53, %v271_v54  ;;  %v9461_v4 = vld [vmem:[%s13209_s29 + $0x74] ss:$8 sps:$4 sm:$0xff]   ;;  %v9528_v53 = vld [vmem:[%s13209_s29 + $0x1c0] ss:$8 sps:$4 sm:$0xff]  }
  0xb9   :  { %v9533_v54 = vld [vmem:[%s13209_s29 + $0xb4] ss:$8 sps:$4 sm:$0xff]  }
  0xbb   :  { %861 = vmatpush1.bf16.msra.mxu0 %v8339_v7  ;;  %902 = vmatpush1.bf16.msra.mxu1 %v8341_v8  ;;  %v8373_v7 = vcombine.low %v259_v61, %v263_v62  ;;  %v9459_v8 = vld [vmem:[%s13209_s29 + $0x70] ss:$8 sps:$4 sm:$0xff]   ;;  %v9540_v61 = vld [vmem:[%s13209_s29 + $0x1a0] ss:$8 sps:$4 sm:$0xff]   ;;  %v9545_v62 = vld [vmem:[%s13209_s29 + $0x94] ss:$8 sps:$4 sm:$0xff]  }
  0xbc   :  { %862 = vmatprep.subr.bf16.mxu0 %v8332_v9  ;;  %903 = vmatprep.subr.bf16.mxu1 %v8334_v11  ;;  %v9462_v9 = vld [vmem:[%s13209_s29 + $0x170] ss:$8 sps:$4 sm:$0xff]   ;;  %v9465_v11 = vld [vmem:[%s13209_s29 + $0x60] ss:$8 sps:$4 sm:$0xff]  }
  0xbf   :  { %863 = vmatpush1.bf16.msra.mxu0 %v8331_v14  ;;  %904 = vmatpush1.bf16.msra.mxu1 %v8333_v15  ;;  %v9476_v14 = vld [vmem:[%s13209_s29 + $0x154] ss:$8 sps:$4 sm:$0xff]   ;;  %v9471_v15 = vld [vmem:[%s13209_s29 + $0x50] ss:$8 sps:$4 sm:$0xff]  }
  0xc0   :  { %864 = vmatprep.subr.bf16.mxu0 %v8324_v16  ;;  %905 = vmatprep.subr.bf16.mxu1 %v8326_v19  ;;  %v9474_v16 = vld [vmem:[%s13209_s29 + $0x150] ss:$8 sps:$4 sm:$0xff]   ;;  %v9480_v19 = vld [vmem:[%s13209_s29 + $0x140] ss:$8 sps:$4 sm:$0xff]  }
  0xc3   :  { %865 = vmatpush1.bf16.msra.mxu0 %v8323_v22  ;;  %906 = vmatpush1.bf16.msra.mxu1 %v8325_v25  ;;  %v9483_v22 = vld [vmem:[%s13209_s29 + $0x30] ss:$8 sps:$4 sm:$0xff]   ;;  %v9494_v25 = vld [vmem:[%s13209_s29 + $0x124] ss:$8 sps:$4 sm:$0xff]  }
  0xc4   :  { %866 = vmatprep.subr.bf16.mxu0 %v8316_v26  ;;  %907 = vmatprep.subr.bf16.mxu1 %v8318_v29  ;;  %v9489_v26 = vld [vmem:[%s13209_s29 + $0x20] ss:$8 sps:$4 sm:$0xff]   ;;  %v9500_v29 = vld [vmem:[%s13209_s29 + $0x114] ss:$8 sps:$4 sm:$0xff]  }
  0xc7   :  { %867 = vmatpush1.bf16.msra.mxu0 %v8315_v30  ;;  %908 = vmatpush1.bf16.msra.mxu1 %v8317_v33  ;;  %v9495_v30 = vld [vmem:[%s13209_s29 + $0x10] ss:$8 sps:$4 sm:$0xff]   ;;  %v9506_v33 = vld [vmem:[%s13209_s29 + $0x104] ss:$8 sps:$4 sm:$0xff]  }
  0xc8   :  { %868 = vmatprep.subr.bf16.mxu0 %v8308_v34  ;;  %909 = vmatprep.subr.bf16.mxu1 %v8310_v37  ;;  %v9501_v34 = vld [vmem:[%s13209_s29] ss:$8 sps:$4 sm:$0xff]   ;;  %v9512_v37 = vld [vmem:[%s13209_s29 + $0x1f4] ss:$8 sps:$4 sm:$0xff]  }
  0xcb   :  { %869 = vmatpush1.bf16.msra.mxu0 %v8307_v38  ;;  %910 = vmatpush1.bf16.msra.mxu1 %v8309_v41  ;;  %v9507_v38 = vld [vmem:[%s13209_s29 + $0xf0] ss:$8 sps:$4 sm:$0xff]   ;;  %v9518_v41 = vld [vmem:[%s13209_s29 + $0x1e4] ss:$8 sps:$4 sm:$0xff]  }
  0xcc   :  { %878 = vmatprep.subr.bf16.mxu0 %v8396_v42  ;;  %919 = vmatprep.subr.bf16.mxu1 %v8398_v47  ;;  %v9513_v42 = vld [vmem:[%s13209_s29 + $0xe0] ss:$8 sps:$4 sm:$0xff]   ;;  %v9524_v47 = vld [vmem:[%s13209_s29 + $0x1d4] ss:$8 sps:$4 sm:$0xff]  }
  0xcf   :  { %879 = vmatpush2.bf16.msra.mxu0 %v8395_v48  ;;  %920 = vmatpush2.bf16.msra.mxu1 %v8397_v51  ;;  %v9519_v48 = vld [vmem:[%s13209_s29 + $0xd0] ss:$8 sps:$4 sm:$0xff]   ;;  %v9530_v51 = vld [vmem:[%s13209_s29 + $0x1c4] ss:$8 sps:$4 sm:$0xff]  }
  0xd0   :  { %880 = vmatprep.subr.bf16.mxu0 %v8388_v52  ;;  %921 = vmatprep.subr.bf16.mxu1 %v8390_v55  ;;  %v9525_v52 = vld [vmem:[%s13209_s29 + $0xc0] ss:$8 sps:$4 sm:$0xff]   ;;  %v9536_v55 = vld [vmem:[%s13209_s29 + $0x1b4] ss:$8 sps:$4 sm:$0xff]  }
  0xd3   :  { %881 = vmatpush2.bf16.msra.mxu0 %v8387_v56  ;;  %922 = vmatpush2.bf16.msra.mxu1 %v8389_v59  ;;  %v9531_v56 = vld [vmem:[%s13209_s29 + $0xb0] ss:$8 sps:$4 sm:$0xff]   ;;  %v9542_v59 = vld [vmem:[%s13209_s29 + $0x1a4] ss:$8 sps:$4 sm:$0xff]  }
  0xd4   :  { %882 = vmatprep.subr.bf16.mxu0 %v8380_v60  ;;  %923 = vmatprep.subr.bf16.mxu1 %v8382_v63  ;;  %v9537_v60 = vld [vmem:[%s13209_s29 + $0xa0] ss:$8 sps:$4 sm:$0xff]   ;;  %v9548_v63 = vld [vmem:[%s13209_s29 + $0x194] ss:$8 sps:$4 sm:$0xff]  }
  0xd7   :  { %883 = vmatpush2.bf16.msra.mxu0 %v8379_v0  ;;  %924 = vmatpush2.bf16.msra.mxu1 %v8381_v1  ;;  %v9543_v0 = vld [vmem:[%s13209_s29 + $0x90] ss:$8 sps:$4 sm:$0xff]  }
  0xd8   :  { %884 = vmatprep.subr.bf16.mxu0 %v8372_v2  ;;  %925 = vmatprep.subr.bf16.mxu1 %v8374_v3  ;;  %v9546_v1 = vld [vmem:[%s13209_s29 + $0x190] ss:$8 sps:$4 sm:$0xff]   ;;  %v9551_v2 = vld [vmem:[%s13209_s29 + $0x84] ss:$8 sps:$4 sm:$0xff]  }
  0xd9   :  { %v9554_v3 = vld [vmem:[%s13209_s29 + $0x184] ss:$8 sps:$4 sm:$0xff]  }
  0xdb   :  { %885 = vmatpush2.bf16.msra.mxu0 %v8371_v5  ;;  %926 = vmatpush2.bf16.msra.mxu1 %v8373_v7  ;;  %v9552_v5 = vld [vmem:[%s13209_s29 + $0x180] ss:$8 sps:$4 sm:$0xff]   ;;  %v9560_v7 = vld [vmem:[%s13209_s29 + $0x374] ss:$8 sps:$4 sm:$0xff]  }
  0xdc   :  { %1740 = vmatprep.subr.bf16.mxu0 %v9461_v4  ;;  %1781 = vmatprep.subr.bf16.mxu1 %v9464_v6  ;;  %v9549_v4 = vld [vmem:[%s13209_s29 + $0x80] ss:$8 sps:$4 sm:$0xff]   ;;  %v9557_v6 = vld [vmem:[%s13209_s29 + $0x274] ss:$8 sps:$4 sm:$0xff]  }
  0xde   :  { %887 = vmatmul.mubr.bf16.vlgmr.msra.gmra.mxu0 %v10328_v44  ;;  %928 = vmatmul.mubr.bf16.vlgmr.msra.gmra.mxu1 %v10328_v44  ;;  %v9479_v44 = vld [vmem:[%s13209_s29 + $0x44] ss:$8 sps:$4 sm:$0xff]  }
  0xdf   :  { %1741 = vmatpush1.bf16.msra.mxu0 %v9459_v8  ;;  %1782 = vmatpush1.bf16.msra.mxu1 %v9462_v9 }
  0xe0   :  { %1742 = vmatprep.subr.bf16.mxu0 %v9467_v10  ;;  %1783 = vmatprep.subr.bf16.mxu1 %v9470_v46 }
  0xe3   :  { %1743 = vmatpush1.bf16.msra.mxu0 %v9465_v11  ;;  %1784 = vmatpush1.bf16.msra.mxu1 %v9468_v12 }
  0xe4   :  { %1744 = vmatprep.subr.bf16.mxu0 %v9473_v13  ;;  %1785 = vmatprep.subr.bf16.mxu1 %v9476_v14 }
  0xe7   :  { %1745 = vmatpush1.bf16.msra.mxu0 %v9471_v15  ;;  %1786 = vmatpush1.bf16.msra.mxu1 %v9474_v16 }
  0xe8   :  { %1746 = vmatprep.subr.bf16.mxu0 %v9479_v44  ;;  %1787 = vmatprep.subr.bf16.mxu1 %v9482_v17 }
  0xeb   :  { %1747 = vmatpush1.bf16.msra.mxu0 %v9477_v18  ;;  %1788 = vmatpush1.bf16.msra.mxu1 %v9480_v19 }
  0xec   :  { %1748 = vmatprep.subr.bf16.mxu0 %v9485_v20  ;;  %1789 = vmatprep.subr.bf16.mxu1 %v9488_v21 }
  0xef   :  { %1749 = vmatpush1.bf16.msra.mxu0 %v9483_v22  ;;  %1790 = vmatpush1.bf16.msra.mxu1 %v9486_v23  ;;  %v9555_v23 = vld [vmem:[%s13209_s29 + $0x270] ss:$8 sps:$4 sm:$0xff]  }
  0xf0   :  { %1750 = vmatprep.subr.bf16.mxu0 %v9491_v24  ;;  %1791 = vmatprep.subr.bf16.mxu1 %v9494_v25 }
  0xf3   :  { %1751 = vmatpush1.bf16.msra.mxu0 %v9489_v26  ;;  %1792 = vmatpush1.bf16.msra.mxu1 %v9492_v27  ;;  %v9558_v26 = vld [vmem:[%s13209_s29 + $0x370] ss:$8 sps:$4 sm:$0xff]   ;;  %v9563_v27 = vld [vmem:[%s13209_s29 + $0x264] ss:$8 sps:$4 sm:$0xff]  }
  0xf4   :  { %1752 = vmatprep.subr.bf16.mxu0 %v9497_v28  ;;  %1793 = vmatprep.subr.bf16.mxu1 %v9500_v29  ;;  %v9566_v29 = vld [vmem:[%s13209_s29 + $0x364] ss:$8 sps:$4 sm:$0xff]  }
  0xf7   :  { %1753 = vmatpush1.bf16.msra.mxu0 %v9495_v30  ;;  %1794 = vmatpush1.bf16.msra.mxu1 %v9498_v31  ;;  %v9561_v30 = vld [vmem:[%s13209_s29 + $0x260] ss:$8 sps:$4 sm:$0xff]  }
  0xf8   :  { %1754 = vmatprep.subr.bf16.mxu0 %v9503_v32  ;;  %1795 = vmatprep.subr.bf16.mxu1 %v9506_v33  ;;  %v9564_v31 = vld [vmem:[%s13209_s29 + $0x360] ss:$8 sps:$4 sm:$0xff]   ;;  %v9569_v32 = vld [vmem:[%s13209_s29 + $0x254] ss:$8 sps:$4 sm:$0xff]  }
  0xf9   :  { %v9572_v33 = vld [vmem:[%s13209_s29 + $0x354] ss:$8 sps:$4 sm:$0xff]  }
  0xfb   :  { %1755 = vmatpush1.bf16.msra.mxu0 %v9501_v34  ;;  %1796 = vmatpush1.bf16.msra.mxu1 %v9504_v35  ;;  %v9567_v34 = vld [vmem:[%s13209_s29 + $0x250] ss:$8 sps:$4 sm:$0xff]  }
  0xfc   :  { %1756 = vmatprep.subr.bf16.mxu0 %v9509_v36  ;;  %1797 = vmatprep.subr.bf16.mxu1 %v9512_v37  ;;  %v9570_v35 = vld [vmem:[%s13209_s29 + $0x350] ss:$8 sps:$4 sm:$0xff]   ;;  %v9575_v36 = vld [vmem:[%s13209_s29 + $0x244] ss:$8 sps:$4 sm:$0xff]  }
  0xfd   :  { %v9578_v37 = vld [vmem:[%s13209_s29 + $0x344] ss:$8 sps:$4 sm:$0xff]  }
  0xff   :  { %1757 = vmatpush2.bf16.msra.mxu0 %v9507_v38  ;;  %1798 = vmatpush2.bf16.msra.mxu1 %v9510_v39  ;;  %v9573_v38 = vld [vmem:[%s13209_s29 + $0x240] ss:$8 sps:$4 sm:$0xff]  }
 0x100   :  { %1758 = vmatprep.subr.bf16.mxu0 %v9515_v40  ;;  %1799 = vmatprep.subr.bf16.mxu1 %v9518_v41  ;;  %v9576_v39 = vld [vmem:[%s13209_s29 + $0x340] ss:$8 sps:$4 sm:$0xff]   ;;  %v9581_v40 = vld [vmem:[%s13209_s29 + $0x234] ss:$8 sps:$4 sm:$0xff]  }
 0x101   :  { %v9584_v41 = vld [vmem:[%s13209_s29 + $0x334] ss:$8 sps:$4 sm:$0xff]  }
 0x103   :  { %1759 = vmatpush2.bf16.msra.mxu0 %v9513_v42  ;;  %1800 = vmatpush2.bf16.msra.mxu1 %v9516_v43  ;;  %v9579_v42 = vld [vmem:[%s13209_s29 + $0x230] ss:$8 sps:$4 sm:$0xff]  }
 0x104   :  { %1760 = vmatprep.subr.bf16.mxu0 %v9521_v45  ;;  %1801 = vmatprep.subr.bf16.mxu1 %v9524_v47  ;;  %v9582_v43 = vld [vmem:[%s13209_s29 + $0x330] ss:$8 sps:$4 sm:$0xff]   ;;  %v9587_v45 = vld [vmem:[%s13209_s29 + $0x224] ss:$8 sps:$4 sm:$0xff]  }
 0x105   :  { %v9590_v47 = vld [vmem:[%s13209_s29 + $0x324] ss:$8 sps:$4 sm:$0xff]  }
 0x107   :  { %1761 = vmatpush2.bf16.msra.mxu0 %v9519_v48  ;;  %1802 = vmatpush2.bf16.msra.mxu1 %v9522_v49  ;;  %v9585_v48 = vld [vmem:[%s13209_s29 + $0x220] ss:$8 sps:$4 sm:$0xff]  }
 0x108   :  { %1762 = vmatprep.subr.bf16.mxu0 %v9527_v50  ;;  %1803 = vmatprep.subr.bf16.mxu1 %v9530_v51  ;;  %v9588_v49 = vld [vmem:[%s13209_s29 + $0x320] ss:$8 sps:$4 sm:$0xff]   ;;  %v9593_v50 = vld [vmem:[%s13209_s29 + $0x214] ss:$8 sps:$4 sm:$0xff]  }
 0x109   :  { %v9596_v51 = vld [vmem:[%s13209_s29 + $0x314] ss:$8 sps:$4 sm:$0xff]  }
 0x10b   :  { %1763 = vmatpush2.bf16.msra.mxu0 %v9525_v52  ;;  %1804 = vmatpush2.bf16.msra.mxu1 %v9528_v53  ;;  %v9591_v52 = vld [vmem:[%s13209_s29 + $0x210] ss:$8 sps:$4 sm:$0xff]  }
 0x10c   :  { %1764 = vmatprep.subr.bf16.mxu0 %v9533_v54  ;;  %1805 = vmatprep.subr.bf16.mxu1 %v9536_v55  ;;  %v9594_v53 = vld [vmem:[%s13209_s29 + $0x310] ss:$8 sps:$4 sm:$0xff]   ;;  %v9599_v54 = vld [vmem:[%s13209_s29 + $0x204] ss:$8 sps:$4 sm:$0xff]  }
 0x10d   :  { %v9602_v55 = vld [vmem:[%s13209_s29 + $0x304] ss:$8 sps:$4 sm:$0xff]  }
 0x10f   :  { %1765 = vmatpush2.bf16.msra.mxu0 %v9531_v56  ;;  %1806 = vmatpush2.bf16.msra.mxu1 %v9534_v57  ;;  %v9597_v56 = vld [vmem:[%s13209_s29 + $0x200] ss:$8 sps:$4 sm:$0xff]  }
 0x110   :  { %1766 = vmatprep.subr.bf16.mxu0 %v9539_v58  ;;  %1807 = vmatprep.subr.bf16.mxu1 %v9542_v59  ;;  %v9600_v57 = vld [vmem:[%s13209_s29 + $0x300] ss:$8 sps:$4 sm:$0xff]   ;;  %v9605_v58 = vld [vmem:[%s13209_s29 + $0x2f4] ss:$8 sps:$4 sm:$0xff]  }
 0x111   :  { %v9608_v59 = vld [vmem:[%s13209_s29 + $0x3f4] ss:$8 sps:$4 sm:$0xff]  }
 0x113   :  { %1767 = vmatpush2.bf16.msra.mxu0 %v9537_v60  ;;  %1808 = vmatpush2.bf16.msra.mxu1 %v9540_v61  ;;  %v9603_v60 = vld [vmem:[%s13209_s29 + $0x2f0] ss:$8 sps:$4 sm:$0xff]  }
 0x114   :  { %1768 = vmatprep.subr.bf16.mxu0 %v9545_v62  ;;  %1809 = vmatprep.subr.bf16.mxu1 %v9548_v63  ;;  %v9606_v61 = vld [vmem:[%s13209_s29 + $0x3f0] ss:$8 sps:$4 sm:$0xff]   ;;  %v9611_v62 = vld [vmem:[%s13209_s29 + $0x2e4] ss:$8 sps:$4 sm:$0xff]  }
 0x115   :  { %v9614_v63 = vld [vmem:[%s13209_s29 + $0x3e4] ss:$8 sps:$4 sm:$0xff]  }
 0x117   :  { %1769 = vmatpush2.bf16.msra.mxu0 %v9543_v0  ;;  %1810 = vmatpush2.bf16.msra.mxu1 %v9546_v1  ;;  %v9609_v0 = vld [vmem:[%s13209_s29 + $0x2e0] ss:$8 sps:$4 sm:$0xff]  }
 0x118   :  { %1770 = vmatprep.subr.bf16.mxu0 %v9551_v2  ;;  %1811 = vmatprep.subr.bf16.mxu1 %v9554_v3  ;;  %v9612_v1 = vld [vmem:[%s13209_s29 + $0x3e0] ss:$8 sps:$4 sm:$0xff]   ;;  %v9617_v2 = vld [vmem:[%s13209_s29 + $0x2d4] ss:$8 sps:$4 sm:$0xff]  }
 0x119   :  { %v9620_v3 = vld [vmem:[%s13209_s29 + $0x3d4] ss:$8 sps:$4 sm:$0xff]  }
 0x11b   :  { %1771 = vmatpush2.bf16.msra.mxu0 %v9549_v4  ;;  %1812 = vmatpush2.bf16.msra.mxu1 %v9552_v5  ;;  %v9615_v4 = vld [vmem:[%s13209_s29 + $0x2d0] ss:$8 sps:$4 sm:$0xff]  }
 0x11c   :  { %1822 = vmatprep.subr.bf16.mxu0 %v9557_v6  ;;  %1863 = vmatprep.subr.bf16.mxu1 %v9560_v7  ;;  %v9618_v5 = vld [vmem:[%s13209_s29 + $0x3d0] ss:$8 sps:$4 sm:$0xff]   ;;  %v9623_v6 = vld [vmem:[%s13209_s29 + $0x2c4] ss:$8 sps:$4 sm:$0xff]  }
 0x16e   :  { %v806_v8 = vpop.f32.mrf.mxu0  ;;  %v847_v10 = vpop.f32.mrf.mxu1 }
 0x16f   :  { %v936_v9 = vmul.f32 0.2, %v806_v8  ;;  %v938_v46 = vmul.f32 0.2, %v847_v10 }
 0x170   :  { %v808_v11 = vpop.f32.mrf.mxu0  ;;  %v849_v13 = vpop.f32.mrf.mxu1 }
 0x171   :  { %v937_v12 = vmul.f32 0.2, %v808_v11  ;;  %v944_v14 = vmax.f32 %v806_v8, %v936_v9  ;;  %v939_v15 = vmul.f32 0.2, %v849_v13  ;;  %v946_v44 = vmax.f32 %v847_v10, %v938_v46  ;;  %v9626_v8 = vld [vmem:[%s13209_s29 + $0x3c4] ss:$8 sps:$4 sm:$0xff]  }
 0x172   :  { %v810_v16 = vpop.f32.mrf.mxu0  ;;  %v851_v18 = vpop.f32.mrf.mxu1  ;;  %v9621_v46 = vld [vmem:[%s13209_s29 + $0x2c0] ss:$8 sps:$4 sm:$0xff]  }
 0x173   :  { %v945_v17 = vmax.f32 %v808_v11, %v937_v12  ;;  %v947_v19 = vmax.f32 %v849_v13, %v939_v15  ;;  %v952_v24 = vpack.c.bf16 %v944_v14, %v944_v14  ;;  %v954_v28 = vpack.c.bf16 %v946_v44, %v946_v44  ;;  %v9624_v13 = vld [vmem:[%s13209_s29 + $0x3c0] ss:$8 sps:$4 sm:$0xff]   ;;  %v9629_v14 = vld [vmem:[%s13209_s29 + $0x2b4] ss:$8 sps:$4 sm:$0xff]  }
 0x174   :  { %v811_v20 = vpop.f32.mrf.mxu0  ;;  %v852_v22 = vpop.f32.mrf.mxu1  ;;  %v9632_v44 = vld [vmem:[%s13209_s29 + $0x3b4] ss:$8 sps:$4 sm:$0xff]  }
 0x175   :  { %v953_v21 = vpack.c.bf16 %v945_v17, %v945_v17  ;;  %v955_v25 = vpack.c.bf16 %v947_v19, %v947_v19 }
 0x177   :  { %1772 = vmatprep.mubr.bf16.mxu0 %v953_v21  ;;  %1813 = vmatprep.mubr.bf16.mxu1 %v955_v25  ;;  %v9627_v21 = vld [vmem:[%s13209_s29 + $0x2b0] ss:$8 sps:$4 sm:$0xff]  }
 0x178   :  { %1773 = vmatmul.mubr.bf16.vlgmr.msra.gmra.mxu0 %v952_v24  ;;  %1814 = vmatmul.mubr.bf16.vlgmr.msra.gmra.mxu1 %v954_v28  ;;  %v9630_v24 = vld [vmem:[%s13209_s29 + $0x3b0] ss:$8 sps:$4 sm:$0xff]   ;;  %v9633_v28 = vld [vmem:[%s13209_s29 + $0x2a0] ss:$8 sps:$4 sm:$0xff]  }
 0x179   :  { %1823 = vmatpush1.bf16.msra.mxu0 %v9555_v23  ;;  %1864 = vmatpush1.bf16.msra.mxu1 %v9558_v26  ;;  %v9635_v26 = vld [vmem:[%s13209_s29 + $0x2a4] ss:$8 sps:$4 sm:$0xff]  }
 0x17a   :  { %1824 = vmatprep.subr.bf16.mxu0 %v9563_v27  ;;  %1865 = vmatprep.subr.bf16.mxu1 %v9566_v29  ;;  %v9638_v27 = vld [vmem:[%s13209_s29 + $0x3a4] ss:$8 sps:$4 sm:$0xff]   ;;  %v9636_v29 = vld [vmem:[%s13209_s29 + $0x3a0] ss:$8 sps:$4 sm:$0xff]  }
 0x17d   :  { %1825 = vmatpush1.bf16.msra.mxu0 %v9561_v30  ;;  %1866 = vmatpush1.bf16.msra.mxu1 %v9564_v31  ;;  %v9641_v30 = vld [vmem:[%s13209_s29 + $0x294] ss:$8 sps:$4 sm:$0xff]  }
 0x17e   :  { %1826 = vmatprep.subr.bf16.mxu0 %v9569_v32  ;;  %1867 = vmatprep.subr.bf16.mxu1 %v9572_v33  ;;  %v9644_v31 = vld [vmem:[%s13209_s29 + $0x394] ss:$8 sps:$4 sm:$0xff]   ;;  %v9639_v32 = vld [vmem:[%s13209_s29 + $0x290] ss:$8 sps:$4 sm:$0xff]  }
 0x181   :  { %1827 = vmatpush1.bf16.msra.mxu0 %v9567_v34  ;;  %1868 = vmatpush1.bf16.msra.mxu1 %v9570_v35  ;;  %v9642_v34 = vld [vmem:[%s13209_s29 + $0x390] ss:$8 sps:$4 sm:$0xff]   ;;  %v9647_v35 = vld [vmem:[%s13209_s29 + $0x284] ss:$8 sps:$4 sm:$0xff]  }
 0x182   :  { %1828 = vmatprep.subr.bf16.mxu0 %v9575_v36  ;;  %1869 = vmatprep.subr.bf16.mxu1 %v9578_v37  ;;  %v9650_v37 = vld [vmem:[%s13209_s29 + $0x384] ss:$8 sps:$4 sm:$0xff]  }
 0x185   :  { %1829 = vmatpush1.bf16.msra.mxu0 %v9573_v38  ;;  %1870 = vmatpush1.bf16.msra.mxu1 %v9576_v39  ;;  %v9645_v38 = vld [vmem:[%s13209_s29 + $0x280] ss:$8 sps:$4 sm:$0xff]  }
 0x186   :  { %1830 = vmatprep.subr.bf16.mxu0 %v9581_v40  ;;  %1871 = vmatprep.subr.bf16.mxu1 %v9584_v41  ;;  %v9648_v40 = vld [vmem:[%s13209_s29 + $0x380] ss:$8 sps:$4 sm:$0xff]  }
 0x189   :  { %1831 = vmatpush1.bf16.msra.mxu0 %v9579_v42  ;;  %1872 = vmatpush1.bf16.msra.mxu1 %v9582_v43 }
 0x18a   :  { %1832 = vmatprep.subr.bf16.mxu0 %v9587_v45  ;;  %1873 = vmatprep.subr.bf16.mxu1 %v9590_v47  ;;  %v9651_v45 = vld [vmem:[%s13210_s4 + $0x38] sm:$0xff]   ;;  %v13099_v47 = vmov 0.0  }
 0x18d   :  { %1833 = vmatpush1.bf16.msra.mxu0 %v9585_v48  ;;  %1874 = vmatpush1.bf16.msra.mxu1 %v9588_v49  ;;  %v9652_v48 = vld [vmem:[#allocation4 + $0x38] sm:$0xff]   ;;  %v9653_v49 = vld [vmem:[%s13210_s4 + $0x30] sm:$0xff]  }
 0x18e   :  { %1834 = vmatprep.subr.bf16.mxu0 %v9593_v50  ;;  %1875 = vmatprep.subr.bf16.mxu1 %v9596_v51  ;;  %v9654_v50 = vld [vmem:[#allocation4 + $0x30] sm:$0xff]   ;;  %v9655_v51 = vld [vmem:[%s13210_s4 + $0x28] sm:$0xff]  }
 0x191   :  { %1835 = vmatpush1.bf16.msra.mxu0 %v9591_v52  ;;  %1876 = vmatpush1.bf16.msra.mxu1 %v9594_v53  ;;  %v9656_v52 = vld [vmem:[#allocation4 + $0x28] sm:$0xff]   ;;  %v9657_v53 = vld [vmem:[%s13210_s4 + $0x20] sm:$0xff]  }
 0x192   :  { %1836 = vmatprep.subr.bf16.mxu0 %v9599_v54  ;;  %1877 = vmatprep.subr.bf16.mxu1 %v9602_v55  ;;  %v9658_v54 = vld [vmem:[#allocation4 + $0x20] sm:$0xff]   ;;  %v9659_v55 = vld [vmem:[%s13210_s4 + $0x18] sm:$0xff]  }
 0x195   :  { %1837 = vmatpush1.bf16.msra.mxu0 %v9597_v56  ;;  %1878 = vmatpush1.bf16.msra.mxu1 %v9600_v57  ;;  %v9660_v56 = vld [vmem:[#allocation4 + $0x18] sm:$0xff]   ;;  %v9661_v57 = vld [vmem:[%s13210_s4 + $0x10] sm:$0xff]  }
 0x196   :  { %1838 = vmatprep.subr.bf16.mxu0 %v9605_v58  ;;  %1879 = vmatprep.subr.bf16.mxu1 %v9608_v59  ;;  %v9662_v58 = vld [vmem:[#allocation4 + $0x10] sm:$0xff]   ;;  %v9663_v59 = vld [vmem:[%s13210_s4 + $0x8] sm:$0xff]  }
 0x199   :  { %1839 = vmatpush2.bf16.msra.mxu0 %v9603_v60  ;;  %1880 = vmatpush2.bf16.msra.mxu1 %v9606_v61  ;;  %v9664_v60 = vld [vmem:[#allocation4 + $0x8] sm:$0xff]   ;;  %v9665_v61 = vld [vmem:[%s13210_s4] sm:$0xff]  }
 0x19a   :  { %1840 = vmatprep.subr.bf16.mxu0 %v9611_v62  ;;  %1881 = vmatprep.subr.bf16.mxu1 %v9614_v63  ;;  %v9666_v62 = vld [vmem:[#allocation4] sm:$0xff]  }
 0x19d   :  { %1841 = vmatpush2.bf16.msra.mxu0 %v9609_v0  ;;  %1882 = vmatpush2.bf16.msra.mxu1 %v9612_v1 }
 0x19e   :  { %1842 = vmatprep.subr.bf16.mxu0 %v9617_v2  ;;  %v888_v7 = vpop.f32.mrf.mxu0  ;;  %1883 = vmatprep.subr.bf16.mxu1 %v9620_v3  ;;  %v929_v9 = vpop.f32.mrf.mxu1 }
 0x19f   :  { %v940_v33 = vmul.f32 0.2, %v888_v7  ;;  %v942_v36 = vmul.f32 0.2, %v929_v9 }
 0x1a0   :  { %v890_v10 = vpop.f32.mrf.mxu0  ;;  %v931_v12 = vpop.f32.mrf.mxu1 }
 0x1a1   :  { %1843 = vmatpush2.bf16.msra.mxu0 %v9615_v4  ;;  %v941_v11 = vmul.f32 0.2, %v890_v10  ;;  %1884 = vmatpush2.bf16.msra.mxu1 %v9618_v5  ;;  %v943_v16 = vmul.f32 0.2, %v931_v12  ;;  %v948_v39 = vmax.f32 %v888_v7, %v940_v33  ;;  %v950_v41 = vmax.f32 %v929_v9, %v942_v36  ;;  %v2369_v33 = vld [vmem:[#allocation7 + $0x1c8] sm:$0xff]  ;;  %v2368_v36 = vld [vmem:[#allocation7 + $0x1c0] sm:$0xff] }
 0x1a2   :  { %1844 = vmatprep.subr.bf16.mxu0 %v9623_v6  ;;  %v892_v15 = vpop.f32.mrf.mxu0  ;;  %1885 = vmatprep.subr.bf16.mxu1 %v9626_v8  ;;  %v933_v18 = vpop.f32.mrf.mxu1  ;;  %v1090_v7 = vlaneseq }
 0x1a3   :  { %v949_v17 = vmax.f32 %v890_v10, %v941_v11  ;;  %v951_v19 = vmax.f32 %v931_v12, %v943_v16  ;;  %v956_v42 = vpack.c.bf16 %v948_v39, %v948_v39  ;;  %v958_v43 = vpack.c.bf16 %v950_v41, %v950_v41  ;;  %v1088_v10 = vld [vmem:[%s13213_s17] sm:$0x3] }
 0x1a4   :  { %v893_v20 = vpop.f32.mrf.mxu0  ;;  %v934_v23 = vpop.f32.mrf.mxu1  ;;  %v10764_v8 = vshrl.u32 %v1090_v7, 7  ;;  %v2224_v39 = vld [vmem:[%s13216_s0] sm:$0xff] }
 0x1a5   :  { %1845 = vmatpush2.bf16.msra.mxu0 %v9621_v46  ;;  %v957_v22 = vpack.c.bf16 %v949_v17, %v949_v17  ;;  %1886 = vmatpush2.bf16.msra.mxu1 %v9624_v13  ;;  %v959_v25 = vpack.c.bf16 %v951_v19, %v951_v19 }
 0x1a6   :  { %1846 = vmatprep.subr.bf16.mxu0 %v9629_v14  ;;  %1887 = vmatprep.subr.bf16.mxu1 %v9632_v44  ;;  %13211 = vst [vmem:[#allocation21_spill] sm:$0xff] %v10764_v8  ;;  %v10767_v9 = vsub.s32 0, %v10764_v8  ;;  %v10773_v46 = vsub.s32 1, %v10764_v8  ;;  %v11318_v8 = vld [vmem:[%s13081_s14 + $0x100] sm:$0xff] }
 0x1a7   :  { %1854 = vmatprep.mubr.bf16.mxu0 %v957_v22  ;;  %1895 = vmatprep.mubr.bf16.mxu1 %v959_v25  ;;  %13245 = vst [vmem:[#allocation51_spill] sm:$0xff] %v11318_v8 }
 0x1a8   :  { %13212 = vst [vmem:[#allocation22_spill] sm:$0xff] %v10767_v9  ;;  %13214 = vst [vmem:[#allocation23_spill] sm:$0xff] %v10773_v46  ;;  %v1093_v11 = vrot.slane %v1088_v10, %v10767_v9  ;;  %v1097_v12 = vrot.slane %v1088_v10, %v10773_v46  ;;  %v11306_v9 = vld [vmem:[%s13081_s14 + $0x180] sm:$0xff] }
 0x1a9   :  { %1847 = vmatpush2.bf16.msra.mxu0 %v9627_v21  ;;  %1888 = vmatpush2.bf16.msra.mxu1 %v9630_v24  ;;  %13243 = vst [vmem:[#allocation49_spill] sm:$0xff] %v11306_v9  ;;  %v11313_v46 = vld [vmem:[%s13081_s14] sm:$0xff] }
 0x1aa   :  { %1848 = vmatprep.subr.bf16.mxu0 %v9635_v26  ;;  %1889 = vmatprep.subr.bf16.mxu1 %v9638_v27  ;;  %13244 = vst [vmem:[#allocation50_spill] sm:$0xff] %v11313_v46 }
 0x1ad   :  { %1849 = vmatpush2.bf16.msra.mxu0 %v9633_v28  ;;  %1890 = vmatpush2.bf16.msra.mxu1 %v9636_v29 }
 0x1ae   :  { %1850 = vmatprep.subr.bf16.mxu0 %v9641_v30  ;;  %1891 = vmatprep.subr.bf16.mxu1 %v9644_v31  ;;  %v1906_v30 = vld [vmem:[%s13215_s11] sm:$0xff] }
 0x1b1   :  { %1851 = vmatpush2.bf16.msra.mxu0 %v9639_v32  ;;  %1892 = vmatpush2.bf16.msra.mxu1 %v9642_v34  ;;  %v2373_v34 = vld [vmem:[#allocation7 + $0x1e8] sm:$0xff] }
 0x1b2   :  { %1852 = vmatprep.subr.bf16.mxu0 %v9647_v35  ;;  %1893 = vmatprep.subr.bf16.mxu1 %v9650_v37  ;;  %v2372_v37 = vld [vmem:[#allocation7 + $0x1e0] sm:$0xff] }
 0x1b5   :  { %1853 = vmatpush2.bf16.msra.mxu0 %v9645_v38  ;;  %1894 = vmatpush2.bf16.msra.mxu1 %v9648_v40  ;;  %v8611_v40 = vcombine.high %v2369_v33, %v2373_v34 }
 0x1b6   :  { %9412 = vmatprep.subr.bf16.mxu1 %v13099_v47  ;;  %9392 = vmatprep.subr.bf16.mxu0 %v13099_v47 }
 0x1b8   :  { %1855 = vmatmul.mubr.bf16.vlgmr.msra.gmra.mxu0 %v956_v42  ;;  %1896 = vmatmul.mubr.bf16.vlgmr.msra.gmra.mxu1 %v958_v43  ;;  %v2136_v42 = vld [vmem:[%s13217_s28] sm:$0xff]  ;;  %v8609_v43 = vcombine.high %v2368_v36, %v2372_v37 }
 0x1b9   :  { %9413 = vmatpush3.bf16.msra.mxu1 %v9651_v45  ;;  %9393 = vmatpush3.bf16.msra.mxu0 %v9652_v48  ;;  %v2361_v45 = vld [vmem:[#allocation7 + $0x188] sm:$0xff] }
 0x1ba   :  { %9414 = vmatprep.subr.bf16.mxu1 %v13099_v47  ;;  %9394 = vmatprep.subr.bf16.mxu0 %v13099_v47  ;;  %v2365_v48 = vld [vmem:[#allocation7 + $0x1a8] sm:$0xff] }
 0x1bb   :  { %9428 = vmatprep.mubr.msk.bf16.mxu1 %vm10144_vm1, %v13099_v47  ;;  %9408 = vmatprep.mubr.msk.bf16.mxu0 %vm10144_vm1, %v13099_v47 }
 0x1bd   :  { %9415 = vmatpush3.bf16.msra.mxu1 %v9653_v49  ;;  %9395 = vmatpush3.bf16.msra.mxu0 %v9654_v50  ;;  %v2225_v49 = vld [vmem:[%s13216_s0 + $0x8] sm:$0xf]  ;;  %v8610_v50 = vcombine.low %v2369_v33, %v2373_v34 }
 0x1be   :  { %9416 = vmatprep.subr.bf16.mxu1 %v13099_v47  ;;  %9396 = vmatprep.subr.bf16.mxu0 %v13099_v47 }
 0x1c1   :  { %9417 = vmatpush3.bf16.msra.mxu1 %v9655_v51  ;;  %9397 = vmatpush3.bf16.msra.mxu0 %v9656_v52  ;;  %v2360_v51 = vld [vmem:[#allocation7 + $0x180] sm:$0xff] }
 0x1c2   :  { %9418 = vmatprep.subr.bf16.mxu1 %v13099_v47  ;;  %9398 = vmatprep.subr.bf16.mxu0 %v13099_v47  ;;  %v2364_v52 = vld [vmem:[#allocation7 + $0x1a0] sm:$0xff] }
 0x1c5   :  { %9419 = vmatpush3.bf16.msra.mxu1 %v9657_v53  ;;  %9399 = vmatpush3.bf16.msra.mxu0 %v9658_v54  ;;  %v8603_v53 = vcombine.high %v2361_v45, %v2365_v48  ;;  %v2137_v54 = vld [vmem:[%s13217_s28 + $0x8] sm:$0xf] }
 0x1c6   :  { %9420 = vmatprep.subr.bf16.mxu1 %v13099_v47  ;;  %9400 = vmatprep.subr.bf16.mxu0 %v13099_v47 }
 0x1c9   :  { %9421 = vmatpush3.bf16.msra.mxu1 %v9659_v55  ;;  %9401 = vmatpush3.bf16.msra.mxu0 %v9660_v56  ;;  %v8608_v55 = vcombine.low %v2368_v36, %v2372_v37  ;;  %v2353_v56 = vld [vmem:[#allocation7 + $0x148] sm:$0xff]  ;;  %v2312_v36 = vld [vmem:[#allocation7] sm:$0xff] }
 0x1ca   :  { %9422 = vmatprep.subr.bf16.mxu1 %v13099_v47  ;;  %9402 = vmatprep.subr.bf16.mxu0 %v13099_v47  ;;  %v2316_v37 = vld [vmem:[#allocation7 + $0x20] sm:$0xff] }
 0x1cd   :  { %9423 = vmatpush3.bf16.msra.mxu1 %v9661_v57  ;;  %9403 = vmatpush3.bf16.msra.mxu0 %v9662_v58  ;;  %v2357_v57 = vld [vmem:[#allocation7 + $0x168] sm:$0xff]  ;;  %v8601_v58 = vcombine.high %v2360_v51, %v2364_v52 }
 0x1ce   :  { %9424 = vmatprep.subr.bf16.mxu1 %v13099_v47  ;;  %9404 = vmatprep.subr.bf16.mxu0 %v13099_v47 }
 0x1d1   :  { %9425 = vmatpush3.bf16.msra.mxu1 %v9663_v59  ;;  %9405 = vmatpush3.bf16.msra.mxu0 %v9664_v60  ;;  %v8602_v59 = vcombine.low %v2361_v45, %v2365_v48  ;;  %v2352_v60 = vld [vmem:[#allocation7 + $0x140] sm:$0xff]  ;;  %v2370_v45 = vld [vmem:[#allocation7 + $0x1d0] sm:$0xff] }
 0x1d2   :  { %9426 = vmatprep.subr.bf16.mxu1 %v13099_v47  ;;  %9406 = vmatprep.subr.bf16.mxu0 %v13099_v47  ;;  %v2374_v48 = vld [vmem:[#allocation7 + $0x1f0] sm:$0xff] }
 0x1d5   :  { %9427 = vmatpush3.bf16.msra.mxu1 %v9665_v61  ;;  %9407 = vmatpush3.bf16.msra.mxu0 %v9666_v62  ;;  %v2356_v61 = vld [vmem:[#allocation7 + $0x160] sm:$0xff]  ;;  %v8595_v62 = vcombine.high %v2353_v56, %v2357_v57 }
 0x1d6   :  { %v8592_v7 = vcombine.low %v2352_v60, %v2356_v61 }
 0x238   :  { %v1774_v63 = vpop.f32.mrf.mxu0  ;;  %v1815_v0 = vpop.f32.mrf.mxu1 }
 0x239   :  { %v1775_v13 = vadd.f32 %v1774_v63, %v1093_v11  ;;  %v8600_v63 = vcombine.low %v2360_v51, %v2364_v52  ;;  %v8613_v51 = vcombine.high %v2370_v45, %v2374_v48  ;;  %v2375_v52 = vld [vmem:[#allocation7 + $0x1f8] sm:$0xff] }
 0x23a   :  { %v1776_v1 = vpop.f32.mrf.mxu0  ;;  %v1817_v2 = vpop.f32.mrf.mxu1 }
 0x23b   :  { %v1777_v14 = vadd.f32 %v1776_v1, %v1097_v12  ;;  %v1816_v15 = vadd.f32 %v1815_v0, %v1775_v13  ;;  %v2345_v0 = vld [vmem:[#allocation7 + $0x108] sm:$0xff]  ;;  %v2336_v13 = vld [vmem:[#allocation7 + $0xc0] sm:$0xff] }
 0x23c   :  { %v1778_v3 = vpop.f32.mrf.mxu0  ;;  %v1819_v4 = vpop.f32.mrf.mxu1  ;;  %v2349_v1 = vld [vmem:[#allocation7 + $0x128] sm:$0xff] }
 0x23d   :  { %v1818_v44 = vadd.f32 %v1817_v2, %v1777_v14  ;;  %v8593_v2 = vcombine.high %v2352_v60, %v2356_v61  ;;  %v8594_v3 = vcombine.low %v2353_v56, %v2357_v57  ;;  %v2344_v4 = vld [vmem:[#allocation7 + $0x100] sm:$0xff]  ;;  %v8586_v11 = vcombine.low %v2345_v0, %v2349_v1 }
 0x23e   :  { %v1779_v5 = vpop.f32.mrf.mxu0  ;;  %v1820_v6 = vpop.f32.mrf.mxu1  ;;  %v2340_v14 = vld [vmem:[#allocation7 + $0xe0] sm:$0xff] }
 0x23f   :  { %v2348_v5 = vld [vmem:[#allocation7 + $0x120] sm:$0xff]  ;;  %v8587_v6 = vcombine.high %v2345_v0, %v2349_v1 }
 0x240   :  { %v8585_v10 = vcombine.high %v2344_v4, %v2348_v5  ;;  %v8584_v12 = vcombine.low %v2344_v4, %v2348_v5 }
 0x278   :  { %v1856_v16 = vpop.f32.mrf.mxu0  ;;  %v1897_v18 = vpop.f32.mrf.mxu1 }
 0x279   :  { %v1857_v17 = vadd.f32 %v1856_v16, %v1816_v15  ;;  %v2337_v15 = vld [vmem:[#allocation7 + $0xc8] sm:$0xff]  ;;  %v8577_v16 = vcombine.high %v2336_v13, %v2340_v14 }
 0x27a   :  { %v1858_v19 = vpop.f32.mrf.mxu0  ;;  %v1899_v22 = vpop.f32.mrf.mxu1 }
 0x27b   :  { %v1898_v20 = vadd.f32 %v1897_v18, %v1857_v17  ;;  %v1859_v21 = vadd.f32 %v1858_v19, %v1818_v44  ;;  %v2341_v44 = vld [vmem:[#allocation7 + $0xe8] sm:$0xff]  ;;  %v8576_v17 = vcombine.low %v2336_v13, %v2340_v14 }
 0x27c   :  { %v1860_v23 = vpop.f32.mrf.mxu0  ;;  %v1901_v25 = vpop.f32.mrf.mxu1  ;;  %v8578_v18 = vcombine.low %v2337_v15, %v2341_v44  ;;  %v8579_v19 = vcombine.high %v2337_v15, %v2341_v44  ;;  %v2362_v44 = vld [vmem:[#allocation7 + $0x190] sm:$0xff] }
 0x27d   :  { %1904 = vst [vmem:[%s13088_s21] sm:$0xff] %v1898_v20  ;;  %v1900_v24 = vadd.f32 %v1899_v22, %v1859_v21  ;;  %v2332_v21 = vld [vmem:[#allocation7 + $0xa0] sm:$0xff]  ;;  %v2329_v22 = vld [vmem:[#allocation7 + $0x88] sm:$0xff] }
 0x27e   :  { %v1861_v26 = vpop.f32.mrf.mxu0  ;;  %v1902_v28 = vpop.f32.mrf.mxu1 }
 0x27f   :  { %1905 = vst [vmem:[%s13088_s21 + $0x8] sm:$0xff] %v1900_v24  ;;  %v1907_v27 = vmul.f32 0.5, %v1900_v24  ;;  %v2333_v24 = vld [vmem:[#allocation7 + $0xa8] sm:$0xff]  ;;  %v2320_v28 = vld [vmem:[#allocation7 + $0x40] sm:$0xff] }
 0x280   :  { %v8570_v26 = vcombine.low %v2329_v22, %v2333_v24 }
 0x281   :  { %v1908_v29 = vmul.f32 1.442695, %v1907_v27  ;;  %v8571_v27 = vcombine.high %v2329_v22, %v2333_v24 }
 0x283   :  { %9923 = vpow2.f32 %v1908_v29  ;;  %v2324_v29 = vld [vmem:[#allocation7 + $0x60] sm:$0xff] }
 0x284   :  { %v8560_v33 = vcombine.low %v2320_v28, %v2324_v29 }
 0x290   :  { %v9924_v31 = vpop.eup %9923 }
 0x291   :  { %v1910_v32 = vmul.f32 %v9924_v31, %v1906_v30  ;;  %v8561_v30 = vcombine.high %v2320_v28, %v2324_v29  ;;  %v2321_v31 = vld [vmem:[#allocation7 + $0x48] sm:$0xff]  ;;  %v2359_v28 = vld [vmem:[#allocation7 + $0x178] sm:$0xff] }
 0x293   :  { %v1911_v35 = vadd.f32 %v1910_v32, %v1898_v20  ;;  %v2328_v20 = vld [vmem:[#allocation7 + $0x80] sm:$0xff]  ;;  %v2325_v32 = vld [vmem:[#allocation7 + $0x68] sm:$0xff] }
 0x294   :  { %v8569_v23 = vcombine.high %v2328_v20, %v2332_v21  ;;  %v8568_v25 = vcombine.low %v2328_v20, %v2332_v21  ;;  %v8562_v34 = vcombine.low %v2321_v31, %v2325_v32 }
 0x295   :  { %1912 = vst [vmem:[%s13089_s22] sm:$0xff] %v1911_v35  ;;  %9432 = vmatprep.subr.mxu0 %v1911_v35  ;;  %9437 = vmatprep.subr.mxu1 %v1911_v35  ;;  %v1913_v38 = vpack.c.bf16 %v1911_v35, %v1911_v35 }
 0x297   :  { %9429 = vmatmul.mubr.bf16.vlgmr.msra.gmra.mxu1 %v1913_v38  ;;  %v1947_v41 = vrot.slane %v1913_v38, 1  ;;  %v2313_v38 = vld [vmem:[#allocation7 + $0x8] sm:$0xff] }
 0x298   :  { %9438 = vmatpush3.msra.mxu1 %v1911_v35  ;;  %9439 = vmatprep.mubr.msk.f32.mxu1 %vm2138_vm2, %v2224_v39  ;;  %v8553_v39 = vcombine.high %v2312_v36, %v2316_v37 }
 0x299   :  { %9409 = vmatmul.mubr.bf16.vlgmr.msra.gmra.mxu0 %v1947_v41  ;;  %2739 = vmatprep.subr.bf16.mxu1 %v8611_v40  ;;  %v2317_v40 = vld [vmem:[#allocation7 + $0x28] sm:$0xff]  ;;  %v8552_v41 = vcombine.low %v2312_v36, %v2316_v37  ;;  %v2351_v36 = vld [vmem:[#allocation7 + $0x138] sm:$0xff] }
 0x29a   :  { %9433 = vmatpush3.msra.mxu0 %v1911_v35  ;;  %9434 = vmatprep.mubr.msk.f32.mxu0 %vm2138_vm2, %v2136_v42  ;;  %v8563_v35 = vcombine.high %v2321_v31, %v2325_v32  ;;  %v8554_v42 = vcombine.low %v2313_v38, %v2317_v40 }
 0x29b   :  { %2696 = vmatprep.subr.bf16.mxu0 %v8609_v43  ;;  %v8555_v43 = vcombine.high %v2313_v38, %v2317_v40 }
 0x29f   :  { %9440 = vmatmul.mubr.msk.f32.vlgmr.msra.gmra.mxu1 %vm2138_vm2, %v2225_v49  ;;  %v2371_v49 = vld [vmem:[#allocation7 + $0x1d8] sm:$0xff] }
 0x2a0   :  { %2740 = vmatpush1.bf16.msra.mxu1 %v8610_v50  ;;  %v8612_v50 = vcombine.low %v2370_v45, %v2374_v48  ;;  %v2343_v45 = vld [vmem:[#allocation7 + $0xf8] sm:$0xff] }
 0x2a1   :  { %9435 = vmatmul.mubr.msk.f32.vlgmr.msra.gmra.mxu0 %vm2138_vm2, %v2137_v54  ;;  %2741 = vmatprep.subr.bf16.mxu1 %v8603_v53  ;;  %v10145_v53 = vmov 0   ;;  %v8614_v54 = vcombine.low %v2371_v49, %v2375_v52 }
 0x2a2   :  { %2697 = vmatpush1.bf16.msra.mxu0 %v8608_v55  ;;  %2728 = vmatprep.mubr.bf16.mxu0 %v10145_v53  ;;  %v8615_v55 = vcombine.high %v2371_v49, %v2375_v52  ;;  %v2330_v52 = vld [vmem:[#allocation7 + $0x90] sm:$0xff] }
 0x2a3   :  { %2698 = vmatprep.subr.bf16.mxu0 %v8601_v58  ;;  %2771 = vmatprep.mubr.bf16.mxu1 %v10145_v53  ;;  %v8547_v58 = vld [vmem:[#allocation6] ss:$0 sm:$0xff] }
 0x2a4   :  { %2742 = vmatpush1.bf16.msra.mxu1 %v8602_v59 }
 0x2a5   :  { %2743 = vmatprep.subr.bf16.mxu1 %v8595_v62 }
 0x2a6   :  { %2699 = vmatpush1.bf16.msra.mxu0 %v8600_v63  ;;  %v2135_v63 = vld [vmem:[%s13077_s10 + $0x8] sm:$0xf] }
 0x2a7   :  { %2700 = vmatprep.subr.bf16.mxu0 %v8593_v2  ;;  %v2223_v4 = vsub.f32 1.0, %v2135_v63 }
 0x2a8   :  { %2744 = vmatpush1.bf16.msra.mxu1 %v8594_v3  ;;  %v2134_v3 = vld [vmem:[%s13077_s10] sm:$0xff] }
 0x2a9   :  { %2745 = vmatprep.subr.bf16.mxu1 %v8587_v6 }
 0x2aa   :  { %2701 = vmatpush1.bf16.msra.mxu0 %v8592_v7  ;;  %v2222_v7 = vsub.f32 1.0, %v2134_v3 }
 0x2ab   :  { %2702 = vmatprep.subr.bf16.mxu0 %v8585_v10 }
 0x2ac   :  { %2746 = vmatpush1.bf16.msra.mxu1 %v8586_v11 }
 0x2ad   :  { %2747 = vmatprep.subr.bf16.mxu1 %v8579_v19  ;;  %v2367_v19 = vld [vmem:[#allocation7 + $0x1b8] sm:$0xff] }
 0x2ae   :  { %2703 = vmatpush1.bf16.msra.mxu0 %v8584_v12 }
 0x2af   :  { %2704 = vmatprep.subr.bf16.mxu0 %v8577_v16 }
 0x2b0   :  { %2748 = vmatpush1.bf16.msra.mxu1 %v8578_v18  ;;  %v2363_v18 = vld [vmem:[#allocation7 + $0x198] sm:$0xff] }
 0x2b1   :  { %2749 = vmatprep.subr.bf16.mxu1 %v8571_v27  ;;  %v8607_v24 = vcombine.high %v2363_v18, %v2367_v19  ;;  %v2355_v27 = vld [vmem:[#allocation7 + $0x158] sm:$0xff] }
 0x2b2   :  { %2705 = vmatpush1.bf16.msra.mxu0 %v8576_v17  ;;  %v2366_v17 = vld [vmem:[#allocation7 + $0x1b0] sm:$0xff]  ;;  %v8599_v32 = vcombine.high %v2355_v27, %v2359_v28  ;;  %v8598_v38 = vcombine.low %v2355_v27, %v2359_v28 }
 0x2b3   :  { %2706 = vmatprep.subr.bf16.mxu0 %v8569_v23  ;;  %v8605_v23 = vcombine.high %v2362_v44, %v2366_v17  ;;  %v8604_v29 = vcombine.low %v2362_v44, %v2366_v17 }
 0x2b4   :  { %2750 = vmatpush1.bf16.msra.mxu1 %v8570_v26  ;;  %v2358_v26 = vld [vmem:[#allocation7 + $0x170] sm:$0xff] }
 0x2b5   :  { %2751 = vmatprep.subr.bf16.mxu1 %v8563_v35  ;;  %v2347_v35 = vld [vmem:[#allocation7 + $0x118] sm:$0xff] }
 0x2b6   :  { %2707 = vmatpush1.bf16.msra.mxu0 %v8568_v25  ;;  %v2354_v25 = vld [vmem:[#allocation7 + $0x150] sm:$0xff]  ;;  %v8591_v40 = vcombine.high %v2347_v35, %v2351_v36  ;;  %v8590_v49 = vcombine.low %v2347_v35, %v2351_v36 }
 0x2b7   :  { %2708 = vmatprep.subr.bf16.mxu0 %v8561_v30  ;;  %v8606_v30 = vcombine.low %v2363_v18, %v2367_v19  ;;  %v8597_v31 = vcombine.high %v2354_v25, %v2358_v26  ;;  %v8596_v37 = vcombine.low %v2354_v25, %v2358_v26 }
 0x2b8   :  { %2752 = vmatpush1.bf16.msra.mxu1 %v8562_v34  ;;  %v2350_v34 = vld [vmem:[#allocation7 + $0x130] sm:$0xff] }
 0x2b9   :  { %2753 = vmatprep.subr.bf16.mxu1 %v8555_v43  ;;  %v2339_v43 = vld [vmem:[#allocation7 + $0xd8] sm:$0xff] }
 0x2ba   :  { %2709 = vmatpush1.bf16.msra.mxu0 %v8560_v33  ;;  %v2346_v33 = vld [vmem:[#allocation7 + $0x110] sm:$0xff] }
 0x2bb   :  { %2710 = vmatprep.subr.bf16.mxu0 %v8553_v39  ;;  %v8589_v39 = vcombine.high %v2346_v33, %v2350_v34  ;;  %v8588_v48 = vcombine.low %v2346_v33, %v2350_v34 }
 0x2bc   :  { %2754 = vmatpush1.bf16.msra.mxu1 %v8554_v42  ;;  %v2342_v42 = vld [vmem:[#allocation7 + $0xf0] sm:$0xff] }
 0x2bd   :  { %2825 = vmatprep.subr.bf16.mxu1 %v8615_v55  ;;  %v2335_v55 = vld [vmem:[#allocation7 + $0xb8] sm:$0xff] }
 0x2be   :  { %2711 = vmatpush1.bf16.msra.mxu0 %v8552_v41  ;;  %v2338_v41 = vld [vmem:[#allocation7 + $0xd0] sm:$0xff] }
 0x2bf   :  { %2782 = vmatprep.subr.bf16.mxu0 %v8613_v51  ;;  %v8583_v51 = vcombine.high %v2339_v43, %v2343_v45 }
 0x357   :  { %v2119_v56 = vpop.f32.mrf.mxu1 }
 0x359   :  { %v2031_v57 = vpop.f32.mrf.mxu0  ;;  %v9430_v59 = vpop.f32.mrf.mxu1 }
 0x35a   :  { %v2120_v60 = vadd.f32 %v2119_v56, %v2031_v57  ;;  %v8580_v56 = vcombine.low %v2338_v41, %v2342_v42  ;;  %v8582_v57 = vcombine.low %v2339_v43, %v2343_v45 }
 0x35b   :  { %v9410_v61 = vpop.f32.mrf.mxu0  ;;  %v2122_v62 = vpop.f32.mrf.mxu1 }
 0x35c   :  { %v2132_v0 = vadd.f32 %v8547_v58, %v2120_v60  ;;  %v2322_v60 = vld [vmem:[#allocation7 + $0x50] sm:$0xff]  ;;  %v2323_v62 = vld [vmem:[#allocation7 + $0x58] sm:$0xff] }
 0x35d   :  { %v2034_v1 = vpop.f32.mrf.mxu0  ;;  %v9431_v2 = vpop.f32.mrf.mxu1  ;;  %v2326_v61 = vld [vmem:[#allocation7 + $0x70] sm:$0xff] }
 0x35e   :  { %2133 = vst [vmem:[%s13090_s23] sm:$0x3] %v2132_v0  ;;  %v8565_v2 = vcombine.high %v2322_v60, %v2326_v61 }
 0x35f   :  { %v9411_v5 = vpop.f32.mrf.mxu0  ;;  %v9441_v6 = vpop.f32.mrf.mxu1 }
 0x360   :  { %v2308_v12 = vmul.f32 %v9441_v6, %v2223_v4  ;;  %v2314_v4 = vld [vmem:[#allocation7 + $0x10] sm:$0xff]  ;;  %v2315_v6 = vld [vmem:[#allocation7 + $0x18] sm:$0xff] }
 0x361   :  { %v9436_v10 = vpop.f32.mrf.mxu0  ;;  %v2298_v11 = vpop.f32.mrf.mxu1  ;;  %v2318_v5 = vld [vmem:[#allocation7 + $0x30] sm:$0xff] }
 0x362   :  { %v2221_v13 = vmul.f32 %v9436_v10, %v2135_v63  ;;  %v2307_v15 = vmul.f32 %v2298_v11, %v2222_v7  ;;  %v2327_v63 = vld [vmem:[#allocation7 + $0x78] sm:$0xff]  ;;  %v8564_v10 = vcombine.low %v2322_v60, %v2326_v61  ;;  %v10994_v60 = vld [vmem:[%s13081_s14 + $0x1e8] sm:$0xff] }
 0x363   :  { %v2211_v14 = vpop.f32.mrf.mxu0  ;;  %v2319_v7 = vld [vmem:[#allocation7 + $0x38] sm:$0xff]  ;;  %v8566_v11 = vcombine.low %v2323_v62, %v2327_v63  ;;  %v11001_v61 = vld [vmem:[%s13081_s14 + $0x68] sm:$0xff] }
 0x364   :  { %v2220_v16 = vmul.f32 %v2211_v14, %v2134_v3  ;;  %v2310_v20 = vadd.f32 %v2308_v12, %v2221_v13  ;;  %v8567_v3 = vcombine.high %v2323_v62, %v2327_v63  ;;  %v8557_v12 = vcombine.high %v2314_v4, %v2318_v5  ;;  %v11006_v62 = vld [vmem:[%s13081_s14 + $0x168] sm:$0xff]  ;;  %v11013_v63 = vld [vmem:[%s13081_s14 + $0xe0] sm:$0xff] }
 0x365   :  { %v8559_v13 = vcombine.high %v2315_v6, %v2319_v7  ;;  %v8556_v14 = vcombine.low %v2314_v4, %v2318_v5  ;;  %v11042_v4 = vld [vmem:[%s13081_s14 + $0x1d8] sm:$0xff] }
 0x366   :  { %v2309_v21 = vadd.f32 %v2307_v15, %v2220_v16  ;;  %v8558_v15 = vcombine.low %v2315_v6, %v2319_v7  ;;  %v11049_v5 = vld [vmem:[%s13081_s14 + $0x58] sm:$0xff]  ;;  %v11061_v7 = vld [vmem:[%s13081_s14 + $0xd0] sm:$0xff] }
 0x367   :  { %v11054_v6 = vld [vmem:[%s13081_s14 + $0x158] sm:$0xff] }
 0x368   :  { %v10814_v22 = vpack.c.bf16 %v2310_v20, %v2309_v21 }
 0x36a   :  { %2729 = vmatmul.mubr.bf16.vlgmr.msra.gmra.mxu0 %v10814_v22  ;;  %2772 = vmatmul.mubr.bf16.vlgmr.msra.gmra.mxu1 %v10814_v22 }
 0x36b   :  { %2783 = vmatpush1.bf16.msra.mxu0 %v8612_v50  ;;  %2826 = vmatpush1.bf16.msra.mxu1 %v8614_v54  ;;  %v8581_v50 = vcombine.high %v2338_v41, %v2342_v42  ;;  %v2331_v54 = vld [vmem:[#allocation7 + $0x98] sm:$0xff] }
 0x36c   :  { %2784 = vmatprep.subr.bf16.mxu0 %v8605_v23  ;;  %2827 = vmatprep.subr.bf16.mxu1 %v8607_v24  ;;  %v8575_v59 = vcombine.high %v2331_v54, %v2335_v55  ;;  %v8574_v1 = vcombine.low %v2331_v54, %v2335_v55  ;;  %v10846_v23 = vld [vmem:[#allocation9] sm:$0x3f]  ;;  %v10956_v54 = vld [vmem:[%s13081_s14 + $0x178] sm:$0xff]  ;;  %v10965_v55 = vld [vmem:[%s13081_s14 + $0xf0] sm:$0xff] }
 0x36d   :  { %2814 = vmatprep.mubr.bf16.mxu0 %v10145_v53  ;;  %2857 = vmatprep.mubr.bf16.mxu1 %v10145_v53  ;;  %v2334_v53 = vld [vmem:[#allocation7 + $0xb0] sm:$0xff] }
 0x36e   :  { %v8573_v58 = vcombine.high %v2330_v52, %v2334_v53  ;;  %v8572_v0 = vcombine.low %v2330_v52, %v2334_v53  ;;  %v10944_v52 = vld [vmem:[%s13081_s14 + $0x1f8] sm:$0xff] }
 0x36f   :  { %2785 = vmatpush1.bf16.msra.mxu0 %v8604_v29  ;;  %2828 = vmatpush1.bf16.msra.mxu1 %v8606_v30  ;;  %v10951_v53 = vld [vmem:[%s13081_s14 + $0x78] sm:$0xff] }
 0x370   :  { %2786 = vmatprep.subr.bf16.mxu0 %v8597_v31  ;;  %2829 = vmatprep.subr.bf16.mxu1 %v8599_v32 }
 0x373   :  { %2787 = vmatpush1.bf16.msra.mxu0 %v8596_v37  ;;  %2830 = vmatpush1.bf16.msra.mxu1 %v8598_v38 }
 0x374   :  { %2788 = vmatprep.subr.bf16.mxu0 %v8589_v39  ;;  %2831 = vmatprep.subr.bf16.mxu1 %v8591_v40 }
 0x377   :  { %2789 = vmatpush1.bf16.msra.mxu0 %v8588_v48  ;;  %2832 = vmatpush1.bf16.msra.mxu1 %v8590_v49 }
 0x378   :  { %2790 = vmatprep.subr.bf16.mxu0 %v8581_v50  ;;  %2833 = vmatprep.subr.bf16.mxu1 %v8583_v51  ;;  %v10939_v51 = vld [vmem:[%s13081_s14 + $0xf8] sm:$0xff] }
 0x37b   :  { %2791 = vmatpush1.bf16.msra.mxu0 %v8580_v56  ;;  %2834 = vmatpush1.bf16.msra.mxu1 %v8582_v57  ;;  %v10970_v56 = vld [vmem:[%s13081_s14 + $0x1f0] sm:$0xff] }
 0x37c   :  { %2792 = vmatprep.subr.bf16.mxu0 %v8573_v58  ;;  %2835 = vmatprep.subr.bf16.mxu1 %v8575_v59  ;;  %v10977_v57 = vld [vmem:[%s13081_s14 + $0x70] sm:$0xff]  ;;  %v10989_v59 = vld [vmem:[%s13081_s14 + $0xe8] sm:$0xff] }
 0x37d   :  { %v10982_v58 = vld [vmem:[%s13081_s14 + $0x170] sm:$0xff] }
 0x37f   :  { %2793 = vmatpush1.bf16.msra.mxu0 %v8572_v0  ;;  %2836 = vmatpush1.bf16.msra.mxu1 %v8574_v1  ;;  %v11018_v0 = vld [vmem:[%s13081_s14 + $0x1e0] sm:$0xff] }
 0x380   :  { %2794 = vmatprep.subr.bf16.mxu0 %v8565_v2  ;;  %2837 = vmatprep.subr.bf16.mxu1 %v8567_v3  ;;  %v11025_v1 = vld [vmem:[%s13081_s14 + $0x60] sm:$0xff]  ;;  %v11037_v3 = vld [vmem:[%s13081_s14 + $0xd8] sm:$0xff] }
 0x381   :  { %v11030_v2 = vld [vmem:[%s13081_s14 + $0x160] sm:$0xff] }
 0x383   :  { %2795 = vmatpush1.bf16.msra.mxu0 %v8564_v10  ;;  %2838 = vmatpush1.bf16.msra.mxu1 %v8566_v11  ;;  %v11066_v10 = vld [vmem:[%s13081_s14 + $0x1d0] sm:$0xff] }
 0x384   :  { %2796 = vmatprep.subr.bf16.mxu0 %v8557_v12  ;;  %2839 = vmatprep.subr.bf16.mxu1 %v8559_v13  ;;  %v11073_v11 = vld [vmem:[%s13081_s14 + $0x50] sm:$0xff]  ;;  %v11085_v13 = vld [vmem:[%s13081_s14 + $0xc8] sm:$0xff] }
 0x385   :  { %v11078_v12 = vld [vmem:[%s13081_s14 + $0x150] sm:$0xff] }
 0x387   :  { %2797 = vmatpush1.bf16.msra.mxu0 %v8556_v14  ;;  %2840 = vmatpush1.bf16.msra.mxu1 %v8558_v15  ;;  %v11090_v14 = vld [vmem:[%s13081_s14 + $0x1c8] sm:$0xff] }
 0x388   :  { %v11097_v15 = vld [vmem:[%s13081_s14 + $0x48] sm:$0xff] }
 0x38a   :  { %2815 = vmatmul.mubr.bf16.vlgmr.msra.gmra.mxu0 %v10814_v22  ;;  %2858 = vmatmul.mubr.bf16.vlgmr.msra.gmra.mxu1 %v10814_v22 }
 0x38b   :  { %2962 = vmatprep.mubr.f32.mxu0 %v13099_v47  ;;  %3033 = vmatprep.mubr.f32.mxu1 %v13099_v47 }
 0x42a   :  { %v10822_v16 = vpop.f32.mrf.mxu0  ;;  %v10824_v44 = vpop.f32.mrf.mxu1 }
 0x42b   :  { %13218 = vst [vmem:[#allocation24_spill] sm:$0xff] %v10822_v16  ;;  %13219 = vst [vmem:[#allocation25_spill] sm:$0xff] %v10824_v44  ;;  %v3182_v38 = vmul.f32 %v10822_v16, %v10822_v16  ;;  %v3184_v39 = vmul.f32 %v10824_v44, %v10824_v44 }
 0x42c   :  { %v10826_v17 = vpop.f32.mrf.mxu0  ;;  %v10828_v18 = vpop.f32.mrf.mxu1 }
 0x42d   :  { %13220 = vst [vmem:[#allocation26_spill] sm:$0xff] %v10826_v17  ;;  %13221 = vst [vmem:[#allocation27_spill] sm:$0xff] %v10828_v18  ;;  %v3183_v36 = vmul.f32 %v10826_v17, %v10826_v17  ;;  %v3185_v37 = vmul.f32 %v10828_v18, %v10828_v18 }
 0x42e   :  { %v10830_v19 = vpop.f32.mrf.mxu0  ;;  %v10832_v20 = vpop.f32.mrf.mxu1 }
 0x42f   :  { %13222 = vst [vmem:[#allocation28_spill] sm:$0xff] %v10830_v19  ;;  %13223 = vst [vmem:[#allocation29_spill] sm:$0xff] %v10832_v20  ;;  %v3190_v34 = vmul.f32 %v10830_v19, %v10830_v19  ;;  %v3192_v35 = vmul.f32 %v10832_v20, %v10832_v20 }
 0x430   :  { %v10834_v21 = vpop.f32.mrf.mxu0  ;;  %v10836_v22 = vpop.f32.mrf.mxu1 }
 0x431   :  { %13224 = vst [vmem:[#allocation30_spill] sm:$0xff] %v10834_v21  ;;  %13225 = vst [vmem:[#allocation31_spill] sm:$0xff] %v10836_v22  ;;  %8616 = vmatprep.subr.msk.mxu0 %vm2873_vm3, %v10834_v21  ;;  %8619 = vmatprep.subr.msk.mxu1 %vm2873_vm3, %v10836_v22  ;;  %v3191_v32 = vmul.f32 %v10834_v21, %v10834_v21  ;;  %v3193_v33 = vmul.f32 %v10836_v22, %v10836_v22  ;;  %v11258_v22 = vld [vmem:[%s13081_s14 + $0x190] sm:$0xff] }
 0x432   :  { %8617 = vmatpush1.msk.msra.mxu0 %vm2873_vm3, %v10830_v19  ;;  %8620 = vmatpush1.msk.msra.mxu1 %vm2873_vm3, %v10832_v20  ;;  %13235 = vst [vmem:[#allocation41_spill] sm:$0xff] %v11258_v22  ;;  %v11265_v21 = vld [vmem:[%s13081_s14 + $0x10] sm:$0xff]  ;;  %v11277_v19 = vld [vmem:[%s13081_s14 + $0x88] sm:$0xff] }
 0x433   :  { %2928 = vmatprep.subr.mxu0 %v10826_v17  ;;  %2999 = vmatprep.subr.mxu1 %v10828_v18  ;;  %13236 = vst [vmem:[#allocation42_spill] sm:$0xff] %v11265_v21  ;;  %v11270_v20 = vld [vmem:[%s13081_s14 + $0x110] sm:$0xff]  ;;  %13238 = vst [vmem:[#allocation44_spill] sm:$0xff] %v11277_v19  ;;  %v11289_v18 = vld [vmem:[%s13081_s14 + $0x8] sm:$0xff] }
 0x434   :  { %2929 = vmatpush1.msra.mxu0 %v10822_v16  ;;  %3000 = vmatpush1.msra.mxu1 %v10824_v44  ;;  %13237 = vst [vmem:[#allocation43_spill] sm:$0xff] %v11270_v20  ;;  %v11282_v44 = vld [vmem:[%s13081_s14 + $0x188] sm:$0xff]  ;;  %13240 = vst [vmem:[#allocation46_spill] sm:$0xff] %v11289_v18  ;;  %v11301_v16 = vld [vmem:[%s13081_s14 + $0x80] sm:$0xff] }
 0x435   :  { %8618 = vmatmul.mubr.msk.f32.vlgmr.msra.gmra.mxu0 %vm2869_vm4, %v10846_v23  ;;  %8621 = vmatmul.mubr.msk.f32.vlgmr.msra.gmra.mxu1 %vm2869_vm4, %v10846_v23  ;;  %13239 = vst [vmem:[#allocation45_spill] sm:$0xff] %v11282_v44  ;;  %v11294_v17 = vld [vmem:[%s13081_s14 + $0x108] sm:$0xff]  ;;  %13242 = vst [vmem:[#allocation48_spill] sm:$0xff] %v11301_v16 }
 0x436   :  { %3104 = vmatprep.mubr.f32.mxu0 %v13099_v47  ;;  %3175 = vmatprep.mubr.f32.mxu1 %v13099_v47  ;;  %13241 = vst [vmem:[#allocation47_spill] sm:$0xff] %v11294_v17 }
 0x44a   :  { %v10858_v24 = vpop.f32.mrf.mxu0  ;;  %v10860_v25 = vpop.f32.mrf.mxu1 }
 0x44b   :  { %13226 = vst [vmem:[#allocation32_spill] sm:$0xff] %v10858_v24  ;;  %13227 = vst [vmem:[#allocation33_spill] sm:$0xff] %v10860_v25  ;;  %v3186_v49 = vmul.f32 %v10858_v24, %v10858_v24  ;;  %v3188_v50 = vmul.f32 %v10860_v25, %v10860_v25 }
 0x44c   :  { %v10862_v26 = vpop.f32.mrf.mxu0  ;;  %v10864_v27 = vpop.f32.mrf.mxu1 }
 0x44d   :  { %13228 = vst [vmem:[#allocation34_spill] sm:$0xff] %v10862_v26  ;;  %13229 = vst [vmem:[#allocation35_spill] sm:$0xff] %v10864_v27  ;;  %v3187_v45 = vmul.f32 %v10862_v26, %v10862_v26  ;;  %v3189_v48 = vmul.f32 %v10864_v27, %v10864_v27 }
 0x44e   :  { %v10866_v28 = vpop.f32.mrf.mxu0  ;;  %v10868_v29 = vpop.f32.mrf.mxu1 }
 0x44f   :  { %13230 = vst [vmem:[#allocation36_spill] sm:$0xff] %v10866_v28  ;;  %13231 = vst [vmem:[#allocation37_spill] sm:$0xff] %v10868_v29  ;;  %v3194_v42 = vmul.f32 %v10866_v28, %v10866_v28  ;;  %v3196_v43 = vmul.f32 %v10868_v29, %v10868_v29 }
 0x450   :  { %v10870_v30 = vpop.f32.mrf.mxu0  ;;  %v10872_v31 = vpop.f32.mrf.mxu1 }
 0x451   :  { %13232 = vst [vmem:[#allocation38_spill] sm:$0xff] %v10870_v30  ;;  %13233 = vst [vmem:[#allocation39_spill] sm:$0xff] %v10872_v31  ;;  %8622 = vmatprep.subr.msk.mxu0 %vm2873_vm3, %v10870_v30  ;;  %8625 = vmatprep.subr.msk.mxu1 %vm2873_vm3, %v10872_v31  ;;  %v3195_v40 = vmul.f32 %v10870_v30, %v10870_v30  ;;  %v3197_v41 = vmul.f32 %v10872_v31, %v10872_v31  ;;  %v11210_v31 = vld [vmem:[%s13081_s14 + $0x1a0] sm:$0xff] }
 0x452   :  { %8623 = vmatpush1.msk.msra.mxu0 %vm2873_vm3, %v10866_v28  ;;  %8626 = vmatpush1.msk.msra.mxu1 %vm2873_vm3, %v10868_v29  ;;  %v11217_v30 = vld [vmem:[%s13081_s14 + $0x20] sm:$0xff]  ;;  %v11229_v28 = vld [vmem:[%s13081_s14 + $0x98] sm:$0xff] }
 0x453   :  { %3070 = vmatprep.subr.mxu0 %v10862_v26  ;;  %3141 = vmatprep.subr.mxu1 %v10864_v27  ;;  %v11222_v29 = vld [vmem:[%s13081_s14 + $0x120] sm:$0xff]  ;;  %v11234_v27 = vld [vmem:[%s13081_s14 + $0x198] sm:$0xff] }
 0x454   :  { %3071 = vmatpush1.msra.mxu0 %v10858_v24  ;;  %3142 = vmatpush1.msra.mxu1 %v10860_v25  ;;  %v11241_v26 = vld [vmem:[%s13081_s14 + $0x18] sm:$0xff]  ;;  %v11253_v24 = vld [vmem:[%s13081_s14 + $0x90] sm:$0xff] }
 0x455   :  { %8624 = vmatmul.mubr.msk.f32.vlgmr.msra.gmra.mxu0 %vm2869_vm4, %v10846_v23  ;;  %8627 = vmatmul.mubr.msk.f32.vlgmr.msra.gmra.mxu1 %vm2869_vm4, %v10846_v23  ;;  %v11246_v25 = vld [vmem:[%s13081_s14 + $0x118] sm:$0xff]  ;;  %13234 = vst [vmem:[#allocation40_spill] sm:$0xff] %v11253_v24 }
 0x456   :  { %8628 = vmatprep.subr.msk.mxu0 %vm2873_vm3, %v3191_v32  ;;  %8631 = vmatprep.subr.msk.mxu1 %vm2873_vm3, %v3193_v33  ;;  %v11109_v32 = vld [vmem:[%s13081_s14 + $0xc0] sm:$0xff] }
 0x457   :  { %8629 = vmatpush1.msk.msra.mxu0 %vm2873_vm3, %v3190_v34  ;;  %8632 = vmatpush1.msk.msra.mxu1 %vm2873_vm3, %v3192_v35  ;;  %v11114_v33 = vld [vmem:[%s13081_s14 + $0x1c0] sm:$0xff] }
 0x458   :  { %3252 = vmatprep.subr.mxu0 %v3183_v36  ;;  %3323 = vmatprep.subr.mxu1 %v3185_v37  ;;  %v11121_v34 = vld [vmem:[%s13081_s14 + $0x40] sm:$0xff]  ;;  %v11133_v36 = vld [vmem:[%s13081_s14 + $0xb8] sm:$0xff] }
 0x459   :  { %3253 = vmatpush1.msra.mxu0 %v3182_v38  ;;  %3324 = vmatpush1.msra.mxu1 %v3184_v39  ;;  %v11126_v35 = vld [vmem:[%s13081_s14 + $0x140] sm:$0xff]  ;;  %v11138_v37 = vld [vmem:[%s13081_s14 + $0x1b8] sm:$0xff] }
 0x45a   :  { %3286 = vmatprep.mubr.f32.mxu0 %v13099_v47  ;;  %3357 = vmatprep.mubr.f32.mxu1 %v13099_v47  ;;  %v11145_v38 = vld [vmem:[%s13081_s14 + $0x38] sm:$0xff] }
 0x45b   :  { %8634 = vmatprep.subr.msk.mxu0 %vm2873_vm3, %v3195_v40  ;;  %8637 = vmatprep.subr.msk.mxu1 %vm2873_vm3, %v3197_v41  ;;  %v11150_v39 = vld [vmem:[%s13081_s14 + $0x138] sm:$0xff]  ;;  %v11157_v40 = vld [vmem:[%s13081_s14 + $0xb0] sm:$0xff] }
 0x45c   :  { %8630 = vmatmul.mubr.msk.f32.vlgmr.msra.gmra.mxu0 %vm2869_vm4, %v10846_v23  ;;  %8633 = vmatmul.mubr.msk.f32.vlgmr.msra.gmra.mxu1 %vm2869_vm4, %v10846_v23  ;;  %v11162_v41 = vld [vmem:[%s13081_s14 + $0x1b0] sm:$0xff] }
 0x45d   :  { %8635 = vmatpush1.msk.msra.mxu0 %vm2873_vm3, %v3194_v42  ;;  %8638 = vmatpush1.msk.msra.mxu1 %vm2873_vm3, %v3196_v43  ;;  %v11169_v42 = vld [vmem:[%s13081_s14 + $0x30] sm:$0xff] }
 0x45e   :  { %3394 = vmatprep.subr.mxu0 %v3187_v45  ;;  %3465 = vmatprep.subr.mxu1 %v3189_v48  ;;  %v11174_v43 = vld [vmem:[%s13081_s14 + $0x130] sm:$0xff]  ;;  %v11181_v45 = vld [vmem:[%s13081_s14 + $0xa8] sm:$0xff] }
 0x45f   :  { %3395 = vmatpush1.msra.mxu0 %v3186_v49  ;;  %3466 = vmatpush1.msra.mxu1 %v3188_v50  ;;  %v11186_v48 = vld [vmem:[%s13081_s14 + $0x1a8] sm:$0xff] }
 0x460   :  { %3428 = vmatprep.mubr.f32.mxu0 %v13099_v47  ;;  %3499 = vmatprep.mubr.f32.mxu1 %v13099_v47  ;;  %v11193_v49 = vld [vmem:[%s13081_s14 + $0x28] sm:$0xff]  ;;  %v11205_v47 = vld [vmem:[%s13081_s14 + $0xa0] sm:$0xff] }
 0x461   :  { %8636 = vmatmul.mubr.msk.f32.vlgmr.msra.gmra.mxu0 %vm2869_vm4, %v10846_v23  ;;  %8639 = vmatmul.mubr.msk.f32.vlgmr.msra.gmra.mxu1 %vm2869_vm4, %v10846_v23  ;;  %v11102_v23 = vld [vmem:[%s13081_s14 + $0x148] sm:$0xff] }
 0x462   :  { %9024 = vmatprep.subr.mxu0 %v10939_v51  ;;  %9059 = vmatprep.subr.mxu1 %v10944_v52  ;;  %v11198_v50 = vld [vmem:[%s13081_s14 + $0x128] sm:$0xff] }
 0x463   :  { %9025 = vmatpush3.msra.mxu0 %v10951_v53  ;;  %9060 = vmatpush3.msra.mxu1 %v10956_v54 }
 0x464   :  { %9026 = vmatprep.subr.mxu0 %v10965_v55  ;;  %9061 = vmatprep.subr.mxu1 %v10970_v56 }
 0x465   :  { %9027 = vmatpush3.msra.mxu0 %v10977_v57  ;;  %9062 = vmatpush3.msra.mxu1 %v10982_v58 }
 0x466   :  { %9028 = vmatprep.subr.mxu0 %v10989_v59  ;;  %9063 = vmatprep.subr.mxu1 %v10994_v60 }
 0x467   :  { %9029 = vmatpush3.msra.mxu0 %v11001_v61  ;;  %9064 = vmatpush3.msra.mxu1 %v11006_v62 }
 0x468   :  { %9030 = vmatprep.subr.mxu0 %v11013_v63  ;;  %9065 = vmatprep.subr.mxu1 %v11018_v0 }
 0x469   :  { %9031 = vmatpush3.msra.mxu0 %v11025_v1  ;;  %9066 = vmatpush3.msra.mxu1 %v11030_v2 }
 0x46a   :  { %9032 = vmatprep.subr.mxu0 %v11037_v3  ;;  %9067 = vmatprep.subr.mxu1 %v11042_v4 }
 0x46b   :  { %9033 = vmatpush3.msra.mxu0 %v11049_v5  ;;  %9068 = vmatpush3.msra.mxu1 %v11054_v6 }
 0x46c   :  { %9034 = vmatprep.subr.mxu0 %v11061_v7  ;;  %9069 = vmatprep.subr.mxu1 %v11066_v10 }
 0x46d   :  { %9035 = vmatpush3.msra.mxu0 %v11073_v11  ;;  %9070 = vmatpush3.msra.mxu1 %v11078_v12 }
 0x46e   :  { %9036 = vmatprep.subr.mxu0 %v11085_v13  ;;  %9071 = vmatprep.subr.mxu1 %v11090_v14 }
 0x46f   :  { %9037 = vmatpush3.msra.mxu0 %v11097_v15  ;;  %9072 = vmatpush3.msra.mxu1 %v11102_v23 }
 0x470   :  { %9038 = vmatprep.subr.mxu0 %v11109_v32  ;;  %9073 = vmatprep.subr.mxu1 %v11114_v33 }
 0x471   :  { %9039 = vmatpush3.msra.mxu0 %v11121_v34  ;;  %9074 = vmatpush3.msra.mxu1 %v11126_v35 }
 0x472   :  { %9040 = vmatprep.subr.mxu0 %v11133_v36  ;;  %9075 = vmatprep.subr.mxu1 %v11138_v37 }
 0x473   :  { %9041 = vmatpush3.msra.mxu0 %v11145_v38  ;;  %9076 = vmatpush3.msra.mxu1 %v11150_v39 }
 0x474   :  { %9042 = vmatprep.subr.mxu0 %v11157_v40  ;;  %9077 = vmatprep.subr.mxu1 %v11162_v41 }
 0x475   :  { %9043 = vmatpush3.msra.mxu0 %v11169_v42  ;;  %9078 = vmatpush3.msra.mxu1 %v11174_v43 }
 0x476   :  { %9044 = vmatprep.subr.mxu0 %v11181_v45  ;;  %9079 = vmatprep.subr.mxu1 %v11186_v48 }
 0x477   :  { %9045 = vmatpush3.msra.mxu0 %v11193_v49  ;;  %9080 = vmatpush3.msra.mxu1 %v11198_v50 }
 0x478   :  { %9046 = vmatprep.subr.mxu0 %v11205_v47  ;;  %9081 = vmatprep.subr.mxu1 %v11210_v31 }
 0x479   :  { %9047 = vmatpush3.msra.mxu0 %v11217_v30  ;;  %9082 = vmatpush3.msra.mxu1 %v11222_v29 }
 0x47a   :  { %9048 = vmatprep.subr.mxu0 %v11229_v28  ;;  %9083 = vmatprep.subr.mxu1 %v11234_v27 }
 0x47b   :  { %9049 = vmatpush3.msra.mxu0 %v11241_v26  ;;  %9084 = vmatpush3.msra.mxu1 %v11246_v25 }
 0x47c   :  { %9050 = vmatprep.subr.mxu0 %v11253_v24  ;;  %9085 = vmatprep.subr.mxu1 %v11258_v22  ;;  %v11341_v22 = vld [vmem:[%s13081_s14 + $0x278] sm:$0xff] }
 0x47d   :  { %9051 = vmatpush3.msra.mxu0 %v11265_v21  ;;  %9086 = vmatpush3.msra.mxu1 %v11270_v20  ;;  %13248 = vst [vmem:[#allocation54_spill] sm:$0xff] %v11341_v22 }
 0x47e   :  { %9052 = vmatprep.subr.mxu0 %v11277_v19  ;;  %9087 = vmatprep.subr.mxu1 %v11282_v44  ;;  %v11325_v19 = vld [vmem:[%s13081_s14 + $0x2f8] sm:$0xff] }
 0x47f   :  { %9053 = vmatpush3.msra.mxu0 %v11289_v18  ;;  %9088 = vmatpush3.msra.mxu1 %v11294_v17  ;;  %13246 = vst [vmem:[#allocation52_spill] sm:$0xff] %v11325_v19  ;;  %v11330_v44 = vld [vmem:[%s13081_s14 + $0x3f8] sm:$0xff] }
 0x480   :  { %13247 = vst [vmem:[#allocation53_spill] sm:$0xff] %v11330_v44  ;;  %9054 = vmatprep.subr.mxu0 %v11301_v16  ;;  %9089 = vmatprep.subr.mxu1 %v11306_v9  ;;  %v11346_v9 = vld [vmem:[%s13081_s14 + $0x378] sm:$0xff] }
 0x481   :  { %9055 = vmatpush3.msra.mxu0 %v11313_v46  ;;  %9090 = vmatpush3.msra.mxu1 %v11318_v8  ;;  %13249 = vst [vmem:[#allocation55_spill] sm:$0xff] %v11346_v9  ;;  %v11361_v8 = vld [vmem:[%s13081_s14 + $0x270] sm:$0xff] }
 0x482   :  { %9094 = vmatprep.subr.mxu0 %v11325_v19  ;;  %9129 = vmatprep.subr.mxu1 %v11330_v44  ;;  %v11351_v44 = vld [vmem:[%s13081_s14 + $0x2f0] sm:$0xff]  ;;  %13252 = vst [vmem:[#allocation58_spill] sm:$0xff] %v11361_v8 }
 0x483   :  { %13250 = vst [vmem:[#allocation56_spill] sm:$0xff] %v11351_v44  ;;  %v11356_v19 = vld [vmem:[%s13081_s14 + $0x3f0] sm:$0xff] }
 0x484   :  { %13251 = vst [vmem:[#allocation57_spill] sm:$0xff] %v11356_v19 }
 0x4f5   :  { %v2964_v17 = vpop.f32.mrf.mxu0  ;;  %v3035_v18 = vpop.f32.mrf.mxu1 }
 0x4f7   :  { %v2966_v20 = vpop.f32.mrf.mxu0  ;;  %v3037_v21 = vpop.f32.mrf.mxu1 }
 0x4f8   :  { %3698 = vmatprep.mubr.f32.mxu0 %v2966_v20  ;;  %3768 = vmatprep.mubr.f32.mxu1 %v3037_v21  ;;  %v11366_v20 = vld [vmem:[%s13081_s14 + $0x370] sm:$0xff]  ;;  %v11373_v21 = vld [vmem:[%s13081_s14 + $0x2e8] sm:$0xff] }
 0x4f9   :  { %3699 = vmatmul.mubr.f32.vlgmr.msra.gmra.mxu0 %v2964_v17  ;;  %3769 = vmatmul.mubr.f32.vlgmr.msra.gmra.mxu1 %v3035_v18  ;;  %13253 = vst [vmem:[#allocation59_spill] sm:$0xff] %v11366_v20  ;;  %13254 = vst [vmem:[#allocation60_spill] sm:$0xff] %v11373_v21  ;;  %v11378_v17 = vld [vmem:[%s13081_s14 + $0x3e8] sm:$0xff] }
 0x4fa   :  { %9095 = vmatpush3.msra.mxu0 %v11341_v22  ;;  %9130 = vmatpush3.msra.mxu1 %v11346_v9  ;;  %13255 = vst [vmem:[#allocation61_spill] sm:$0xff] %v11378_v17  ;;  %v11385_v18 = vld [vmem:[%s13081_s14 + $0x268] sm:$0xff] }
 0x4fb   :  { %9096 = vmatprep.subr.mxu0 %v11351_v44  ;;  %9131 = vmatprep.subr.mxu1 %v11356_v19  ;;  %13256 = vst [vmem:[#allocation62_spill] sm:$0xff] %v11385_v18  ;;  %v11390_v9 = vld [vmem:[%s13081_s14 + $0x368] sm:$0xff]  ;;  %v11397_v44 = vld [vmem:[%s13081_s14 + $0x2e0] sm:$0xff] }
 0x4fc   :  { %13257 = vst [vmem:[#allocation63_spill] sm:$0xff] %v11390_v9  ;;  %9097 = vmatpush3.msra.mxu0 %v11361_v8  ;;  %9132 = vmatpush3.msra.mxu1 %v11366_v20  ;;  %13258 = vst [vmem:[#allocation64_spill] sm:$0xff] %v11397_v44  ;;  %v11402_v19 = vld [vmem:[%s13081_s14 + $0x3e0] sm:$0xff] }
 0x4fd   :  { %13259 = vst [vmem:[#allocation65_spill] sm:$0xff] %v11402_v19  ;;  %9098 = vmatprep.subr.mxu0 %v11373_v21  ;;  %9133 = vmatprep.subr.mxu1 %v11378_v17  ;;  %v11409_v8 = vld [vmem:[%s13081_s14 + $0x260] sm:$0xff]  ;;  %v11421_v21 = vld [vmem:[%s13081_s14 + $0x2d8] sm:$0xff] }
 0x4fe   :  { %13260 = vst [vmem:[#allocation66_spill] sm:$0xff] %v11409_v8  ;;  %v11414_v20 = vld [vmem:[%s13081_s14 + $0x360] sm:$0xff]  ;;  %9099 = vmatpush3.msra.mxu0 %v11385_v18  ;;  %9134 = vmatpush3.msra.mxu1 %v11390_v9  ;;  %13262 = vst [vmem:[#allocation68_spill] sm:$0xff] %v11421_v21  ;;  %v11426_v17 = vld [vmem:[%s13081_s14 + $0x3d8] sm:$0xff] }
 0x4ff   :  { %13261 = vst [vmem:[#allocation67_spill] sm:$0xff] %v11414_v20  ;;  %13263 = vst [vmem:[#allocation69_spill] sm:$0xff] %v11426_v17  ;;  %9100 = vmatprep.subr.mxu0 %v11397_v44  ;;  %9135 = vmatprep.subr.mxu1 %v11402_v19  ;;  %v11433_v18 = vld [vmem:[%s13081_s14 + $0x258] sm:$0xff]  ;;  %v11445_v44 = vld [vmem:[%s13081_s14 + $0x2d0] sm:$0xff] }
 0x500   :  { %13264 = vst [vmem:[#allocation70_spill] sm:$0xff] %v11433_v18  ;;  %v11438_v9 = vld [vmem:[%s13081_s14 + $0x358] sm:$0xff]  ;;  %9101 = vmatpush3.msra.mxu0 %v11409_v8  ;;  %9136 = vmatpush3.msra.mxu1 %v11414_v20  ;;  %13266 = vst [vmem:[#allocation72_spill] sm:$0xff] %v11445_v44  ;;  %v11450_v19 = vld [vmem:[%s13081_s14 + $0x3d0] sm:$0xff] }
 0x501   :  { %13265 = vst [vmem:[#allocation71_spill] sm:$0xff] %v11438_v9  ;;  %13267 = vst [vmem:[#allocation73_spill] sm:$0xff] %v11450_v19  ;;  %9102 = vmatprep.subr.mxu0 %v11421_v21  ;;  %9137 = vmatprep.subr.mxu1 %v11426_v17  ;;  %v11457_v8 = vld [vmem:[%s13081_s14 + $0x250] sm:$0xff]  ;;  %v11469_v21 = vld [vmem:[%s13081_s14 + $0x2c8] sm:$0xff] }
 0x502   :  { %13268 = vst [vmem:[#allocation74_spill] sm:$0xff] %v11457_v8  ;;  %v11462_v20 = vld [vmem:[%s13081_s14 + $0x350] sm:$0xff]  ;;  %9103 = vmatpush3.msra.mxu0 %v11433_v18  ;;  %9138 = vmatpush3.msra.mxu1 %v11438_v9  ;;  %13270 = vst [vmem:[#allocation76_spill] sm:$0xff] %v11469_v21  ;;  %v11474_v17 = vld [vmem:[%s13081_s14 + $0x3c8] sm:$0xff] }
 0x503   :  { %13269 = vst [vmem:[#allocation75_spill] sm:$0xff] %v11462_v20  ;;  %13271 = vst [vmem:[#allocation77_spill] sm:$0xff] %v11474_v17  ;;  %9104 = vmatprep.subr.mxu0 %v11445_v44  ;;  %9139 = vmatprep.subr.mxu1 %v11450_v19  ;;  %v11481_v18 = vld [vmem:[%s13081_s14 + $0x248] sm:$0xff]  ;;  %v11493_v44 = vld [vmem:[%s13081_s14 + $0x2c0] sm:$0xff] }
 0x504   :  { %13272 = vst [vmem:[#allocation78_spill] sm:$0xff] %v11481_v18  ;;  %v11486_v9 = vld [vmem:[%s13081_s14 + $0x348] sm:$0xff]  ;;  %9105 = vmatpush3.msra.mxu0 %v11457_v8  ;;  %9140 = vmatpush3.msra.mxu1 %v11462_v20  ;;  %13274 = vst [vmem:[#allocation80_spill] sm:$0xff] %v11493_v44  ;;  %v11498_v19 = vld [vmem:[%s13081_s14 + $0x3c0] sm:$0xff] }
 0x505   :  { %13273 = vst [vmem:[#allocation79_spill] sm:$0xff] %v11486_v9  ;;  %13275 = vst [vmem:[#allocation81_spill] sm:$0xff] %v11498_v19  ;;  %9106 = vmatprep.subr.mxu0 %v11469_v21  ;;  %9141 = vmatprep.subr.mxu1 %v11474_v17  ;;  %v11505_v8 = vld [vmem:[%s13081_s14 + $0x240] sm:$0xff]  ;;  %v11517_v21 = vld [vmem:[%s13081_s14 + $0x2b8] sm:$0xff] }
 0x506   :  { %13276 = vst [vmem:[#allocation82_spill] sm:$0xff] %v11505_v8  ;;  %v11510_v20 = vld [vmem:[%s13081_s14 + $0x340] sm:$0xff]  ;;  %9107 = vmatpush3.msra.mxu0 %v11481_v18  ;;  %9142 = vmatpush3.msra.mxu1 %v11486_v9  ;;  %13278 = vst [vmem:[#allocation84_spill] sm:$0xff] %v11517_v21  ;;  %v11522_v17 = vld [vmem:[%s13081_s14 + $0x3b8] sm:$0xff] }
 0x507   :  { %13277 = vst [vmem:[#allocation83_spill] sm:$0xff] %v11510_v20  ;;  %13279 = vst [vmem:[#allocation85_spill] sm:$0xff] %v11522_v17  ;;  %9108 = vmatprep.subr.mxu0 %v11493_v44  ;;  %9143 = vmatprep.subr.mxu1 %v11498_v19  ;;  %v11529_v18 = vld [vmem:[%s13081_s14 + $0x238] sm:$0xff]  ;;  %v11541_v44 = vld [vmem:[%s13081_s14 + $0x2b0] sm:$0xff] }
 0x508   :  { %13280 = vst [vmem:[#allocation86_spill] sm:$0xff] %v11529_v18  ;;  %v11534_v9 = vld [vmem:[%s13081_s14 + $0x338] sm:$0xff]  ;;  %9109 = vmatpush3.msra.mxu0 %v11505_v8  ;;  %9144 = vmatpush3.msra.mxu1 %v11510_v20  ;;  %13282 = vst [vmem:[#allocation88_spill] sm:$0xff] %v11541_v44  ;;  %v11546_v19 = vld [vmem:[%s13081_s14 + $0x3b0] sm:$0xff] }
 0x509   :  { %13281 = vst [vmem:[#allocation87_spill] sm:$0xff] %v11534_v9  ;;  %13283 = vst [vmem:[#allocation89_spill] sm:$0xff] %v11546_v19  ;;  %9110 = vmatprep.subr.mxu0 %v11517_v21  ;;  %9145 = vmatprep.subr.mxu1 %v11522_v17  ;;  %v11553_v8 = vld [vmem:[%s13081_s14 + $0x230] sm:$0xff]  ;;  %v11565_v21 = vld [vmem:[%s13081_s14 + $0x2a8] sm:$0xff] }
 0x50a   :  { %13284 = vst [vmem:[#allocation90_spill] sm:$0xff] %v11553_v8  ;;  %v11558_v20 = vld [vmem:[%s13081_s14 + $0x330] sm:$0xff]  ;;  %9111 = vmatpush3.msra.mxu0 %v11529_v18  ;;  %9146 = vmatpush3.msra.mxu1 %v11534_v9  ;;  %13286 = vst [vmem:[#allocation92_spill] sm:$0xff] %v11565_v21  ;;  %v11570_v17 = vld [vmem:[%s13081_s14 + $0x3a8] sm:$0xff] }
 0x50b   :  { %13285 = vst [vmem:[#allocation91_spill] sm:$0xff] %v11558_v20  ;;  %13287 = vst [vmem:[#allocation93_spill] sm:$0xff] %v11570_v17  ;;  %9112 = vmatprep.subr.mxu0 %v11541_v44  ;;  %9147 = vmatprep.subr.mxu1 %v11546_v19  ;;  %v11577_v18 = vld [vmem:[%s13081_s14 + $0x228] sm:$0xff]  ;;  %v11589_v44 = vld [vmem:[%s13081_s14 + $0x2a0] sm:$0xff] }
 0x50c   :  { %13288 = vst [vmem:[#allocation94_spill] sm:$0xff] %v11577_v18  ;;  %v11582_v9 = vld [vmem:[%s13081_s14 + $0x328] sm:$0xff]  ;;  %9113 = vmatpush3.msra.mxu0 %v11553_v8  ;;  %9148 = vmatpush3.msra.mxu1 %v11558_v20  ;;  %13290 = vst [vmem:[#allocation96_spill] sm:$0xff] %v11589_v44  ;;  %v11594_v19 = vld [vmem:[%s13081_s14 + $0x3a0] sm:$0xff] }
 0x50d   :  { %13289 = vst [vmem:[#allocation95_spill] sm:$0xff] %v11582_v9  ;;  %13291 = vst [vmem:[#allocation97_spill] sm:$0xff] %v11594_v19  ;;  %9114 = vmatprep.subr.mxu0 %v11565_v21  ;;  %9149 = vmatprep.subr.mxu1 %v11570_v17  ;;  %v11601_v8 = vld [vmem:[%s13081_s14 + $0x220] sm:$0xff]  ;;  %v11613_v21 = vld [vmem:[%s13081_s14 + $0x298] sm:$0xff] }
 0x50e   :  { %13292 = vst [vmem:[#allocation98_spill] sm:$0xff] %v11601_v8  ;;  %v11606_v20 = vld [vmem:[%s13081_s14 + $0x320] sm:$0xff]  ;;  %9115 = vmatpush3.msra.mxu0 %v11577_v18  ;;  %9150 = vmatpush3.msra.mxu1 %v11582_v9  ;;  %13294 = vst [vmem:[#allocation100_spill] sm:$0xff] %v11613_v21  ;;  %v11618_v17 = vld [vmem:[%s13081_s14 + $0x398] sm:$0xff] }
 0x50f   :  { %13293 = vst [vmem:[#allocation99_spill] sm:$0xff] %v11606_v20  ;;  %13295 = vst [vmem:[#allocation101_spill] sm:$0xff] %v11618_v17  ;;  %9116 = vmatprep.subr.mxu0 %v11589_v44  ;;  %9151 = vmatprep.subr.mxu1 %v11594_v19  ;;  %v11625_v18 = vld [vmem:[%s13081_s14 + $0x218] sm:$0xff]  ;;  %v11637_v44 = vld [vmem:[%s13081_s14 + $0x290] sm:$0xff] }
 0x510   :  { %13296 = vst [vmem:[#allocation102_spill] sm:$0xff] %v11625_v18  ;;  %v11630_v9 = vld [vmem:[%s13081_s14 + $0x318] sm:$0xff]  ;;  %9117 = vmatpush3.msra.mxu0 %v11601_v8  ;;  %9152 = vmatpush3.msra.mxu1 %v11606_v20  ;;  %13298 = vst [vmem:[#allocation104_spill] sm:$0xff] %v11637_v44  ;;  %v11642_v19 = vld [vmem:[%s13081_s14 + $0x390] sm:$0xff] }
 0x511   :  { %13297 = vst [vmem:[#allocation103_spill] sm:$0xff] %v11630_v9  ;;  %13299 = vst [vmem:[#allocation105_spill] sm:$0xff] %v11642_v19  ;;  %9118 = vmatprep.subr.mxu0 %v11613_v21  ;;  %9153 = vmatprep.subr.mxu1 %v11618_v17  ;;  %v11649_v8 = vld [vmem:[%s13081_s14 + $0x210] sm:$0xff]  ;;  %v11661_v21 = vld [vmem:[%s13081_s14 + $0x288] sm:$0xff] }
 0x512   :  { %13300 = vst [vmem:[#allocation106_spill] sm:$0xff] %v11649_v8  ;;  %v11654_v20 = vld [vmem:[%s13081_s14 + $0x310] sm:$0xff]  ;;  %9119 = vmatpush3.msra.mxu0 %v11625_v18  ;;  %9154 = vmatpush3.msra.mxu1 %v11630_v9  ;;  %v11666_v17 = vld [vmem:[%s13081_s14 + $0x388] sm:$0xff] }
 0x513   :  { %13301 = vst [vmem:[#allocation107_spill] sm:$0xff] %v11654_v20  ;;  %9120 = vmatprep.subr.mxu0 %v11637_v44  ;;  %9155 = vmatprep.subr.mxu1 %v11642_v19  ;;  %v11673_v18 = vld [vmem:[%s13081_s14 + $0x208] sm:$0xff]  ;;  %v11685_v44 = vld [vmem:[%s13081_s14 + $0x280] sm:$0xff] }
 0x514   :  { %v11678_v9 = vld [vmem:[%s13081_s14 + $0x308] sm:$0xff]  ;;  %9121 = vmatpush3.msra.mxu0 %v11649_v8  ;;  %9156 = vmatpush3.msra.mxu1 %v11654_v20  ;;  %v11690_v19 = vld [vmem:[%s13081_s14 + $0x380] sm:$0xff] }
 0x515   :  { %v3106_v22 = vpop.f32.mrf.mxu0  ;;  %v3177_v46 = vpop.f32.mrf.mxu1  ;;  %9122 = vmatprep.subr.mxu0 %v11661_v21  ;;  %9157 = vmatprep.subr.mxu1 %v11666_v17  ;;  %v11697_v20 = vld [vmem:[%s13081_s14 + $0x200] sm:$0xff] }
 0x516   :  { %9123 = vmatpush3.msra.mxu0 %v11673_v18  ;;  %9158 = vmatpush3.msra.mxu1 %v11678_v9  ;;  %v11704_v8 = vld [vmem:[%s13081_s14 + $0x300] sm:$0xff] }
 0x517   :  { %v3108_v16 = vpop.f32.mrf.mxu0  ;;  %v3179_v24 = vpop.f32.mrf.mxu1  ;;  %9124 = vmatprep.subr.mxu0 %v11685_v44  ;;  %9159 = vmatprep.subr.mxu1 %v11690_v19 }
 0x518   :  { %9125 = vmatpush3.msra.mxu0 %v11697_v20  ;;  %3838 = vmatprep.mubr.f32.mxu0 %v3108_v16 }
 0x519   :  { %9160 = vmatpush3.msra.mxu1 %v11704_v8  ;;  %3908 = vmatprep.mubr.f32.mxu1 %v3179_v24  ;;  %v13303_v24 = vld [vmem:[#allocation41_spill] sm:$0xff] }
 0x51a   :  { %3839 = vmatmul.mubr.f32.vlgmr.msra.gmra.mxu0 %v3106_v22  ;;  %3909 = vmatmul.mubr.f32.vlgmr.msra.gmra.mxu1 %v3177_v46  ;;  %v13302_v22 = vld [vmem:[#allocation40_spill] sm:$0xff] }
 0x51b   :  { %9164 = vmatprep.subr.mxu0 %v10939_v51  ;;  %9199 = vmatprep.subr.mxu1 %v10944_v52  ;;  %v13307_v51 = vld [vmem:[#allocation45_spill] sm:$0xff] }
 0x51c   :  { %9165 = vmatpush3.msra.mxu0 %v10951_v53  ;;  %9200 = vmatpush3.msra.mxu1 %v10956_v54  ;;  %v3288_v46 = vpop.f32.mrf.mxu0  ;;  %v3359_v16 = vpop.f32.mrf.mxu1  ;;  %v13311_v52 = vld [vmem:[#allocation49_spill] sm:$0xff]  ;;  %v13312_v53 = vld [vmem:[#allocation50_spill] sm:$0xff]  ;;  %v13313_v54 = vld [vmem:[#allocation51_spill] sm:$0xff] }
 0x51d   :  { %9166 = vmatprep.subr.mxu0 %v10965_v55  ;;  %9201 = vmatprep.subr.mxu1 %v10970_v56  ;;  %v13314_v55 = vld [vmem:[#allocation52_spill] sm:$0xff]  ;;  %v13315_v56 = vld [vmem:[#allocation53_spill] sm:$0xff] }
 0x51e   :  { %9167 = vmatpush3.msra.mxu0 %v10977_v57  ;;  %9202 = vmatpush3.msra.mxu1 %v10982_v58  ;;  %v13316_v57 = vld [vmem:[#allocation54_spill] sm:$0xff]  ;;  %v13317_v58 = vld [vmem:[#allocation55_spill] sm:$0xff] }
 0x51f   :  { %9168 = vmatprep.subr.mxu0 %v10989_v59  ;;  %9203 = vmatprep.subr.mxu1 %v10994_v60  ;;  %v13318_v59 = vld [vmem:[#allocation56_spill] sm:$0xff]  ;;  %v13319_v60 = vld [vmem:[#allocation57_spill] sm:$0xff] }
 0x520   :  { %9169 = vmatpush3.msra.mxu0 %v11001_v61  ;;  %9204 = vmatpush3.msra.mxu1 %v11006_v62  ;;  %v13320_v61 = vld [vmem:[#allocation58_spill] sm:$0xff]  ;;  %v13321_v62 = vld [vmem:[#allocation59_spill] sm:$0xff] }
 0x521   :  { %9170 = vmatprep.subr.mxu0 %v11013_v63  ;;  %9205 = vmatprep.subr.mxu1 %v11018_v0  ;;  %v13322_v63 = vld [vmem:[#allocation60_spill] sm:$0xff]  ;;  %v13323_v0 = vld [vmem:[#allocation61_spill] sm:$0xff] }
 0x522   :  { %9171 = vmatpush3.msra.mxu0 %v11025_v1  ;;  %9206 = vmatpush3.msra.mxu1 %v11030_v2  ;;  %v13324_v1 = vld [vmem:[#allocation62_spill] sm:$0xff]  ;;  %v13325_v2 = vld [vmem:[#allocation63_spill] sm:$0xff] }
 0x523   :  { %9172 = vmatprep.subr.mxu0 %v11037_v3  ;;  %9207 = vmatprep.subr.mxu1 %v11042_v4  ;;  %v13326_v3 = vld [vmem:[#allocation64_spill] sm:$0xff]  ;;  %v13327_v4 = vld [vmem:[#allocation65_spill] sm:$0xff] }
 0x524   :  { %9173 = vmatpush3.msra.mxu0 %v11049_v5  ;;  %9208 = vmatpush3.msra.mxu1 %v11054_v6  ;;  %v13328_v5 = vld [vmem:[#allocation66_spill] sm:$0xff]  ;;  %v13329_v6 = vld [vmem:[#allocation67_spill] sm:$0xff] }
 0x525   :  { %9174 = vmatprep.subr.mxu0 %v11061_v7  ;;  %9209 = vmatprep.subr.mxu1 %v11066_v10  ;;  %v13330_v7 = vld [vmem:[#allocation68_spill] sm:$0xff]  ;;  %v13331_v10 = vld [vmem:[#allocation69_spill] sm:$0xff] }
 0x526   :  { %9175 = vmatpush3.msra.mxu0 %v11073_v11  ;;  %9210 = vmatpush3.msra.mxu1 %v11078_v12  ;;  %v13332_v11 = vld [vmem:[#allocation70_spill] sm:$0xff]  ;;  %v13333_v12 = vld [vmem:[#allocation71_spill] sm:$0xff] }
 0x527   :  { %9176 = vmatprep.subr.mxu0 %v11085_v13  ;;  %9211 = vmatprep.subr.mxu1 %v11090_v14  ;;  %v13334_v13 = vld [vmem:[#allocation72_spill] sm:$0xff]  ;;  %v13335_v14 = vld [vmem:[#allocation73_spill] sm:$0xff] }
 0x528   :  { %9177 = vmatpush3.msra.mxu0 %v11097_v15  ;;  %9212 = vmatpush3.msra.mxu1 %v11102_v23  ;;  %v13336_v15 = vld [vmem:[#allocation74_spill] sm:$0xff]  ;;  %v13337_v23 = vld [vmem:[#allocation75_spill] sm:$0xff] }
 0x529   :  { %9178 = vmatprep.subr.mxu0 %v11109_v32  ;;  %9213 = vmatprep.subr.mxu1 %v11114_v33  ;;  %v13338_v32 = vld [vmem:[#allocation76_spill] sm:$0xff]  ;;  %v13339_v33 = vld [vmem:[#allocation77_spill] sm:$0xff] }
 0x52a   :  { %9179 = vmatpush3.msra.mxu0 %v11121_v34  ;;  %9214 = vmatpush3.msra.mxu1 %v11126_v35  ;;  %v13340_v34 = vld [vmem:[#allocation78_spill] sm:$0xff]  ;;  %v13341_v35 = vld [vmem:[#allocation79_spill] sm:$0xff] }
 0x52b   :  { %9180 = vmatprep.subr.mxu0 %v11133_v36  ;;  %9215 = vmatprep.subr.mxu1 %v11138_v37  ;;  %v13342_v36 = vld [vmem:[#allocation80_spill] sm:$0xff]  ;;  %v13343_v37 = vld [vmem:[#allocation81_spill] sm:$0xff] }
 0x52c   :  { %9181 = vmatpush3.msra.mxu0 %v11145_v38  ;;  %9216 = vmatpush3.msra.mxu1 %v11150_v39  ;;  %v13344_v38 = vld [vmem:[#allocation82_spill] sm:$0xff]  ;;  %v13345_v39 = vld [vmem:[#allocation83_spill] sm:$0xff] }
 0x52d   :  { %9182 = vmatprep.subr.mxu0 %v11157_v40  ;;  %9217 = vmatprep.subr.mxu1 %v11162_v41  ;;  %v13346_v40 = vld [vmem:[#allocation84_spill] sm:$0xff]  ;;  %v13347_v41 = vld [vmem:[#allocation85_spill] sm:$0xff] }
 0x52e   :  { %9183 = vmatpush3.msra.mxu0 %v11169_v42  ;;  %9218 = vmatpush3.msra.mxu1 %v11174_v43  ;;  %v13348_v42 = vld [vmem:[#allocation86_spill] sm:$0xff]  ;;  %v13349_v43 = vld [vmem:[#allocation87_spill] sm:$0xff] }
 0x52f   :  { %9184 = vmatprep.subr.mxu0 %v11181_v45  ;;  %9219 = vmatprep.subr.mxu1 %v11186_v48  ;;  %v13350_v45 = vld [vmem:[#allocation88_spill] sm:$0xff]  ;;  %v13351_v48 = vld [vmem:[#allocation89_spill] sm:$0xff] }
 0x530   :  { %9185 = vmatpush3.msra.mxu0 %v11193_v49  ;;  %9220 = vmatpush3.msra.mxu1 %v11198_v50  ;;  %v13352_v49 = vld [vmem:[#allocation90_spill] sm:$0xff]  ;;  %v13353_v50 = vld [vmem:[#allocation91_spill] sm:$0xff] }
 0x531   :  { %9186 = vmatprep.subr.mxu0 %v11205_v47  ;;  %9221 = vmatprep.subr.mxu1 %v11210_v31  ;;  %v13304_v47 = vld [vmem:[#allocation42_spill] sm:$0xff]  ;;  %v13305_v31 = vld [vmem:[#allocation43_spill] sm:$0xff] }
 0x532   :  { %9187 = vmatpush3.msra.mxu0 %v11217_v30  ;;  %9222 = vmatpush3.msra.mxu1 %v11222_v29  ;;  %v3290_v30 = vpop.f32.mrf.mxu0  ;;  %v13306_v29 = vld [vmem:[#allocation44_spill] sm:$0xff] }
 0x533   :  { %9188 = vmatprep.subr.mxu0 %v11229_v28  ;;  %9223 = vmatprep.subr.mxu1 %v11234_v27  ;;  %v13308_v28 = vld [vmem:[#allocation46_spill] sm:$0xff]  ;;  %v13309_v27 = vld [vmem:[#allocation47_spill] sm:$0xff] }
 0x534   :  { %9189 = vmatpush3.msra.mxu0 %v11241_v26  ;;  %9224 = vmatpush3.msra.mxu1 %v11246_v25  ;;  %v3361_v26 = vpop.f32.mrf.mxu1  ;;  %v13310_v25 = vld [vmem:[#allocation48_spill] sm:$0xff] }
 0x535   :  { %9190 = vmatprep.subr.mxu0 %v13302_v22  ;;  %9225 = vmatprep.subr.mxu1 %v13303_v24  ;;  %v13356_v22 = vld [vmem:[#allocation94_spill] sm:$0xff]  ;;  %v13357_v24 = vld [vmem:[#allocation95_spill] sm:$0xff] }
 0x536   :  { %9191 = vmatpush3.msra.mxu0 %v13304_v47  ;;  %9226 = vmatpush3.msra.mxu1 %v13305_v31  ;;  %v13358_v47 = vld [vmem:[#allocation96_spill] sm:$0xff]  ;;  %v13359_v31 = vld [vmem:[#allocation97_spill] sm:$0xff] }
 0x537   :  { %9192 = vmatprep.subr.mxu0 %v13306_v29  ;;  %9227 = vmatprep.subr.mxu1 %v13307_v51  ;;  %v13360_v29 = vld [vmem:[#allocation98_spill] sm:$0xff]  ;;  %v13361_v51 = vld [vmem:[#allocation99_spill] sm:$0xff] }
 0x538   :  { %9193 = vmatpush3.msra.mxu0 %v13308_v28  ;;  %9228 = vmatpush3.msra.mxu1 %v13309_v27  ;;  %v13362_v28 = vld [vmem:[#allocation100_spill] sm:$0xff]  ;;  %v13363_v27 = vld [vmem:[#allocation101_spill] sm:$0xff] }
 0x539   :  { %9194 = vmatprep.subr.mxu0 %v13310_v25  ;;  %3978 = vmatprep.mubr.f32.mxu0 %v3290_v30  ;;  %v3430_v30 = vpop.f32.mrf.mxu0  ;;  %v13365_v25 = vld [vmem:[#allocation103_spill] sm:$0xff] }
 0x53a   :  { %9229 = vmatprep.subr.mxu1 %v13311_v52  ;;  %9195 = vmatpush3.msra.mxu0 %v13312_v53  ;;  %v3501_v52 = vpop.f32.mrf.mxu1  ;;  %v13366_v53 = vld [vmem:[#allocation104_spill] sm:$0xff] }
 0x53b   :  { %9230 = vmatpush3.msra.mxu1 %v13313_v54  ;;  %4048 = vmatprep.mubr.f32.mxu1 %v3361_v26  ;;  %v13364_v26 = vld [vmem:[#allocation102_spill] sm:$0xff]  ;;  %v13367_v54 = vld [vmem:[#allocation105_spill] sm:$0xff] }
 0x53c   :  { %3979 = vmatmul.mubr.f32.vlgmr.msra.gmra.mxu0 %v3288_v46  ;;  %4049 = vmatmul.mubr.f32.vlgmr.msra.gmra.mxu1 %v3359_v16  ;;  %v13354_v46 = vld [vmem:[#allocation92_spill] sm:$0xff]  ;;  %v13355_v16 = vld [vmem:[#allocation93_spill] sm:$0xff] }
 0x53d   :  { %9234 = vmatprep.subr.mxu0 %v13314_v55  ;;  %9269 = vmatprep.subr.mxu1 %v13315_v56  ;;  %v3432_v55 = vpop.f32.mrf.mxu0  ;;  %v13368_v56 = vld [vmem:[#allocation106_spill] sm:$0xff] }
 0x53e   :  { %9235 = vmatpush3.msra.mxu0 %v13316_v57  ;;  %9270 = vmatpush3.msra.mxu1 %v13317_v58  ;;  %v13369_v57 = vld [vmem:[#allocation107_spill] sm:$0xff]  ;;  %v3503_v58 = vpop.f32.mrf.mxu1 }
 0x53f   :  { %9236 = vmatprep.subr.mxu0 %v13318_v59  ;;  %9271 = vmatprep.subr.mxu1 %v13319_v60  ;;  %v11860_v59 = vld [vmem:[#allocation10 + $0x190] sm:$0xff]  ;;  %v11864_v60 = vld [vmem:[#allocation10 + $0x148] sm:$0xff] }
 0x540   :  { %9237 = vmatpush3.msra.mxu0 %v13320_v61  ;;  %9272 = vmatpush3.msra.mxu1 %v13321_v62  ;;  %v11866_v61 = vld [vmem:[#allocation10 + $0x158] sm:$0xff]  ;;  %v11868_v62 = vld [vmem:[#allocation10 + $0x140] sm:$0xff] }
 0x541   :  { %9238 = vmatprep.subr.mxu0 %v13322_v63  ;;  %9273 = vmatprep.subr.mxu1 %v13323_v0  ;;  %v11872_v63 = vld [vmem:[#allocation10 + $0x150] sm:$0xff]  ;;  %v11874_v0 = vld [vmem:[#allocation10 + $0x108] sm:$0xff] }
 0x542   :  { %9239 = vmatpush3.msra.mxu0 %v13324_v1  ;;  %9274 = vmatpush3.msra.mxu1 %v13325_v2  ;;  %v11876_v1 = vld [vmem:[#allocation10 + $0x118] sm:$0xff]  ;;  %v11880_v2 = vld [vmem:[#allocation10 + $0x100] sm:$0xff] }
 0x543   :  { %9240 = vmatprep.subr.mxu0 %v13326_v3  ;;  %9275 = vmatprep.subr.mxu1 %v13327_v4  ;;  %v11882_v3 = vld [vmem:[#allocation10 + $0x110] sm:$0xff]  ;;  %v11884_v4 = vld [vmem:[#allocation10 + $0xc8] sm:$0xff] }
 0x544   :  { %9241 = vmatpush3.msra.mxu0 %v13328_v5  ;;  %9276 = vmatpush3.msra.mxu1 %v13329_v6  ;;  %v11888_v5 = vld [vmem:[#allocation10 + $0xd8] sm:$0xff]  ;;  %v11890_v6 = vld [vmem:[#allocation10 + $0xc0] sm:$0xff] }
 0x545   :  { %9242 = vmatprep.subr.mxu0 %v13330_v7  ;;  %9277 = vmatprep.subr.mxu1 %v13331_v10  ;;  %v11892_v7 = vld [vmem:[#allocation10 + $0xd0] sm:$0xff]  ;;  %v11896_v10 = vld [vmem:[#allocation10 + $0x88] sm:$0xff] }
 0x546   :  { %9243 = vmatpush3.msra.mxu0 %v13332_v11  ;;  %9278 = vmatpush3.msra.mxu1 %v13333_v12  ;;  %v11898_v11 = vld [vmem:[#allocation10 + $0x98] sm:$0xff]  ;;  %v11902_v12 = vld [vmem:[#allocation10 + $0x80] sm:$0xff] }
 0x547   :  { %9244 = vmatprep.subr.mxu0 %v13334_v13  ;;  %9279 = vmatprep.subr.mxu1 %v13335_v14  ;;  %v11904_v13 = vld [vmem:[#allocation10 + $0x90] sm:$0xff]  ;;  %v11908_v14 = vld [vmem:[#allocation10 + $0x48] sm:$0xff] }
 0x548   :  { %9245 = vmatpush3.msra.mxu0 %v13336_v15  ;;  %9280 = vmatpush3.msra.mxu1 %v13337_v23  ;;  %v11910_v15 = vld [vmem:[#allocation10 + $0x58] sm:$0xff]  ;;  %v11914_v23 = vld [vmem:[#allocation10 + $0x40] sm:$0xff] }
 0x549   :  { %9246 = vmatprep.subr.mxu0 %v13338_v32  ;;  %9281 = vmatprep.subr.mxu1 %v13339_v33  ;;  %v11916_v32 = vld [vmem:[#allocation10 + $0x50] sm:$0xff]  ;;  %v11920_v33 = vld [vmem:[#allocation10 + $0x8] sm:$0xff] }
 0x54a   :  { %9247 = vmatpush3.msra.mxu0 %v13340_v34  ;;  %9282 = vmatpush3.msra.mxu1 %v13341_v35  ;;  %v11922_v34 = vld [vmem:[#allocation10 + $0x18] sm:$0xff]  ;;  %v11926_v35 = vld [vmem:[#allocation10] sm:$0xff] }
 0x54b   :  { %9248 = vmatprep.subr.mxu0 %v13342_v36  ;;  %9283 = vmatprep.subr.mxu1 %v13343_v37  ;;  %v11928_v36 = vld [vmem:[#allocation10 + $0x10] sm:$0xff]  ;;  %v11932_v37 = vld [vmem:[#allocation10 + $0x1e8] sm:$0xff] }
 0x54c   :  { %9249 = vmatpush3.msra.mxu0 %v13344_v38  ;;  %9284 = vmatpush3.msra.mxu1 %v13345_v39  ;;  %v11934_v38 = vld [vmem:[#allocation10 + $0x1f8] sm:$0xff] }
 0x54d   :  { %9250 = vmatprep.subr.mxu0 %v13346_v40  ;;  %9285 = vmatprep.subr.mxu1 %v13347_v41 }
 0x54e   :  { %9251 = vmatpush3.msra.mxu0 %v13348_v42  ;;  %9286 = vmatpush3.msra.mxu1 %v13349_v43 }
 0x54f   :  { %9252 = vmatprep.subr.mxu0 %v13350_v45  ;;  %9287 = vmatprep.subr.mxu1 %v13351_v48 }
 0x550   :  { %9253 = vmatpush3.msra.mxu0 %v13352_v49  ;;  %9288 = vmatpush3.msra.mxu1 %v13353_v50 }
 0x551   :  { %9254 = vmatprep.subr.mxu0 %v13354_v46  ;;  %9289 = vmatprep.subr.mxu1 %v13355_v16 }
 0x552   :  { %9255 = vmatpush3.msra.mxu0 %v13356_v22  ;;  %9290 = vmatpush3.msra.mxu1 %v13357_v24 }
 0x553   :  { %9256 = vmatprep.subr.mxu0 %v13358_v47  ;;  %9291 = vmatprep.subr.mxu1 %v13359_v31 }
 0x554   :  { %9257 = vmatpush3.msra.mxu0 %v13360_v29  ;;  %9292 = vmatpush3.msra.mxu1 %v13361_v51 }
 0x555   :  { %9258 = vmatprep.subr.mxu0 %v13362_v28  ;;  %9293 = vmatprep.subr.mxu1 %v13363_v27 }
 0x556   :  { %9259 = vmatpush3.msra.mxu0 %v13364_v26  ;;  %9294 = vmatpush3.msra.mxu1 %v13365_v25 }
 0x557   :  { %9260 = vmatprep.subr.mxu0 %v13366_v53  ;;  %9295 = vmatprep.subr.mxu1 %v13367_v54 }
 0x558   :  { %9261 = vmatpush3.msra.mxu0 %v13368_v56  ;;  %9296 = vmatpush3.msra.mxu1 %v13369_v57 }
 0x559   :  { %9262 = vmatprep.subr.mxu0 %v11661_v21  ;;  %9297 = vmatprep.subr.mxu1 %v11666_v17  ;;  %v13370_v21 = vmov 0.0   ;;  %v11840_v17 = vld [vmem:[#allocation10 + $0x1c8] sm:$0xff] }
 0x55a   :  { %9263 = vmatpush3.msra.mxu0 %v11673_v18  ;;  %4118 = vmatprep.mubr.f32.mxu0 %v3432_v55  ;;  %v11842_v18 = vld [vmem:[#allocation10 + $0x1d8] sm:$0xff] }
 0x55b   :  { %9298 = vmatpush3.msra.mxu1 %v11678_v9  ;;  %9264 = vmatprep.subr.mxu0 %v11685_v44  ;;  %v11846_v9 = vld [vmem:[#allocation10 + $0x1c0] sm:$0xff]  ;;  %v11848_v44 = vld [vmem:[#allocation10 + $0x1d0] sm:$0xff] }
 0x55c   :  { %9299 = vmatprep.subr.mxu1 %v11690_v19  ;;  %9265 = vmatpush3.msra.mxu0 %v11697_v20  ;;  %v11854_v19 = vld [vmem:[#allocation10 + $0x198] sm:$0xff]  ;;  %v11858_v20 = vld [vmem:[#allocation10 + $0x180] sm:$0xff] }
 0x55d   :  { %9300 = vmatpush3.msra.mxu1 %v11704_v8  ;;  %4188 = vmatprep.mubr.f32.mxu1 %v3503_v58  ;;  %v11852_v8 = vld [vmem:[#allocation10 + $0x188] sm:$0xff] }
 0x55e   :  { %4119 = vmatmul.mubr.f32.vlgmr.msra.gmra.mxu0 %v3430_v30  ;;  %4189 = vmatmul.mubr.f32.vlgmr.msra.gmra.mxu1 %v3501_v52 }
 0x55f   :  { %4332 = vmatprep.mubr.f32.mxu0 %v13370_v21  ;;  %4403 = vmatprep.mubr.f32.mxu1 %v13370_v21 }
 0x560   :  { %4284 = vmatprep.subr.mxu0 %v11840_v17  ;;  %4355 = vmatprep.subr.mxu1 %v11842_v18 }
 0x561   :  { %4285 = vmatpush1.msra.mxu0 %v11846_v9  ;;  %4356 = vmatpush1.msra.mxu1 %v11848_v44 }
 0x562   :  { %4286 = vmatprep.subr.mxu0 %v11852_v8  ;;  %4357 = vmatprep.subr.mxu1 %v11854_v19 }
 0x563   :  { %4287 = vmatpush1.msra.mxu0 %v11858_v20  ;;  %4358 = vmatpush1.msra.mxu1 %v11860_v59 }
 0x564   :  { %4288 = vmatprep.subr.mxu0 %v11864_v60  ;;  %4359 = vmatprep.subr.mxu1 %v11866_v61 }
 0x565   :  { %4289 = vmatpush1.msra.mxu0 %v11868_v62  ;;  %4360 = vmatpush1.msra.mxu1 %v11872_v63 }
 0x566   :  { %4290 = vmatprep.subr.mxu0 %v11874_v0  ;;  %4361 = vmatprep.subr.mxu1 %v11876_v1 }
 0x567   :  { %4291 = vmatpush1.msra.mxu0 %v11880_v2  ;;  %4362 = vmatpush1.msra.mxu1 %v11882_v3 }
 0x568   :  { %4292 = vmatprep.subr.mxu0 %v11884_v4  ;;  %4363 = vmatprep.subr.mxu1 %v11888_v5 }
 0x569   :  { %4293 = vmatpush1.msra.mxu0 %v11890_v6  ;;  %4364 = vmatpush1.msra.mxu1 %v11892_v7 }
 0x56a   :  { %4294 = vmatprep.subr.mxu0 %v11896_v10  ;;  %4365 = vmatprep.subr.mxu1 %v11898_v11 }
 0x56b   :  { %4295 = vmatpush1.msra.mxu0 %v11902_v12  ;;  %4366 = vmatpush1.msra.mxu1 %v11904_v13 }
 0x56c   :  { %4296 = vmatprep.subr.mxu0 %v11908_v14  ;;  %4367 = vmatprep.subr.mxu1 %v11910_v15 }
 0x56d   :  { %4297 = vmatpush1.msra.mxu0 %v11914_v23  ;;  %4368 = vmatpush1.msra.mxu1 %v11916_v32 }
 0x56e   :  { %4298 = vmatprep.subr.mxu0 %v11920_v33  ;;  %4369 = vmatprep.subr.mxu1 %v11922_v34 }
 0x56f   :  { %4299 = vmatpush1.msra.mxu0 %v11926_v35  ;;  %4370 = vmatpush1.msra.mxu1 %v11928_v36 }
 0x570   :  { %4426 = vmatprep.subr.mxu0 %v11932_v37  ;;  %4497 = vmatprep.subr.mxu1 %v11934_v38 }
 0x5b9   :  { %v9056_v39 = vpop.f32.mrf.mxu0  ;;  %v9091_v40 = vpop.f32.mrf.mxu1 }
 0x5bb   :  { %v9057_v41 = vpop.f32.mrf.mxu0  ;;  %v9092_v42 = vpop.f32.mrf.mxu1 }
 0x5bc   :  { %v9058_v50 = vadd.f32 %v9057_v41, %v9056_v39  ;;  %v9093_v46 = vadd.f32 %v9092_v42, %v9091_v40 }
 0x5be   :  { %v3771_v47 = vadd.f32 %v9093_v46, %v9058_v50  ;;  %v11952_v46 = vld [vmem:[#allocation10 + $0x1a8] sm:$0xff] }
 0x5da   :  { %v9126_v43 = vpop.f32.mrf.mxu0  ;;  %v9161_v45 = vpop.f32.mrf.mxu1 }
 0x5dc   :  { %v9127_v48 = vpop.f32.mrf.mxu0  ;;  %v9162_v49 = vpop.f32.mrf.mxu1 }
 0x5dd   :  { %v9128_v24 = vadd.f32 %v9127_v48, %v9126_v43  ;;  %v9163_v51 = vadd.f32 %v9162_v49, %v9161_v45  ;;  %v11946_v48 = vld [vmem:[#allocation10 + $0x1e0] sm:$0xff]  ;;  %v11948_v49 = vld [vmem:[#allocation10 + $0x1f0] sm:$0xff] }
 0x5df   :  { %v3841_v29 = vadd.f32 %v9128_v24, %v3771_v47  ;;  %v11962_v24 = vld [vmem:[#allocation10 + $0x1b0] sm:$0xff]  ;;  %v11966_v47 = vld [vmem:[#allocation10 + $0x168] sm:$0xff] }
 0x5e1   :  { %v3911_v52 = vadd.f32 %v9163_v51, %v3841_v29  ;;  %v11974_v29 = vld [vmem:[#allocation10 + $0x170] sm:$0xff]  ;;  %v11978_v51 = vld [vmem:[#allocation10 + $0x128] sm:$0xff] }
 0x5e3   :  { %v11942_v57 = vmul.f32 0.03125, %v3911_v52  ;;  %v11992_v52 = vld [vmem:[#allocation10 + $0xf8] sm:$0xff] }
 0x5e5   :  { %v4197_v42 = vmul.f32 %v11942_v57, %v11942_v57 }
 0x5fc   :  { %v9196_v16 = vpop.f32.mrf.mxu0  ;;  %v9231_v22 = vpop.f32.mrf.mxu1 }
 0x5fe   :  { %v9197_v31 = vpop.f32.mrf.mxu0  ;;  %v9232_v30 = vpop.f32.mrf.mxu1 }
 0x5ff   :  { %v9198_v28 = vadd.f32 %v9197_v31, %v9196_v16  ;;  %v9233_v27 = vadd.f32 %v9232_v30, %v9231_v22  ;;  %v11954_v16 = vld [vmem:[#allocation10 + $0x1b8] sm:$0xff]  ;;  %v11960_v22 = vld [vmem:[#allocation10 + $0x1a0] sm:$0xff] }
 0x600   :  { %v11968_v31 = vld [vmem:[#allocation10 + $0x178] sm:$0xff]  ;;  %v11972_v30 = vld [vmem:[#allocation10 + $0x160] sm:$0xff] }
 0x601   :  { %v4051_v55 = vadd.f32 %v9233_v27, %v9198_v28  ;;  %v11980_v28 = vld [vmem:[#allocation10 + $0x138] sm:$0xff]  ;;  %v11984_v27 = vld [vmem:[#allocation10 + $0x120] sm:$0xff] }
 0x61e   :  { %v9266_v26 = vpop.f32.mrf.mxu0  ;;  %v9301_v25 = vpop.f32.mrf.mxu1 }
 0x620   :  { %v9267_v53 = vpop.f32.mrf.mxu0  ;;  %v9302_v54 = vpop.f32.mrf.mxu1 }
 0x621   :  { %v9268_v56 = vadd.f32 %v9267_v53, %v9266_v26  ;;  %v9303_v39 = vadd.f32 %v9302_v54, %v9301_v25  ;;  %v11986_v26 = vld [vmem:[#allocation10 + $0x130] sm:$0xff]  ;;  %v11990_v25 = vld [vmem:[#allocation10 + $0xe8] sm:$0xff]  ;;  %v11996_v53 = vld [vmem:[#allocation10 + $0xe0] sm:$0xff] }
 0x622   :  { %13371 = vst [vmem:[#allocation40_spill] sm:$0xff] %v11996_v53  ;;  %v11998_v54 = vld [vmem:[#allocation10 + $0xf0] sm:$0xff] }
 0x623   :  { %v4121_v58 = vadd.f32 %v9268_v56, %v4051_v55  ;;  %13372 = vst [vmem:[#allocation41_spill] sm:$0xff] %v11998_v54  ;;  %v12002_v55 = vld [vmem:[#allocation10 + $0xa8] sm:$0xff]  ;;  %v12004_v56 = vld [vmem:[#allocation10 + $0xb8] sm:$0xff] }
 0x624   :  { %13373 = vst [vmem:[#allocation42_spill] sm:$0xff] %v12004_v56 }
 0x625   :  { %v4191_v40 = vadd.f32 %v9303_v39, %v4121_v58  ;;  %v12008_v58 = vld [vmem:[#allocation10 + $0xa0] sm:$0xff]  ;;  %v12010_v39 = vld [vmem:[#allocation10 + $0xb0] sm:$0xff] }
 0x627   :  { %v4196_v41 = vmul.f32 0.03125, %v4191_v40  ;;  %v12014_v40 = vld [vmem:[#allocation10 + $0x68] sm:$0xff] }
 0x629   :  { %v4198_v43 = vsub.f32 %v4196_v41, %v4197_v42  ;;  %v12016_v41 = vld [vmem:[#allocation10 + $0x78] sm:$0xff]  ;;  %v12020_v42 = vld [vmem:[#allocation10 + $0x60] sm:$0xff] }
 0x62b   :  { %v4199_v45 = vadd.f32 1e-05, %v4198_v43  ;;  %v12022_v43 = vld [vmem:[#allocation10 + $0x70] sm:$0xff] }
 0x62d   :  { %9925 = vrsqrt.f32 %v4199_v45  ;;  %v12026_v45 = vld [vmem:[#allocation10 + $0x28] sm:$0xff] }
 0x63a   :  { %v11950_v50 = vpop.eup %9925 }
 0x63b   :  { %8640 = vmatmul.mubr.msk.f32.vlgmr.msra.gmra.mxu0 %vm768_vm0, %v11950_v50  ;;  %8641 = vmatmul.mubr.msk.f32.vlgmr.msra.gmra.mxu1 %vm768_vm0, %v11950_v50 }
 0x63c   :  { %4427 = vmatpush1.msra.mxu0 %v11946_v48  ;;  %4498 = vmatpush1.msra.mxu1 %v11948_v49 }
 0x63d   :  { %4428 = vmatprep.subr.mxu0 %v11952_v46  ;;  %4499 = vmatprep.subr.mxu1 %v11954_v16 }
 0x63e   :  { %4429 = vmatpush1.msra.mxu0 %v11960_v22  ;;  %4500 = vmatpush1.msra.mxu1 %v11962_v24 }
 0x63f   :  { %4430 = vmatprep.subr.mxu0 %v11966_v47  ;;  %4501 = vmatprep.subr.mxu1 %v11968_v31 }
 0x640   :  { %4431 = vmatpush1.msra.mxu0 %v11972_v30  ;;  %4502 = vmatpush1.msra.mxu1 %v11974_v29 }
 0x641   :  { %4432 = vmatprep.subr.mxu0 %v11978_v51  ;;  %4503 = vmatprep.subr.mxu1 %v11980_v28 }
 0x642   :  { %4433 = vmatpush1.msra.mxu0 %v11984_v27  ;;  %4504 = vmatpush1.msra.mxu1 %v11986_v26 }
 0x643   :  { %4434 = vmatprep.subr.mxu0 %v11990_v25  ;;  %4505 = vmatprep.subr.mxu1 %v11992_v52 }
 0x644   :  { %4435 = vmatpush1.msra.mxu0 %v11996_v53  ;;  %4506 = vmatpush1.msra.mxu1 %v11998_v54  ;;  %v12028_v53 = vld [vmem:[#allocation10 + $0x38] sm:$0xff]  ;;  %v12032_v54 = vld [vmem:[#allocation10 + $0x20] sm:$0xff] }
 0x645   :  { %4436 = vmatprep.subr.mxu0 %v12002_v55  ;;  %4507 = vmatprep.subr.mxu1 %v12004_v56  ;;  %v12036_v56 = vld [vmem:[#allocation10 + $0x30] sm:$0xff] }
 0x646   :  { %4437 = vmatpush1.msra.mxu0 %v12008_v58  ;;  %4508 = vmatpush1.msra.mxu1 %v12010_v39 }
 0x647   :  { %4438 = vmatprep.subr.mxu0 %v12014_v40  ;;  %4509 = vmatprep.subr.mxu1 %v12016_v41 }
 0x648   :  { %4439 = vmatpush1.msra.mxu0 %v12020_v42  ;;  %4510 = vmatpush1.msra.mxu1 %v12022_v43 }
 0x649   :  { %4440 = vmatprep.subr.mxu0 %v12026_v45  ;;  %4511 = vmatprep.subr.mxu1 %v12028_v53 }
 0x64a   :  { %4441 = vmatpush1.msra.mxu0 %v12032_v54  ;;  %4474 = vmatprep.mubr.f32.mxu0 %v13370_v21 }
 0x64b   :  { %4512 = vmatpush1.msra.mxu1 %v12036_v56  ;;  %4545 = vmatprep.mubr.f32.mxu1 %v13370_v21 }
 0x64c   :  { %8642 = vmatmul.mubr.msk.f32.vlgmr.msra.gmra.mxu0 %vm768_vm0, %v11950_v50  ;;  %8643 = vmatmul.mubr.msk.f32.vlgmr.msra.gmra.mxu1 %vm768_vm0, %v11950_v50 }
 0x64d   :  { %4621 = vmatprep.subr.mxu0 %v11840_v17  ;;  %4692 = vmatprep.subr.mxu1 %v11842_v18  ;;  %v13374_v17 = vld [vmem:[#allocation40_spill] sm:$0xff]  ;;  %v13375_v18 = vld [vmem:[#allocation41_spill] sm:$0xff] }
 0x64e   :  { %4622 = vmatpush1.msra.mxu0 %v11846_v9  ;;  %4693 = vmatpush1.msra.mxu1 %v11848_v44  ;;  %v13376_v9 = vld [vmem:[#allocation42_spill] sm:$0xff]  ;;  %v13377_v44 = vld [vmem:[#allocation21_spill] sm:$0xff] }
 0x64f   :  { %4623 = vmatprep.subr.mxu0 %v11852_v8  ;;  %4694 = vmatprep.subr.mxu1 %v11854_v19  ;;  %v4568_v8 = vsub.s32 3, %v13377_v44  ;;  %v4564_v19 = vsub.s32 2, %v13377_v44 }
 0x650   :  { %4624 = vmatpush1.msra.mxu0 %v11858_v20  ;;  %4695 = vmatpush1.msra.mxu1 %v11860_v59  ;;  %v4552_v20 = vld [vmem:[#allocation12] sm:$0xff] }
 0x651   :  { %4625 = vmatprep.subr.mxu0 %v11864_v60  ;;  %4696 = vmatprep.subr.mxu1 %v11866_v61  ;;  %v13378_v59 = vld [vmem:[#allocation23_spill] sm:$0xff]  ;;  %v4569_v61 = vrot.slane %v4552_v20, %v4568_v8 }
 0x652   :  { %4626 = vmatpush1.msra.mxu0 %v11868_v62  ;;  %4697 = vmatpush1.msra.mxu1 %v11872_v63  ;;  %v4561_v60 = vrot.slane %v4552_v20, %v13378_v59  ;;  %v13379_v63 = vld [vmem:[#allocation22_spill] sm:$0xff] }
 0x653   :  { %4627 = vmatprep.subr.mxu0 %v11874_v0  ;;  %4698 = vmatprep.subr.mxu1 %v11876_v1  ;;  %v4557_v0 = vrot.slane %v4552_v20, %v13379_v63 }
 0x654   :  { %4628 = vmatpush1.msra.mxu0 %v11880_v2  ;;  %4699 = vmatpush1.msra.mxu1 %v11882_v3  ;;  %v4565_v2 = vrot.slane %v4552_v20, %v4564_v19 }
 0x655   :  { %4629 = vmatprep.subr.mxu0 %v11884_v4  ;;  %4700 = vmatprep.subr.mxu1 %v11888_v5 }
 0x656   :  { %4630 = vmatpush1.msra.mxu0 %v11890_v6  ;;  %4701 = vmatpush1.msra.mxu1 %v11892_v7 }
 0x657   :  { %4631 = vmatprep.subr.mxu0 %v11896_v10  ;;  %4702 = vmatprep.subr.mxu1 %v11898_v11  ;;  %v12137_v11 = vld [vmem:[%s13080_s13] sm:$0xff] }
 0x658   :  { %4632 = vmatpush1.msra.mxu0 %v11902_v12  ;;  %4703 = vmatpush1.msra.mxu1 %v11904_v13  ;;  %v12152_v12 = vld [vmem:[%s13080_s13 + $0x8] sm:$0xf]  ;;  %v4576_v13 = vsub.s32 5, %v13377_v44 }
 0x659   :  { %4633 = vmatprep.subr.mxu0 %v11908_v14  ;;  %4704 = vmatprep.subr.mxu1 %v11910_v15  ;;  %v4584_v14 = vsub.s32 7, %v13377_v44  ;;  %v4572_v15 = vsub.s32 4, %v13377_v44 }
 0x65a   :  { %4634 = vmatpush1.msra.mxu0 %v11914_v23  ;;  %4705 = vmatpush1.msra.mxu1 %v11916_v32  ;;  %v4580_v23 = vsub.s32 6, %v13377_v44  ;;  %v4577_v32 = vrot.slane %v4552_v20, %v4576_v13 }
 0x65b   :  { %4635 = vmatprep.subr.mxu0 %v11920_v33  ;;  %4706 = vmatprep.subr.mxu1 %v11922_v34  ;;  %v4585_v33 = vrot.slane %v4552_v20, %v4584_v14 }
 0x65c   :  { %4636 = vmatpush1.msra.mxu0 %v11926_v35  ;;  %4669 = vmatprep.mubr.f32.mxu0 %v13370_v21  ;;  %v4573_v35 = vrot.slane %v4552_v20, %v4572_v15 }
 0x65d   :  { %4707 = vmatpush1.msra.mxu1 %v11928_v36  ;;  %4740 = vmatprep.mubr.f32.mxu1 %v13370_v21 }
 0x65e   :  { %8644 = vmatmul.mubr.msk.f32.vlgmr.msra.gmra.mxu0 %vm768_vm0, %v11942_v57  ;;  %8645 = vmatmul.mubr.msk.f32.vlgmr.msra.gmra.mxu1 %vm768_vm0, %v11942_v57 }
 0x65f   :  { %4763 = vmatprep.subr.mxu0 %v11932_v37  ;;  %4834 = vmatprep.subr.mxu1 %v11934_v38  ;;  %v4581_v37 = vrot.slane %v4552_v20, %v4580_v23 }
 0x660   :  { %4764 = vmatpush1.msra.mxu0 %v11946_v48  ;;  %4835 = vmatpush1.msra.mxu1 %v11948_v49 }
 0x661   :  { %4765 = vmatprep.subr.mxu0 %v11952_v46  ;;  %4836 = vmatprep.subr.mxu1 %v11954_v16  ;;  %v4889_v16 = vld [vmem:[#allocation13] sm:$0xff] }
 0x662   :  { %4766 = vmatpush1.msra.mxu0 %v11960_v22  ;;  %4837 = vmatpush1.msra.mxu1 %v11962_v24 }
 0x663   :  { %4767 = vmatprep.subr.mxu0 %v11966_v47  ;;  %4838 = vmatprep.subr.mxu1 %v11968_v31  ;;  %v4906_v47 = vrot.slane %v4889_v16, %v13378_v59  ;;  %v4914_v31 = vrot.slane %v4889_v16, %v4568_v8 }
 0x664   :  { %4768 = vmatpush1.msra.mxu0 %v11972_v30  ;;  %4839 = vmatpush1.msra.mxu1 %v11974_v29  ;;  %v4902_v29 = vrot.slane %v4889_v16, %v13379_v63  ;;  %v9667_v63 = vld [vmem:[%s13085_s18 + $0x70] ss:$8 sps:$4 sm:$0xff]  }
 0x665   :  { %4769 = vmatprep.subr.mxu0 %v11978_v51  ;;  %4840 = vmatprep.subr.mxu1 %v11980_v28  ;;  %v4910_v28 = vrot.slane %v4889_v16, %v4564_v19 }
 0x666   :  { %4770 = vmatpush1.msra.mxu0 %v11984_v27  ;;  %4841 = vmatpush1.msra.mxu1 %v11986_v26 }
 0x667   :  { %4771 = vmatprep.subr.mxu0 %v11990_v25  ;;  %4842 = vmatprep.subr.mxu1 %v11992_v52 }
 0x668   :  { %4772 = vmatpush1.msra.mxu0 %v13374_v17  ;;  %4843 = vmatpush1.msra.mxu1 %v13375_v18  ;;  %v4926_v17 = vrot.slane %v4889_v16, %v4580_v23  ;;  %v9691_v23 = vld [vmem:[%s13085_s18 + $0x30] ss:$8 sps:$4 sm:$0xff]  }
 0x669   :  { %4773 = vmatprep.subr.mxu0 %v12002_v55  ;;  %4844 = vmatprep.subr.mxu1 %v13376_v9 }
 0x66a   :  { %4774 = vmatpush1.msra.mxu0 %v12008_v58  ;;  %4845 = vmatpush1.msra.mxu1 %v12010_v39 }
 0x66b   :  { %4775 = vmatprep.subr.mxu0 %v12014_v40  ;;  %4846 = vmatprep.subr.mxu1 %v12016_v41  ;;  %v4922_v40 = vrot.slane %v4889_v16, %v4576_v13  ;;  %v4930_v41 = vrot.slane %v4889_v16, %v4584_v14  ;;  %v9688_v13 = vld [vmem:[%s13085_s18 + $0x140] ss:$8 sps:$4 sm:$0xff]   ;;  %v9693_v14 = vld [vmem:[%s13085_s18 + $0x34] ss:$8 sps:$4 sm:$0xff]  }
 0x66c   :  { %4776 = vmatpush1.msra.mxu0 %v12020_v42  ;;  %4847 = vmatpush1.msra.mxu1 %v12022_v43  ;;  %v4918_v43 = vrot.slane %v4889_v16, %v4572_v15  ;;  %v9696_v15 = vld [vmem:[%s13085_s18 + $0x134] ss:$8 sps:$4 sm:$0xff]   ;;  %v9712_v16 = vld [vmem:[%s13085_s18 + $0x100] ss:$8 sps:$4 sm:$0xff]  }
 0x66d   :  { %4777 = vmatprep.subr.mxu0 %v12026_v45  ;;  %4848 = vmatprep.subr.mxu1 %v12028_v53 }
 0x66e   :  { %4778 = vmatpush1.msra.mxu0 %v12032_v54  ;;  %4811 = vmatprep.mubr.f32.mxu0 %v13370_v21 }
 0x66f   :  { %4849 = vmatpush1.msra.mxu1 %v12036_v56  ;;  %4882 = vmatprep.mubr.f32.mxu1 %v13370_v21 }
 0x670   :  { %8646 = vmatmul.mubr.msk.f32.vlgmr.msra.gmra.mxu0 %vm768_vm0, %v11942_v57  ;;  %8647 = vmatmul.mubr.msk.f32.vlgmr.msra.gmra.mxu1 %vm768_vm0, %v11942_v57 }
 0x671   :  { %5045 = vmatprep.mubr.f32.mxu0 %v13370_v21  ;;  %5122 = vmatprep.mubr.f32.mxu1 %v13370_v21 }
 0x6fb   :  { %v4334_v62 = vpop.f32.mrf.mxu0  ;;  %v4405_v1 = vpop.f32.mrf.mxu1 }
 0x6fc   :  { %v4594_v7 = vmul.f32 %v4557_v0, %v4334_v62  ;;  %v4596_v10 = vmul.f32 %v4565_v2, %v4405_v1  ;;  %v9672_v62 = vld [vmem:[%s13085_s18 + $0x174] ss:$8 sps:$4 sm:$0xff]   ;;  %v9670_v0 = vld [vmem:[%s13085_s18 + $0x170] ss:$8 sps:$4 sm:$0xff]   ;;  %v9675_v1 = vld [vmem:[%s13085_s18 + $0x64] ss:$8 sps:$4 sm:$0xff]  }
 0x6fd   :  { %v4336_v3 = vpop.f32.mrf.mxu0  ;;  %v4407_v4 = vpop.f32.mrf.mxu1  ;;  %v9678_v2 = vld [vmem:[%s13085_s18 + $0x164] ss:$8 sps:$4 sm:$0xff]  }
 0x6fe   :  { %v4595_v5 = vmul.f32 %v4561_v60, %v4336_v3  ;;  %v4597_v6 = vmul.f32 %v4569_v61, %v4407_v4  ;;  %v9669_v61 = vld [vmem:[%s13085_s18 + $0x74] ss:$8 sps:$4 sm:$0xff]   ;;  %v9673_v3 = vld [vmem:[%s13085_s18 + $0x60] ss:$8 sps:$4 sm:$0xff]  }
 0x6ff   :  { %v9681_v4 = vld [vmem:[%s13085_s18 + $0x54] ss:$8 sps:$4 sm:$0xff]  }
 0x700   :  { %8648 = vmatprep.subr.msk.mxu0 %vm4956_vm5, %v4595_v5  ;;  %8652 = vmatprep.subr.msk.mxu1 %vm4956_vm5, %v4597_v6 }
 0x701   :  { %8649 = vmatpush1.msk.msra.mxu0 %vm4956_vm5, %v4594_v7  ;;  %8653 = vmatpush1.msk.msra.mxu1 %vm4956_vm5, %v4596_v10 }
 0x702   :  { %8650 = vmatmul.mubr.msk.f32.vlgmr.msra.gmra.mxu0 %vm4949_vm6, %v12137_v11  ;;  %8654 = vmatmul.mubr.msk.f32.vlgmr.msra.gmra.mxu1 %vm4949_vm6, %v12137_v11 }
 0x703   :  { %5051 = vmatprep.mubr.f32.mxu0 %v13370_v21  ;;  %5128 = vmatprep.mubr.f32.mxu1 %v13370_v21 }
 0x706   :  { %8651 = vmatmul.mubr.msk.f32.gmra.mxu0 %vm4949_vm6, %v12152_v12  ;;  %8655 = vmatmul.mubr.msk.f32.gmra.mxu1 %vm4949_vm6, %v12152_v12 }
 0x707   :  { %5199 = vmatprep.mubr.f32.mxu0 %v13370_v21  ;;  %5276 = vmatprep.mubr.f32.mxu1 %v13370_v21 }
 0x70c   :  { %v4476_v34 = vpop.f32.mrf.mxu0  ;;  %v4547_v36 = vpop.f32.mrf.mxu1 }
 0x70d   :  { %v4598_v50 = vmul.f32 %v4573_v35, %v4476_v34  ;;  %v4600_v46 = vmul.f32 %v4581_v37, %v4547_v36  ;;  %v9702_v34 = vld [vmem:[%s13085_s18 + $0x124] ss:$8 sps:$4 sm:$0xff]   ;;  %v9697_v35 = vld [vmem:[%s13085_s18 + $0x20] ss:$8 sps:$4 sm:$0xff]   ;;  %v9705_v37 = vld [vmem:[%s13085_s18 + $0x14] ss:$8 sps:$4 sm:$0xff]  }
 0x70e   :  { %v4478_v38 = vpop.f32.mrf.mxu0  ;;  %v4549_v57 = vpop.f32.mrf.mxu1  ;;  %v9700_v36 = vld [vmem:[%s13085_s18 + $0x120] ss:$8 sps:$4 sm:$0xff]  }
 0x70f   :  { %v4599_v48 = vmul.f32 %v4577_v32, %v4478_v38  ;;  %v4601_v49 = vmul.f32 %v4585_v33, %v4549_v57  ;;  %v9694_v32 = vld [vmem:[%s13085_s18 + $0x130] ss:$8 sps:$4 sm:$0xff]   ;;  %v9699_v33 = vld [vmem:[%s13085_s18 + $0x24] ss:$8 sps:$4 sm:$0xff]   ;;  %v9708_v38 = vld [vmem:[%s13085_s18 + $0x114] ss:$8 sps:$4 sm:$0xff]  }
 0x710   :  { %v9703_v57 = vld [vmem:[%s13085_s18 + $0x10] ss:$8 sps:$4 sm:$0xff]  }
 0x711   :  { %8656 = vmatprep.subr.msk.mxu0 %vm4956_vm5, %v4599_v48  ;;  %8660 = vmatprep.subr.msk.mxu1 %vm4956_vm5, %v4601_v49 }
 0x712   :  { %8657 = vmatpush1.msk.msra.mxu0 %vm4956_vm5, %v4598_v50  ;;  %8661 = vmatpush1.msk.msra.mxu1 %vm4956_vm5, %v4600_v46 }
 0x713   :  { %8658 = vmatmul.mubr.msk.f32.vlgmr.msra.gmra.mxu0 %vm4949_vm6, %v12137_v11  ;;  %8662 = vmatmul.mubr.msk.f32.vlgmr.msra.gmra.mxu1 %vm4949_vm6, %v12137_v11 }
 0x714   :  { %5205 = vmatprep.mubr.f32.mxu0 %v13370_v21  ;;  %5282 = vmatprep.mubr.f32.mxu1 %v13370_v21 }
 0x717   :  { %8659 = vmatmul.mubr.msk.f32.gmra.mxu0 %vm4949_vm6, %v12152_v12  ;;  %8663 = vmatmul.mubr.msk.f32.gmra.mxu1 %vm4949_vm6, %v12152_v12 }
 0x718   :  { %5377 = vmatprep.mubr.f32.mxu0 %v13370_v21  ;;  %5454 = vmatprep.mubr.f32.mxu1 %v13370_v21 }
 0x71e   :  { %v4671_v22 = vpop.f32.mrf.mxu0  ;;  %v4742_v24 = vpop.f32.mrf.mxu1 }
 0x71f   :  { %v4890_v30 = vmul.f32 %v4671_v22, %v4594_v7  ;;  %v4892_v51 = vmul.f32 %v4742_v24, %v4596_v10  ;;  %v9682_v7 = vld [vmem:[%s13085_s18 + $0x150] ss:$8 sps:$4 sm:$0xff]   ;;  %v9687_v10 = vld [vmem:[%s13085_s18 + $0x44] ss:$8 sps:$4 sm:$0xff]   ;;  %v9717_v22 = vld [vmem:[%s13085_s18 + $0xf4] ss:$8 sps:$4 sm:$0xff]  }
 0x720   :  { %v4673_v27 = vpop.f32.mrf.mxu0  ;;  %v4744_v26 = vpop.f32.mrf.mxu1  ;;  %v9720_v24 = vld [vmem:[%s13085_s18 + $0x1f4] ss:$8 sps:$4 sm:$0xff]  }
 0x721   :  { %v4891_v25 = vmul.f32 %v4673_v27, %v4595_v5  ;;  %v4893_v52 = vmul.f32 %v4744_v26, %v4597_v6  ;;  %v4939_v55 = vsub.f32 %v4902_v29, %v4890_v30  ;;  %v4941_v56 = vsub.f32 %v4910_v28, %v4892_v51  ;;  %v9684_v5 = vld [vmem:[%s13085_s18 + $0x154] ss:$8 sps:$4 sm:$0xff]   ;;  %v9679_v6 = vld [vmem:[%s13085_s18 + $0x50] ss:$8 sps:$4 sm:$0xff]   ;;  %v9723_v30 = vld [vmem:[%s13085_s18 + $0xe4] ss:$8 sps:$4 sm:$0xff]  }
 0x722   :  { %v9726_v29 = vld [vmem:[%s13085_s18 + $0x1e4] ss:$8 sps:$4 sm:$0xff]   ;;  %v9721_v51 = vld [vmem:[%s13085_s18 + $0xe0] ss:$8 sps:$4 sm:$0xff]   ;;  %v9729_v27 = vld [vmem:[%s13085_s18 + $0xd4] ss:$8 sps:$4 sm:$0xff]  }
 0x723   :  { %v4940_v53 = vsub.f32 %v4906_v47, %v4891_v25  ;;  %v4942_v54 = vsub.f32 %v4914_v31, %v4893_v52  ;;  %v9715_v47 = vld [vmem:[%s13085_s18 + $0xf0] ss:$8 sps:$4 sm:$0xff]   ;;  %v9724_v28 = vld [vmem:[%s13085_s18 + $0x1e0] ss:$8 sps:$4 sm:$0xff]   ;;  %v9732_v26 = vld [vmem:[%s13085_s18 + $0x1d4] ss:$8 sps:$4 sm:$0xff]  }
 0x724   :  { %v9718_v31 = vld [vmem:[%s13085_s18 + $0x1f0] ss:$8 sps:$4 sm:$0xff]  }
 0x725   :  { %8664 = vmatprep.subr.msk.mxu0 %vm4956_vm5, %v4940_v53  ;;  %8668 = vmatprep.subr.msk.mxu1 %vm4956_vm5, %v4942_v54  ;;  %v9727_v25 = vld [vmem:[%s13085_s18 + $0xd0] ss:$8 sps:$4 sm:$0xff]   ;;  %v9735_v53 = vld [vmem:[%s13085_s18 + $0xc4] ss:$8 sps:$4 sm:$0xff]  }
 0x726   :  { %8665 = vmatpush1.msk.msra.mxu0 %vm4956_vm5, %v4939_v55  ;;  %8669 = vmatpush1.msk.msra.mxu1 %vm4956_vm5, %v4941_v56  ;;  %v9730_v52 = vld [vmem:[%s13085_s18 + $0x1d0] ss:$8 sps:$4 sm:$0xff]   ;;  %v9738_v54 = vld [vmem:[%s13085_s18 + $0x1c4] ss:$8 sps:$4 sm:$0xff]   ;;  %v9733_v55 = vld [vmem:[%s13085_s18 + $0xc0] ss:$8 sps:$4 sm:$0xff]  }
 0x727   :  { %8666 = vmatmul.mubr.msk.f32.vlgmr.msra.gmra.mxu0 %vm4949_vm6, %v12137_v11  ;;  %8670 = vmatmul.mubr.msk.f32.vlgmr.msra.gmra.mxu1 %vm4949_vm6, %v12137_v11  ;;  %v9736_v56 = vld [vmem:[%s13085_s18 + $0x1c0] ss:$8 sps:$4 sm:$0xff]  }
 0x728   :  { %5383 = vmatprep.mubr.f32.mxu0 %v13370_v21  ;;  %5460 = vmatprep.mubr.f32.mxu1 %v13370_v21 }
 0x72b   :  { %8667 = vmatmul.mubr.msk.f32.gmra.mxu0 %vm4949_vm6, %v12152_v12  ;;  %8671 = vmatmul.mubr.msk.f32.gmra.mxu1 %vm4949_vm6, %v12152_v12 }
 0x72c   :  { %5531 = vmatprep.mubr.f32.mxu0 %v13370_v21  ;;  %5608 = vmatprep.mubr.f32.mxu1 %v13370_v21 }
 0x730   :  { %v4813_v58 = vpop.f32.mrf.mxu0  ;;  %v4884_v39 = vpop.f32.mrf.mxu1 }
 0x731   :  { %v4894_v42 = vmul.f32 %v4813_v58, %v4598_v50  ;;  %v4896_v45 = vmul.f32 %v4884_v39, %v4600_v46  ;;  %v9714_v50 = vld [vmem:[%s13085_s18 + $0x104] ss:$8 sps:$4 sm:$0xff]   ;;  %v9709_v46 = vld [vmem:[%s13085_s18] ss:$8 sps:$4 sm:$0xff]   ;;  %v9741_v58 = vld [vmem:[%s13085_s18 + $0xb4] ss:$8 sps:$4 sm:$0xff]  }
 0x732   :  { %v4815_v18 = vpop.f32.mrf.mxu0  ;;  %v4886_v9 = vpop.f32.mrf.mxu1  ;;  %v9744_v39 = vld [vmem:[%s13085_s18 + $0x1b4] ss:$8 sps:$4 sm:$0xff]  }
 0x733   :  { %v4895_v44 = vmul.f32 %v4815_v18, %v4599_v48  ;;  %v4897_v8 = vmul.f32 %v4886_v9, %v4601_v49  ;;  %v4943_v59 = vsub.f32 %v4918_v43, %v4894_v42  ;;  %v4945_v60 = vsub.f32 %v4926_v17, %v4896_v45  ;;  %v9706_v48 = vld [vmem:[%s13085_s18 + $0x110] ss:$8 sps:$4 sm:$0xff]   ;;  %v9711_v49 = vld [vmem:[%s13085_s18 + $0x4] ss:$8 sps:$4 sm:$0xff]   ;;  %v9745_v45 = vld [vmem:[%s13085_s18 + $0xa0] ss:$8 sps:$4 sm:$0xff]  }
 0x734   :  { %v9747_v42 = vld [vmem:[%s13085_s18 + $0xa4] ss:$8 sps:$4 sm:$0xff]   ;;  %v9748_v17 = vld [vmem:[%s13085_s18 + $0x1a0] ss:$8 sps:$4 sm:$0xff]   ;;  %v9753_v18 = vld [vmem:[%s13085_s18 + $0x94] ss:$8 sps:$4 sm:$0xff]  }
 0x735   :  { %v4944_v19 = vsub.f32 %v4922_v40, %v4895_v44  ;;  %v4946_v20 = vsub.f32 %v4930_v41, %v4897_v8  ;;  %v9739_v40 = vld [vmem:[%s13085_s18 + $0xb0] ss:$8 sps:$4 sm:$0xff]   ;;  %v9750_v43 = vld [vmem:[%s13085_s18 + $0x1a4] ss:$8 sps:$4 sm:$0xff]   ;;  %v9756_v9 = vld [vmem:[%s13085_s18 + $0x194] ss:$8 sps:$4 sm:$0xff]  }
 0x736   :  { %v9742_v41 = vld [vmem:[%s13085_s18 + $0x1b0] ss:$8 sps:$4 sm:$0xff]  }
 0x737   :  { %8672 = vmatprep.subr.msk.mxu0 %vm4956_vm5, %v4944_v19  ;;  %8676 = vmatprep.subr.msk.mxu1 %vm4956_vm5, %v4946_v20  ;;  %v9751_v44 = vld [vmem:[%s13085_s18 + $0x90] ss:$8 sps:$4 sm:$0xff]   ;;  %v9759_v19 = vld [vmem:[%s13085_s18 + $0x84] ss:$8 sps:$4 sm:$0xff]  }
 0x738   :  { %8673 = vmatpush1.msk.msra.mxu0 %vm4956_vm5, %v4943_v59  ;;  %8677 = vmatpush1.msk.msra.mxu1 %vm4956_vm5, %v4945_v60  ;;  %v9754_v8 = vld [vmem:[%s13085_s18 + $0x190] ss:$8 sps:$4 sm:$0xff]   ;;  %v9762_v20 = vld [vmem:[%s13085_s18 + $0x184] ss:$8 sps:$4 sm:$0xff]   ;;  %v9757_v59 = vld [vmem:[%s13085_s18 + $0x80] ss:$8 sps:$4 sm:$0xff]  }
 0x739   :  { %8674 = vmatmul.mubr.msk.f32.vlgmr.msra.gmra.mxu0 %vm4949_vm6, %v12137_v11  ;;  %8678 = vmatmul.mubr.msk.f32.vlgmr.msra.gmra.mxu1 %vm4949_vm6, %v12137_v11  ;;  %v9690_v11 = vld [vmem:[%s13085_s18 + $0x144] ss:$8 sps:$4 sm:$0xff]   ;;  %v9760_v60 = vld [vmem:[%s13085_s18 + $0x180] ss:$8 sps:$4 sm:$0xff]  }
 0x73a   :  { %5537 = vmatprep.mubr.f32.mxu0 %v13370_v21  ;;  %5614 = vmatprep.mubr.f32.mxu1 %v13370_v21  ;;  %v9676_v21 = vld [vmem:[%s13085_s18 + $0x160] ss:$8 sps:$4 sm:$0xff]  }
 0x73b   :  { %6461 = vmatprep.subr.bf16.mxu0 %v9669_v61  ;;  %6504 = vmatprep.subr.bf16.mxu1 %v9672_v62  ;;  %v9765_v61 = vld [vmem:[%s13085_s18 + $0x274] ss:$8 sps:$4 sm:$0xff]  }
 0x73c   :  { %6462 = vmatpush1.bf16.msra.mxu0 %v9667_v63  ;;  %6505 = vmatpush1.bf16.msra.mxu1 %v9670_v0  ;;  %v9768_v62 = vld [vmem:[%s13085_s18 + $0x374] ss:$8 sps:$4 sm:$0xff]  }
 0x73d   :  { %8675 = vmatmul.mubr.msk.f32.gmra.mxu0 %vm4949_vm6, %v12152_v12  ;;  %8679 = vmatmul.mubr.msk.f32.gmra.mxu1 %vm4949_vm6, %v12152_v12  ;;  %v9685_v12 = vld [vmem:[%s13085_s18 + $0x40] ss:$8 sps:$4 sm:$0xff]  }
 0x73e   :  { %6463 = vmatprep.subr.bf16.mxu0 %v9675_v1  ;;  %6506 = vmatprep.subr.bf16.mxu1 %v9678_v2 }
 0x740   :  { %6464 = vmatpush1.bf16.msra.mxu0 %v9673_v3  ;;  %6507 = vmatpush1.bf16.msra.mxu1 %v9676_v21 }
 0x741   :  { %6465 = vmatprep.subr.bf16.mxu0 %v9681_v4  ;;  %6508 = vmatprep.subr.bf16.mxu1 %v9684_v5 }
 0x744   :  { %6466 = vmatpush1.bf16.msra.mxu0 %v9679_v6  ;;  %6509 = vmatpush1.bf16.msra.mxu1 %v9682_v7 }
 0x745   :  { %6467 = vmatprep.subr.bf16.mxu0 %v9687_v10  ;;  %6510 = vmatprep.subr.bf16.mxu1 %v9690_v11 }
 0x748   :  { %6468 = vmatpush1.bf16.msra.mxu0 %v9685_v12  ;;  %6511 = vmatpush1.bf16.msra.mxu1 %v9688_v13 }
 0x749   :  { %6469 = vmatprep.subr.bf16.mxu0 %v9693_v14  ;;  %6512 = vmatprep.subr.bf16.mxu1 %v9696_v15 }
 0x74c   :  { %6470 = vmatpush1.bf16.msra.mxu0 %v9691_v23  ;;  %6513 = vmatpush1.bf16.msra.mxu1 %v9694_v32  ;;  %v13380_v23 = vld [vmem:[#allocation24_spill] sm:$0xff] }
 0x74d   :  { %6471 = vmatprep.subr.bf16.mxu0 %v9699_v33  ;;  %6514 = vmatprep.subr.bf16.mxu1 %v9702_v34 }
 0x750   :  { %6472 = vmatpush1.bf16.msra.mxu0 %v9697_v35  ;;  %6515 = vmatpush1.bf16.msra.mxu1 %v9700_v36  ;;  %v13381_v35 = vld [vmem:[#allocation26_spill] sm:$0xff] }
 0x751   :  { %6473 = vmatprep.subr.bf16.mxu0 %v9705_v37  ;;  %6516 = vmatprep.subr.bf16.mxu1 %v9708_v38  ;;  %v13382_v37 = vld [vmem:[#allocation27_spill] sm:$0xff] }
 0x754   :  { %6474 = vmatpush1.bf16.msra.mxu0 %v9703_v57  ;;  %6517 = vmatpush1.bf16.msra.mxu1 %v9706_v48  ;;  %v13383_v57 = vld [vmem:[#allocation25_spill] sm:$0xff] }
 0x755   :  { %6475 = vmatprep.subr.bf16.mxu0 %v9711_v49  ;;  %6518 = vmatprep.subr.bf16.mxu1 %v9714_v50 }
 0x758   :  { %6476 = vmatpush1.bf16.msra.mxu0 %v9709_v46  ;;  %6519 = vmatpush1.bf16.msra.mxu1 %v9712_v16 }
 0x759   :  { %6477 = vmatprep.subr.bf16.mxu0 %v9717_v22  ;;  %6520 = vmatprep.subr.bf16.mxu1 %v9720_v24  ;;  %v13384_v24 = vld [vmem:[#allocation28_spill] sm:$0xff] }
 0x75c   :  { %6478 = vmatpush2.bf16.msra.mxu0 %v9715_v47  ;;  %6521 = vmatpush2.bf16.msra.mxu1 %v9718_v31  ;;  %v13385_v31 = vld [vmem:[#allocation29_spill] sm:$0xff] }
 0x75d   :  { %6479 = vmatprep.subr.bf16.mxu0 %v9723_v30  ;;  %6522 = vmatprep.subr.bf16.mxu1 %v9726_v29 }
 0x760   :  { %6480 = vmatpush2.bf16.msra.mxu0 %v9721_v51  ;;  %6523 = vmatpush2.bf16.msra.mxu1 %v9724_v28 }
 0x761   :  { %6481 = vmatprep.subr.bf16.mxu0 %v9729_v27  ;;  %6524 = vmatprep.subr.bf16.mxu1 %v9732_v26  ;;  %v13386_v27 = vld [vmem:[#allocation30_spill] sm:$0xff] }
 0x764   :  { %6482 = vmatpush2.bf16.msra.mxu0 %v9727_v25  ;;  %6525 = vmatpush2.bf16.msra.mxu1 %v9730_v52  ;;  %v13387_v25 = vld [vmem:[#allocation31_spill] sm:$0xff] }
 0x765   :  { %6483 = vmatprep.subr.bf16.mxu0 %v9735_v53  ;;  %6526 = vmatprep.subr.bf16.mxu1 %v9738_v54 }
 0x768   :  { %6484 = vmatpush2.bf16.msra.mxu0 %v9733_v55  ;;  %6527 = vmatpush2.bf16.msra.mxu1 %v9736_v56 }
 0x769   :  { %6485 = vmatprep.subr.bf16.mxu0 %v9741_v58  ;;  %6528 = vmatprep.subr.bf16.mxu1 %v9744_v39 }
 0x76c   :  { %6486 = vmatpush2.bf16.msra.mxu0 %v9739_v40  ;;  %6529 = vmatpush2.bf16.msra.mxu1 %v9742_v41 }
 0x76d   :  { %6487 = vmatprep.subr.bf16.mxu0 %v9747_v42  ;;  %6530 = vmatprep.subr.bf16.mxu1 %v9750_v43 }
 0x770   :  { %6488 = vmatpush2.bf16.msra.mxu0 %v9745_v45  ;;  %6531 = vmatpush2.bf16.msra.mxu1 %v9748_v17 }
 0x771   :  { %6489 = vmatprep.subr.bf16.mxu0 %v9753_v18  ;;  %6532 = vmatprep.subr.bf16.mxu1 %v9756_v9 }
 0x774   :  { %6490 = vmatpush2.bf16.msra.mxu0 %v9751_v44  ;;  %6533 = vmatpush2.bf16.msra.mxu1 %v9754_v8 }
 0x775   :  { %6491 = vmatprep.subr.bf16.mxu0 %v9759_v19  ;;  %6534 = vmatprep.subr.bf16.mxu1 %v9762_v20 }
 0x778   :  { %6492 = vmatpush2.bf16.msra.mxu0 %v9757_v59  ;;  %6535 = vmatpush2.bf16.msra.mxu1 %v9760_v60 }
 0x779   :  { %6547 = vmatprep.subr.bf16.mxu0 %v9765_v61  ;;  %6590 = vmatprep.subr.bf16.mxu1 %v9768_v62 }
 0x7c2   :  { %v5047_v63 = vpop.f32.mrf.mxu0  ;;  %v5124_v0 = vpop.f32.mrf.mxu1 }
 0x7c3   :  { %v5621_v32 = vmul.f32 %v5047_v63, %v13380_v23  ;;  %v5623_v48 = vmul.f32 %v5124_v0, %v13383_v57  ;;  %v9769_v23 = vld [vmem:[%s13085_s18 + $0x260] ss:$8 sps:$4 sm:$0xff]   ;;  %v9777_v57 = vld [vmem:[%s13085_s18 + $0x254] ss:$8 sps:$4 sm:$0xff]  }
 0x7c4   :  { %v5049_v1 = vpop.f32.mrf.mxu0  ;;  %v5126_v2 = vpop.f32.mrf.mxu1 }
 0x7c5   :  { %v5622_v36 = vmul.f32 %v5049_v1, %v13381_v35  ;;  %v5624_v38 = vmul.f32 %v5126_v2, %v13382_v37  ;;  %v9763_v1 = vld [vmem:[%s13085_s18 + $0x270] ss:$8 sps:$4 sm:$0xff]  }
 0x7c6   :  { %v5053_v3 = vpop.f32.mrf.mxu0  ;;  %v5130_v21 = vpop.f32.mrf.mxu1  ;;  %v9766_v2 = vld [vmem:[%s13085_s18 + $0x370] ss:$8 sps:$4 sm:$0xff]  }
 0x7c7   :  { %v5629_v47 = vmul.f32 %v5053_v3, %v13384_v24  ;;  %v5631_v30 = vmul.f32 %v5130_v21, %v13385_v31  ;;  %v13389_v35 = vld [vmem:[#allocation33_spill] sm:$0xff] }
 0x7c8   :  { %v5055_v4 = vpop.f32.mrf.mxu0  ;;  %v5132_v5 = vpop.f32.mrf.mxu1 }
 0x7c9   :  { %v5630_v26 = vmul.f32 %v5055_v4, %v13386_v27  ;;  %v5632_v52 = vmul.f32 %v5132_v5, %v13387_v25  ;;  %v9771_v4 = vld [vmem:[%s13085_s18 + $0x264] ss:$8 sps:$4 sm:$0xff]  }
 0x7ca   :  { %v9774_v5 = vld [vmem:[%s13085_s18 + $0x364] ss:$8 sps:$4 sm:$0xff]  }
 0x7cb   :  { %v9783_v25 = vld [vmem:[%s13085_s18 + $0x244] ss:$8 sps:$4 sm:$0xff]  }
 0x7d3   :  { %v12414_v6 = vpop.f32.mrf.mxu0  ;;  %v12416_v7 = vpop.f32.mrf.mxu1 }
 0x7d5   :  { %v12418_v10 = vpop.f32.mrf.mxu0  ;;  %v12420_v11 = vpop.f32.mrf.mxu1 }
 0x7d7   :  { %v12422_v12 = vpop.f32.mrf.mxu0  ;;  %v12424_v13 = vpop.f32.mrf.mxu1 }
 0x7d9   :  { %v12426_v14 = vpop.f32.mrf.mxu0  ;;  %v12428_v15 = vpop.f32.mrf.mxu1 }
 0x7e7   :  { %v5379_v33 = vpop.f32.mrf.mxu0  ;;  %v5456_v34 = vpop.f32.mrf.mxu1 }
 0x7e8   :  { %v5637_v49 = vadd.f32 %v5621_v32, %v5379_v33  ;;  %v5639_v29 = vadd.f32 %v5623_v48, %v5456_v34  ;;  %v9772_v32 = vld [vmem:[%s13085_s18 + $0x360] ss:$8 sps:$4 sm:$0xff]   ;;  %v13388_v33 = vld [vmem:[#allocation32_spill] sm:$0xff] }
 0x7e9   :  { %v5381_v50 = vpop.f32.mrf.mxu0  ;;  %v5458_v46 = vpop.f32.mrf.mxu1  ;;  %v5625_v34 = vmul.f32 %v12414_v6, %v13388_v33  ;;  %v9780_v48 = vld [vmem:[%s13085_s18 + $0x354] ss:$8 sps:$4 sm:$0xff]   ;;  %v9795_v33 = vld [vmem:[%s13085_s18 + $0x224] ss:$8 sps:$4 sm:$0xff]  }
 0x7ea   :  { %v5638_v16 = vadd.f32 %v5622_v36, %v5381_v50  ;;  %v5640_v22 = vadd.f32 %v5624_v38, %v5458_v46  ;;  %v5653_v53 = vmul.f32 0.2, %v5637_v49  ;;  %v5655_v43 = vmul.f32 0.2, %v5639_v29  ;;  %v13391_v46 = vld [vmem:[#allocation35_spill] sm:$0xff] }
 0x7eb   :  { %v5385_v51 = vpop.f32.mrf.mxu0  ;;  %v5462_v28 = vpop.f32.mrf.mxu1  ;;  %v5627_v36 = vmul.f32 %v12416_v7, %v13389_v35  ;;  %v5628_v6 = vmul.f32 %v12420_v11, %v13391_v46  ;;  %v9793_v35 = vld [vmem:[%s13085_s18 + $0x220] ss:$8 sps:$4 sm:$0xff]  }
 0x7ec   :  { %v5645_v54 = vadd.f32 %v5629_v47, %v5385_v51  ;;  %v5647_v55 = vadd.f32 %v5631_v30, %v5462_v28  ;;  %v5654_v39 = vmul.f32 0.2, %v5638_v16  ;;  %v5656_v40 = vmul.f32 0.2, %v5640_v22  ;;  %v9775_v30 = vld [vmem:[%s13085_s18 + $0x250] ss:$8 sps:$4 sm:$0xff]  }
 0x7ed   :  { %v5387_v56 = vpop.f32.mrf.mxu0  ;;  %v5464_v58 = vpop.f32.mrf.mxu1  ;;  %v5669_v61 = vmax.f32 %v5637_v49, %v5653_v53  ;;  %v5671_v62 = vmax.f32 %v5639_v29, %v5655_v43  ;;  %v13390_v49 = vld [vmem:[#allocation34_spill] sm:$0xff]  ;;  %v13392_v29 = vld [vmem:[#allocation36_spill] sm:$0xff]  ;;  %v13393_v28 = vld [vmem:[#allocation37_spill] sm:$0xff] }
 0x7ee   :  { %v5646_v41 = vadd.f32 %v5630_v26, %v5387_v56  ;;  %v5648_v42 = vadd.f32 %v5632_v52, %v5464_v58  ;;  %v5661_v45 = vmul.f32 0.2, %v5645_v54  ;;  %v5663_v17 = vmul.f32 0.2, %v5647_v55  ;;  %v9778_v26 = vld [vmem:[%s13085_s18 + $0x350] ss:$8 sps:$4 sm:$0xff]  }
 0x7ef   :  { %v5670_v19 = vmax.f32 %v5638_v16, %v5654_v39  ;;  %v5672_v20 = vmax.f32 %v5640_v22, %v5656_v40  ;;  %v5626_v50 = vmul.f32 %v12418_v10, %v13390_v49  ;;  %v5633_v51 = vmul.f32 %v12422_v12, %v13392_v29  ;;  %v13394_v52 = vld [vmem:[#allocation38_spill] sm:$0xff] }
 0x7f0   :  { %v5662_v18 = vmul.f32 0.2, %v5646_v41  ;;  %v5664_v9 = vmul.f32 0.2, %v5648_v42  ;;  %v5677_v44 = vmax.f32 %v5645_v54, %v5661_v45  ;;  %v5679_v8 = vmax.f32 %v5647_v55, %v5663_v17  ;;  %v13395_v54 = vld [vmem:[#allocation39_spill] sm:$0xff] }
 0x7f1   :  { %v5635_v10 = vmul.f32 %v12424_v13, %v13393_v28  ;;  %v5634_v53 = vmul.f32 %v12426_v14, %v13394_v52  ;;  %v5636_v12 = vmul.f32 %v12428_v15, %v13395_v54  ;;  %v9786_v13 = vld [vmem:[%s13085_s18 + $0x344] ss:$8 sps:$4 sm:$0xff]   ;;  %v9784_v15 = vld [vmem:[%s13085_s18 + $0x340] ss:$8 sps:$4 sm:$0xff]   ;;  %v9828_v28 = vld [vmem:[%s13085_s18 + $0x3d4] ss:$8 sps:$4 sm:$0xff]  }
 0x7f2   :  { %v5678_v59 = vmax.f32 %v5646_v41, %v5662_v18  ;;  %v5680_v60 = vmax.f32 %v5648_v42, %v5664_v9  ;;  %v5685_v3 = vpack.c.bf16 %v5677_v44, %v5669_v61  ;;  %v5687_v21 = vpack.c.bf16 %v5679_v8, %v5671_v62  ;;  %v9781_v42 = vld [vmem:[%s13085_s18 + $0x240] ss:$8 sps:$4 sm:$0xff]   ;;  %v9789_v44 = vld [vmem:[%s13085_s18 + $0x234] ss:$8 sps:$4 sm:$0xff]   ;;  %v9807_v49 = vld [vmem:[%s13085_s18 + $0x204] ss:$8 sps:$4 sm:$0xff]  }
 0x7f3   :  { %v9805_v46 = vld [vmem:[%s13085_s18 + $0x200] ss:$8 sps:$4 sm:$0xff]   ;;  %v9840_v54 = vld [vmem:[%s13085_s18 + $0x3b4] ss:$8 sps:$4 sm:$0xff]  }
 0x7f4   :  { %v5686_v63 = vpack.c.bf16 %v5678_v59, %v5670_v19  ;;  %v5688_v0 = vpack.c.bf16 %v5680_v60, %v5672_v20  ;;  %v9792_v20 = vld [vmem:[%s13085_s18 + $0x334] ss:$8 sps:$4 sm:$0xff]   ;;  %v9820_v29 = vld [vmem:[%s13085_s18 + $0x3e0] ss:$8 sps:$4 sm:$0xff]  }
 0x7f5   :  { %v9832_v52 = vld [vmem:[%s13085_s18 + $0x3c0] ss:$8 sps:$4 sm:$0xff]  }
 0x7f6   :  { %6493 = vmatprep.mubr.bf16.mxu0 %v5686_v63  ;;  %6536 = vmatprep.mubr.bf16.mxu1 %v5688_v0 }
 0x7f7   :  { %6494 = vmatmul.mubr.bf16.vlgmr.msra.gmra.mxu0 %v5685_v3  ;;  %6537 = vmatmul.mubr.bf16.vlgmr.msra.gmra.mxu1 %v5687_v21 }
 0x7f8   :  { %6548 = vmatpush1.bf16.msra.mxu0 %v9763_v1  ;;  %6591 = vmatpush1.bf16.msra.mxu1 %v9766_v2 }
 0x7f9   :  { %v5533_v37 = vpop.f32.mrf.mxu0  ;;  %v5610_v38 = vpop.f32.mrf.mxu1  ;;  %6549 = vmatprep.subr.bf16.mxu0 %v9771_v4  ;;  %6592 = vmatprep.subr.bf16.mxu1 %v9774_v5  ;;  %v9787_v4 = vld [vmem:[%s13085_s18 + $0x230] ss:$8 sps:$4 sm:$0xff]  }
 0x7fa   :  { %v5641_v16 = vadd.f32 %v5625_v34, %v5533_v37  ;;  %v5643_v7 = vadd.f32 %v5627_v36, %v5610_v38  ;;  %v9790_v5 = vld [vmem:[%s13085_s18 + $0x330] ss:$8 sps:$4 sm:$0xff]   ;;  %v9798_v34 = vld [vmem:[%s13085_s18 + $0x324] ss:$8 sps:$4 sm:$0xff]   ;;  %v9796_v36 = vld [vmem:[%s13085_s18 + $0x320] ss:$8 sps:$4 sm:$0xff]  }
 0x7fb   :  { %v5535_v22 = vpop.f32.mrf.mxu0  ;;  %v5612_v24 = vpop.f32.mrf.mxu1  ;;  %v9801_v37 = vld [vmem:[%s13085_s18 + $0x214] ss:$8 sps:$4 sm:$0xff]  }
 0x7fc   :  { %v5642_v47 = vadd.f32 %v5626_v50, %v5535_v22  ;;  %v5644_v31 = vadd.f32 %v5628_v6, %v5612_v24  ;;  %6550 = vmatpush1.bf16.msra.mxu0 %v9769_v23  ;;  %6593 = vmatpush1.bf16.msra.mxu1 %v9772_v32  ;;  %v5657_v55 = vmul.f32 0.2, %v5641_v16  ;;  %v5659_v56 = vmul.f32 0.2, %v5643_v7  ;;  %v9804_v38 = vld [vmem:[%s13085_s18 + $0x314] ss:$8 sps:$4 sm:$0xff]  }
 0x7fd   :  { %v5539_v27 = vpop.f32.mrf.mxu0  ;;  %v5616_v11 = vpop.f32.mrf.mxu1  ;;  %6551 = vmatprep.subr.bf16.mxu0 %v9777_v57  ;;  %6594 = vmatprep.subr.bf16.mxu1 %v9780_v48  ;;  %v9799_v57 = vld [vmem:[%s13085_s18 + $0x210] ss:$8 sps:$4 sm:$0xff]   ;;  %v9810_v50 = vld [vmem:[%s13085_s18 + $0x304] ss:$8 sps:$4 sm:$0xff]   ;;  %v9808_v6 = vld [vmem:[%s13085_s18 + $0x300] ss:$8 sps:$4 sm:$0xff]  }
 0x7fe   :  { %v5649_v58 = vadd.f32 %v5633_v51, %v5539_v27  ;;  %v5651_v39 = vadd.f32 %v5635_v10, %v5616_v11  ;;  %v5658_v43 = vmul.f32 0.2, %v5642_v47  ;;  %v5660_v45 = vmul.f32 0.2, %v5644_v31  ;;  %v9802_v48 = vld [vmem:[%s13085_s18 + $0x310] ss:$8 sps:$4 sm:$0xff]  }
 0x7ff   :  { %v5541_v40 = vpop.f32.mrf.mxu0  ;;  %v5618_v41 = vpop.f32.mrf.mxu1  ;;  %v5673_v59 = vmax.f32 %v5641_v16, %v5657_v55  ;;  %v5675_v60 = vmax.f32 %v5643_v7, %v5659_v56  ;;  %v9813_v16 = vld [vmem:[%s13085_s18 + $0x2f4] ss:$8 sps:$4 sm:$0xff]   ;;  %v9811_v22 = vld [vmem:[%s13085_s18 + $0x2f0] ss:$8 sps:$4 sm:$0xff]   ;;  %v9831_v11 = vld [vmem:[%s13085_s18 + $0x2c4] ss:$8 sps:$4 sm:$0xff]  }
 0x800   :  { %v5650_v14 = vadd.f32 %v5634_v53, %v5541_v40  ;;  %v5652_v17 = vadd.f32 %v5636_v12, %v5618_v41  ;;  %6552 = vmatpush1.bf16.msra.mxu0 %v9775_v30  ;;  %v5665_v18 = vmul.f32 0.2, %v5649_v58  ;;  %v5667_v9 = vmul.f32 0.2, %v5651_v39  ;;  %6595 = vmatpush1.bf16.msra.mxu1 %v9778_v26  ;;  %v9816_v7 = vld [vmem:[%s13085_s18 + $0x3f4] ss:$8 sps:$4 sm:$0xff]  }
 0x801   :  { %6553 = vmatprep.subr.bf16.mxu0 %v9783_v25  ;;  %6596 = vmatprep.subr.bf16.mxu1 %v9786_v13  ;;  %v5674_v63 = vmax.f32 %v5642_v47, %v5658_v43  ;;  %v5676_v0 = vmax.f32 %v5644_v31, %v5660_v45  ;;  %v9814_v24 = vld [vmem:[%s13085_s18 + $0x3f0] ss:$8 sps:$4 sm:$0xff]   ;;  %v9819_v47 = vld [vmem:[%s13085_s18 + $0x2e4] ss:$8 sps:$4 sm:$0xff]   ;;  %v9817_v30 = vld [vmem:[%s13085_s18 + $0x2e0] ss:$8 sps:$4 sm:$0xff]  }
 0x802   :  { %v5666_v8 = vmul.f32 0.2, %v5650_v14  ;;  %v5668_v19 = vmul.f32 0.2, %v5652_v17  ;;  %v5681_v61 = vmax.f32 %v5649_v58, %v5665_v18  ;;  %v5683_v62 = vmax.f32 %v5651_v39, %v5667_v9  ;;  %v9822_v31 = vld [vmem:[%s13085_s18 + $0x3e4] ss:$8 sps:$4 sm:$0xff]  }
 0x803   :  { %v9825_v51 = vld [vmem:[%s13085_s18 + $0x2d4] ss:$8 sps:$4 sm:$0xff]   ;;  %v9823_v10 = vld [vmem:[%s13085_s18 + $0x2d0] ss:$8 sps:$4 sm:$0xff]   ;;  %v9834_v26 = vld [vmem:[%s13085_s18 + $0x3c4] ss:$8 sps:$4 sm:$0xff]  }
 0x804   :  { %v5682_v1 = vmax.f32 %v5650_v14, %v5666_v8  ;;  %v5684_v2 = vmax.f32 %v5652_v17, %v5668_v19  ;;  %6554 = vmatpush1.bf16.msra.mxu0 %v9781_v42  ;;  %v12502_v3 = vpack.c.bf16 %v5681_v61, %v5673_v59  ;;  %v12504_v21 = vpack.c.bf16 %v5683_v62, %v5675_v60  ;;  %v9826_v27 = vld [vmem:[%s13085_s18 + $0x3d0] ss:$8 sps:$4 sm:$0xff]   ;;  %v9829_v25 = vld [vmem:[%s13085_s18 + $0x2c0] ss:$8 sps:$4 sm:$0xff]   ;;  %v9837_v53 = vld [vmem:[%s13085_s18 + $0x2b4] ss:$8 sps:$4 sm:$0xff]  }
 0x805   :  { %6597 = vmatpush1.bf16.msra.mxu1 %v9784_v15  ;;  %6555 = vmatprep.subr.bf16.mxu0 %v9789_v44  ;;  %v9835_v12 = vld [vmem:[%s13085_s18 + $0x2b0] ss:$8 sps:$4 sm:$0xff]   ;;  %v9843_v55 = vld [vmem:[%s13085_s18 + $0x2a4] ss:$8 sps:$4 sm:$0xff]   ;;  %v9841_v58 = vld [vmem:[%s13085_s18 + $0x2a0] ss:$8 sps:$4 sm:$0xff]  }
 0x806   :  { %v5690_v23 = vpack.c.bf16 %v5682_v1, %v5674_v63  ;;  %6598 = vmatprep.subr.bf16.mxu1 %v9792_v20  ;;  %v5692_v32 = vpack.c.bf16 %v5684_v2, %v5676_v0  ;;  %v9838_v13 = vld [vmem:[%s13085_s18 + $0x3b0] ss:$8 sps:$4 sm:$0xff]   ;;  %v9846_v56 = vld [vmem:[%s13085_s18 + $0x3a4] ss:$8 sps:$4 sm:$0xff]   ;;  %v9844_v39 = vld [vmem:[%s13085_s18 + $0x3a0] ss:$8 sps:$4 sm:$0xff]  }
 0x807   :  { %v9849_v40 = vld [vmem:[%s13085_s18 + $0x294] ss:$8 sps:$4 sm:$0xff]   ;;  %v9847_v42 = vld [vmem:[%s13085_s18 + $0x290] ss:$8 sps:$4 sm:$0xff]   ;;  %v9855_v45 = vld [vmem:[%s13085_s18 + $0x284] ss:$8 sps:$4 sm:$0xff]  }
 0x808   :  { %6579 = vmatprep.mubr.bf16.mxu0 %v5690_v23  ;;  %6622 = vmatprep.mubr.bf16.mxu1 %v5692_v32  ;;  %v9852_v41 = vld [vmem:[%s13085_s18 + $0x394] ss:$8 sps:$4 sm:$0xff]   ;;  %v9850_v43 = vld [vmem:[%s13085_s18 + $0x390] ss:$8 sps:$4 sm:$0xff]   ;;  %v9858_v14 = vld [vmem:[%s13085_s18 + $0x384] ss:$8 sps:$4 sm:$0xff]  }
 0x809   :  { %6556 = vmatpush1.bf16.msra.mxu0 %v9787_v4  ;;  %6599 = vmatpush1.bf16.msra.mxu1 %v9790_v5  ;;  %v9853_v17 = vld [vmem:[%s13085_s18 + $0x280] ss:$8 sps:$4 sm:$0xff]  }
 0x80a   :  { %6557 = vmatprep.subr.bf16.mxu0 %v9795_v33  ;;  %6600 = vmatprep.subr.bf16.mxu1 %v9798_v34  ;;  %v9856_v15 = vld [vmem:[%s13085_s18 + $0x380] ss:$8 sps:$4 sm:$0xff]  }
 0x80b   :  { %v6699_v18 = vld [vmem:[%s13086_s19 + $0x1c0] sm:$0xff]  ;;  %v6700_v44 = vld [vmem:[%s13086_s19 + $0x1c8] sm:$0xff] }
 0x80c   :  { %v6703_v9 = vld [vmem:[%s13086_s19 + $0x1e0] sm:$0xff]  ;;  %v6704_v20 = vld [vmem:[%s13086_s19 + $0x1e8] sm:$0xff] }
 0x80d   :  { %6558 = vmatpush1.bf16.msra.mxu0 %v9793_v35  ;;  %6601 = vmatpush1.bf16.msra.mxu1 %v9796_v36  ;;  %v8864_v8 = vcombine.low %v6699_v18, %v6703_v9  ;;  %v8865_v19 = vcombine.high %v6699_v18, %v6703_v9  ;;  %v6691_v59 = vld [vmem:[%s13086_s19 + $0x180] sm:$0xff]  ;;  %v8866_v61 = vcombine.low %v6700_v44, %v6704_v20  ;;  %v6692_v0 = vld [vmem:[%s13086_s19 + $0x188] sm:$0xff] }
 0x80e   :  { %6559 = vmatprep.subr.bf16.mxu0 %v9801_v37  ;;  %6602 = vmatprep.subr.bf16.mxu1 %v9804_v38  ;;  %v6695_v60 = vld [vmem:[%s13086_s19 + $0x1a0] sm:$0xff]  ;;  %v8867_v62 = vcombine.high %v6700_v44, %v6704_v20  ;;  %v6696_v1 = vld [vmem:[%s13086_s19 + $0x1a8] sm:$0xff] }
 0x80f   :  { %v8857_v63 = vcombine.high %v6691_v59, %v6695_v60  ;;  %v6683_v2 = vld [vmem:[%s13086_s19 + $0x140] sm:$0xff]  ;;  %v6684_v4 = vld [vmem:[%s13086_s19 + $0x148] sm:$0xff]  ;;  %v8856_v23 = vcombine.low %v6691_v59, %v6695_v60  ;;  %v8858_v32 = vcombine.low %v6692_v0, %v6696_v1 }
 0x810   :  { %v6688_v5 = vld [vmem:[%s13086_s19 + $0x168] sm:$0xff]  ;;  %v6675_v35 = vld [vmem:[%s13086_s19 + $0x100] sm:$0xff] }
 0x811   :  { %6560 = vmatpush1.bf16.msra.mxu0 %v9799_v57  ;;  %6603 = vmatpush1.bf16.msra.mxu1 %v9802_v48  ;;  %v8851_v34 = vcombine.high %v6684_v4, %v6688_v5  ;;  %v6679_v36 = vld [vmem:[%s13086_s19 + $0x120] sm:$0xff]  ;;  %v6676_v37 = vld [vmem:[%s13086_s19 + $0x108] sm:$0xff]  ;;  %v8850_v48 = vcombine.low %v6684_v4, %v6688_v5 }
 0x812   :  { %6561 = vmatprep.subr.bf16.mxu0 %v9807_v49  ;;  %6604 = vmatprep.subr.bf16.mxu1 %v9810_v50  ;;  %v6680_v38 = vld [vmem:[%s13086_s19 + $0x128] sm:$0xff]  ;;  %v8841_v49 = vcombine.high %v6675_v35, %v6679_v36  ;;  %v6755_v59 = vld [vmem:[%s13086_s19 + $0x380] sm:$0xff] }
 0x813   :  { %v8843_v50 = vcombine.high %v6676_v37, %v6680_v38  ;;  %v6764_v18 = vld [vmem:[%s13086_s19 + $0x3c8] sm:$0xff]  ;;  %v6759_v60 = vld [vmem:[%s13086_s19 + $0x3a0] sm:$0xff] }
 0x814   :  { %v6768_v9 = vld [vmem:[%s13086_s19 + $0x3e8] sm:$0xff] }
 0x815   :  { %6562 = vmatpush1.bf16.msra.mxu0 %v9805_v46  ;;  %6605 = vmatpush1.bf16.msra.mxu1 %v9808_v6  ;;  %v6667_v46 = vld [vmem:[%s13086_s19 + $0xc0] sm:$0xff]  ;;  %v8931_v20 = vcombine.high %v6764_v18, %v6768_v9  ;;  %v6748_v4 = vld [vmem:[%s13086_s19 + $0x348] sm:$0xff] }
 0x816   :  { %6563 = vmatprep.subr.bf16.mxu0 %v9813_v16  ;;  %6606 = vmatprep.subr.bf16.mxu1 %v9816_v7  ;;  %v6671_v6 = vld [vmem:[%s13086_s19 + $0xe0] sm:$0xff]  ;;  %v6668_v16 = vld [vmem:[%s13086_s19 + $0xc8] sm:$0xff] }
 0x817   :  { %v6672_v7 = vld [vmem:[%s13086_s19 + $0xe8] sm:$0xff] }
 0x818   :  { %v6752_v5 = vld [vmem:[%s13086_s19 + $0x368] sm:$0xff] }
 0x819   :  { %6564 = vmatpush2.bf16.msra.mxu0 %v9811_v22  ;;  %6607 = vmatpush2.bf16.msra.mxu1 %v9814_v24  ;;  %v8840_v22 = vcombine.low %v6675_v35, %v6679_v36  ;;  %v8842_v24 = vcombine.low %v6676_v37, %v6680_v38  ;;  %v8914_v36 = vcombine.low %v6748_v4, %v6752_v5  ;;  %v6739_v37 = vld [vmem:[%s13086_s19 + $0x300] sm:$0xff] }
 0x81a   :  { %6565 = vmatprep.subr.bf16.mxu0 %v9819_v47  ;;  %6608 = vmatprep.subr.bf16.mxu1 %v9822_v31  ;;  %v8833_v47 = vcombine.high %v6667_v46, %v6671_v6  ;;  %v8835_v31 = vcombine.high %v6668_v16, %v6672_v7  ;;  %v6743_v38 = vld [vmem:[%s13086_s19 + $0x320] sm:$0xff] }
 0x81d   :  { %6566 = vmatpush2.bf16.msra.mxu0 %v9817_v30  ;;  %6609 = vmatpush2.bf16.msra.mxu1 %v9820_v29  ;;  %v6659_v30 = vld [vmem:[%s13086_s19 + $0x80] sm:$0xff] }
 0x81e   :  { %6567 = vmatprep.subr.bf16.mxu0 %v9825_v51  ;;  %6610 = vmatprep.subr.bf16.mxu1 %v9828_v28  ;;  %v6663_v29 = vld [vmem:[%s13086_s19 + $0xa0] sm:$0xff]  ;;  %v6660_v51 = vld [vmem:[%s13086_s19 + $0x88] sm:$0xff] }
 0x81f   :  { %v6664_v28 = vld [vmem:[%s13086_s19 + $0xa8] sm:$0xff] }
 0x821   :  { %6568 = vmatpush2.bf16.msra.mxu0 %v9823_v10  ;;  %6611 = vmatpush2.bf16.msra.mxu1 %v9826_v27  ;;  %v8832_v10 = vcombine.low %v6667_v46, %v6671_v6  ;;  %v8834_v27 = vcombine.low %v6668_v16, %v6672_v7  ;;  %v6731_v16 = vld [vmem:[%s13086_s19 + $0x2c0] sm:$0xff] }
 0x822   :  { %6569 = vmatprep.subr.bf16.mxu0 %v9831_v11  ;;  %6612 = vmatprep.subr.bf16.mxu1 %v9834_v26  ;;  %v8825_v11 = vcombine.high %v6659_v30, %v6663_v29  ;;  %v8827_v26 = vcombine.high %v6660_v51, %v6664_v28  ;;  %v6735_v7 = vld [vmem:[%s13086_s19 + $0x2e0] sm:$0xff] }
 0x825   :  { %6570 = vmatpush2.bf16.msra.mxu0 %v9829_v25  ;;  %6613 = vmatpush2.bf16.msra.mxu1 %v9832_v52  ;;  %v6651_v25 = vld [vmem:[%s13086_s19 + $0x40] sm:$0xff] }
 0x826   :  { %6571 = vmatprep.subr.bf16.mxu0 %v9837_v53  ;;  %6614 = vmatprep.subr.bf16.mxu1 %v9840_v54  ;;  %v6655_v52 = vld [vmem:[%s13086_s19 + $0x60] sm:$0xff]  ;;  %v6652_v53 = vld [vmem:[%s13086_s19 + $0x48] sm:$0xff] }
 0x827   :  { %v6656_v54 = vld [vmem:[%s13086_s19 + $0x68] sm:$0xff] }
 0x829   :  { %6572 = vmatpush2.bf16.msra.mxu0 %v9835_v12  ;;  %6615 = vmatpush2.bf16.msra.mxu1 %v9838_v13  ;;  %v8824_v12 = vcombine.low %v6659_v30, %v6663_v29  ;;  %v8826_v13 = vcombine.low %v6660_v51, %v6664_v28  ;;  %v6723_v51 = vld [vmem:[%s13086_s19 + $0x280] sm:$0xff] }
 0x82a   :  { %6573 = vmatprep.subr.bf16.mxu0 %v9843_v55  ;;  %6616 = vmatprep.subr.bf16.mxu1 %v9846_v56  ;;  %v8817_v55 = vcombine.high %v6651_v25, %v6655_v52  ;;  %v8819_v56 = vcombine.high %v6652_v53, %v6656_v54  ;;  %v6727_v28 = vld [vmem:[%s13086_s19 + $0x2a0] sm:$0xff] }
 0x82d   :  { %6574 = vmatpush2.bf16.msra.mxu0 %v9841_v58  ;;  %6617 = vmatpush2.bf16.msra.mxu1 %v9844_v39  ;;  %v6643_v58 = vld [vmem:[%s13086_s19] sm:$0xff] }
 0x82e   :  { %6575 = vmatprep.subr.bf16.mxu0 %v9849_v40  ;;  %6618 = vmatprep.subr.bf16.mxu1 %v9852_v41  ;;  %v6647_v39 = vld [vmem:[%s13086_s19 + $0x20] sm:$0xff]  ;;  %v6644_v40 = vld [vmem:[%s13086_s19 + $0x8] sm:$0xff] }
 0x82f   :  { %v6648_v41 = vld [vmem:[%s13086_s19 + $0x28] sm:$0xff]  ;;  %v8808_v44 = vcombine.low %v6643_v58, %v6647_v39 }
 0x831   :  { %6576 = vmatpush2.bf16.msra.mxu0 %v9847_v42  ;;  %6619 = vmatpush2.bf16.msra.mxu1 %v9850_v43  ;;  %v8816_v42 = vcombine.low %v6651_v25, %v6655_v52  ;;  %v8818_v43 = vcombine.low %v6652_v53, %v6656_v54  ;;  %v6715_v53 = vld [vmem:[%s13086_s19 + $0x240] sm:$0xff] }
 0x832   :  { %6577 = vmatprep.subr.bf16.mxu0 %v9855_v45  ;;  %6620 = vmatprep.subr.bf16.mxu1 %v9858_v14  ;;  %v8809_v45 = vcombine.high %v6643_v58, %v6647_v39  ;;  %v8811_v14 = vcombine.high %v6644_v40, %v6648_v41  ;;  %v6719_v54 = vld [vmem:[%s13086_s19 + $0x260] sm:$0xff] }
 0x835   :  { %6578 = vmatpush2.bf16.msra.mxu0 %v9853_v17  ;;  %6621 = vmatpush2.bf16.msra.mxu1 %v9856_v15  ;;  %v6763_v17 = vld [vmem:[%s13086_s19 + $0x3c0] sm:$0xff] }
 0x836   :  { %7411 = vmatprep.subr.bf16.mxu0 %v8865_v19  ;;  %7452 = vmatprep.subr.bf16.mxu1 %v8867_v62  ;;  %v6767_v15 = vld [vmem:[%s13086_s19 + $0x3e0] sm:$0xff]  ;;  %v6760_v62 = vld [vmem:[%s13086_s19 + $0x3a8] sm:$0xff] }
 0x837   :  { %v8929_v19 = vcombine.high %v6763_v17, %v6767_v15 }
 0x838   :  { %6580 = vmatmul.mubr.bf16.vlgmr.msra.gmra.mxu0 %v12502_v3  ;;  %6623 = vmatmul.mubr.bf16.vlgmr.msra.gmra.mxu1 %v12504_v21  ;;  %v8859_v3 = vcombine.high %v6692_v0, %v6696_v1  ;;  %v6687_v21 = vld [vmem:[%s13086_s19 + $0x160] sm:$0xff]  ;;  %v8930_v0 = vcombine.low %v6764_v18, %v6768_v9  ;;  %v8921_v1 = vcombine.high %v6755_v59, %v6759_v60  ;;  %v12841_v18 = vld [vmem:[%s13086_s19 + $0x1d0] sm:$0xff] }
 0x839   :  { %7412 = vmatpush1.bf16.msra.mxu0 %v8864_v8  ;;  %7453 = vmatpush1.bf16.msra.mxu1 %v8866_v61  ;;  %v8849_v33 = vcombine.high %v6683_v2, %v6687_v21  ;;  %v8848_v57 = vcombine.low %v6683_v2, %v6687_v21  ;;  %v8810_v8 = vcombine.low %v6644_v40, %v6648_v41  ;;  %v6756_v61 = vld [vmem:[%s13086_s19 + $0x388] sm:$0xff]  ;;  %v6751_v21 = vld [vmem:[%s13086_s19 + $0x360] sm:$0xff]  ;;  %v12846_v9 = vld [vmem:[%s13086_s19 + $0x1f0] sm:$0xff] }
 0x83a   :  { %7413 = vmatprep.subr.bf16.mxu0 %v8857_v63  ;;  %7454 = vmatprep.subr.bf16.mxu1 %v8859_v3  ;;  %v8928_v63 = vcombine.low %v6763_v17, %v6767_v15  ;;  %v8923_v2 = vcombine.high %v6756_v61, %v6760_v62  ;;  %v6747_v3 = vld [vmem:[%s13086_s19 + $0x340] sm:$0xff] }
 0x83b   :  { %v8912_v35 = vcombine.low %v6747_v3, %v6751_v21  ;;  %v6707_v40 = vld [vmem:[%s13086_s19 + $0x200] sm:$0xff] }
 0x83c   :  { %v6711_v41 = vld [vmem:[%s13086_s19 + $0x220] sm:$0xff] }
 0x83d   :  { %7414 = vmatpush1.bf16.msra.mxu0 %v8856_v23  ;;  %7455 = vmatpush1.bf16.msra.mxu1 %v8858_v32  ;;  %v8920_v23 = vcombine.low %v6755_v59, %v6759_v60  ;;  %v8922_v32 = vcombine.low %v6756_v61, %v6760_v62 }
 0x83e   :  { %7415 = vmatprep.subr.bf16.mxu0 %v8849_v33  ;;  %7456 = vmatprep.subr.bf16.mxu1 %v8851_v34  ;;  %v8913_v33 = vcombine.high %v6747_v3, %v6751_v21  ;;  %v8915_v34 = vcombine.high %v6748_v4, %v6752_v5 }
 0x841   :  { %7416 = vmatpush1.bf16.msra.mxu0 %v8848_v57  ;;  %7457 = vmatpush1.bf16.msra.mxu1 %v8850_v48  ;;  %v6740_v57 = vld [vmem:[%s13086_s19 + $0x308] sm:$0xff]  ;;  %v8905_v48 = vcombine.high %v6739_v37, %v6743_v38 }
 0x842   :  { %7417 = vmatprep.subr.bf16.mxu0 %v8841_v49  ;;  %7458 = vmatprep.subr.bf16.mxu1 %v8843_v50  ;;  %v6744_v49 = vld [vmem:[%s13086_s19 + $0x328] sm:$0xff]  ;;  %v8904_v50 = vcombine.low %v6739_v37, %v6743_v38 }
 0x843   :  { %v8906_v46 = vcombine.low %v6740_v57, %v6744_v49  ;;  %v8907_v6 = vcombine.high %v6740_v57, %v6744_v49 }
 0x845   :  { %7418 = vmatpush1.bf16.msra.mxu0 %v8840_v22  ;;  %7459 = vmatpush1.bf16.msra.mxu1 %v8842_v24  ;;  %v6732_v22 = vld [vmem:[%s13086_s19 + $0x2c8] sm:$0xff]  ;;  %v8897_v24 = vcombine.high %v6731_v16, %v6735_v7 }
 0x846   :  { %7419 = vmatprep.subr.bf16.mxu0 %v8833_v47  ;;  %7460 = vmatprep.subr.bf16.mxu1 %v8835_v31  ;;  %v6736_v47 = vld [vmem:[%s13086_s19 + $0x2e8] sm:$0xff]  ;;  %v8896_v31 = vcombine.low %v6731_v16, %v6735_v7 }
 0x847   :  { %v8898_v30 = vcombine.low %v6732_v22, %v6736_v47  ;;  %v8899_v29 = vcombine.high %v6732_v22, %v6736_v47 }
 0x849   :  { %7420 = vmatpush1.bf16.msra.mxu0 %v8832_v10  ;;  %7461 = vmatpush1.bf16.msra.mxu1 %v8834_v27  ;;  %v6724_v10 = vld [vmem:[%s13086_s19 + $0x288] sm:$0xff]  ;;  %v8889_v27 = vcombine.high %v6723_v51, %v6727_v28 }
 0x84a   :  { %7421 = vmatprep.subr.bf16.mxu0 %v8825_v11  ;;  %7462 = vmatprep.subr.bf16.mxu1 %v8827_v26  ;;  %v6728_v11 = vld [vmem:[%s13086_s19 + $0x2a8] sm:$0xff]  ;;  %v8888_v26 = vcombine.low %v6723_v51, %v6727_v28  ;;  %v6694_v51 = vld [vmem:[%s13086_s19 + $0x198] sm:$0xff] }
 0x84b   :  { %v8890_v25 = vcombine.low %v6724_v10, %v6728_v11  ;;  %v8891_v52 = vcombine.high %v6724_v10, %v6728_v11  ;;  %v6698_v28 = vld [vmem:[%s13086_s19 + $0x1b8] sm:$0xff] }
 0x84d   :  { %7422 = vmatpush1.bf16.msra.mxu0 %v8824_v12  ;;  %7463 = vmatpush1.bf16.msra.mxu1 %v8826_v13  ;;  %v6716_v12 = vld [vmem:[%s13086_s19 + $0x248] sm:$0xff]  ;;  %v8881_v13 = vcombine.high %v6715_v53, %v6719_v54 }
 0x84e   :  { %7423 = vmatprep.subr.bf16.mxu0 %v8817_v55  ;;  %7464 = vmatprep.subr.bf16.mxu1 %v8819_v56  ;;  %v6720_v55 = vld [vmem:[%s13086_s19 + $0x268] sm:$0xff]  ;;  %v8880_v56 = vcombine.low %v6715_v53, %v6719_v54  ;;  %v6689_v53 = vld [vmem:[%s13086_s19 + $0x170] sm:$0xff]  ;;  %v6686_v54 = vld [vmem:[%s13086_s19 + $0x158] sm:$0xff] }
 0x84f   :  { %v8882_v58 = vcombine.low %v6716_v12, %v6720_v55  ;;  %v8883_v39 = vcombine.high %v6716_v12, %v6720_v55  ;;  %v6690_v12 = vld [vmem:[%s13086_s19 + $0x178] sm:$0xff] }
 0x851   :  { %7424 = vmatpush1.bf16.msra.mxu0 %v8816_v42  ;;  %7465 = vmatpush1.bf16.msra.mxu1 %v8818_v43  ;;  %v6708_v42 = vld [vmem:[%s13086_s19 + $0x208] sm:$0xff]  ;;  %v8873_v43 = vcombine.high %v6707_v40, %v6711_v41 }
 0x852   :  { %7425 = vmatprep.subr.bf16.mxu0 %v8809_v45  ;;  %7466 = vmatprep.subr.bf16.mxu1 %v8811_v14  ;;  %v6712_v45 = vld [vmem:[%s13086_s19 + $0x228] sm:$0xff]  ;;  %v8872_v14 = vcombine.low %v6707_v40, %v6711_v41  ;;  %v6677_v40 = vld [vmem:[%s13086_s19 + $0x110] sm:$0xff] }
 0x853   :  { %v8874_v17 = vcombine.low %v6708_v42, %v6712_v45  ;;  %v8875_v15 = vcombine.high %v6708_v42, %v6712_v45  ;;  %v6681_v41 = vld [vmem:[%s13086_s19 + $0x130] sm:$0xff]  ;;  %v6678_v42 = vld [vmem:[%s13086_s19 + $0x118] sm:$0xff] }
 0x855   :  { %7426 = vmatpush1.bf16.msra.mxu0 %v8808_v44  ;;  %7467 = vmatpush1.bf16.msra.mxu1 %v8810_v8  ;;  %v12851_v44 = vld [vmem:[%s13086_s19 + $0x1d8] sm:$0xff]  ;;  %v8869_v8 = vcombine.high %v12841_v18, %v12846_v9 }
 0x856   :  { %7427 = vmatprep.subr.bf16.mxu0 %v8929_v19  ;;  %7468 = vmatprep.subr.bf16.mxu1 %v8931_v20  ;;  %v12858_v19 = vld [vmem:[%s13086_s19 + $0x1f8] sm:$0xff]  ;;  %v8868_v20 = vcombine.low %v12841_v18, %v12846_v9  ;;  %v6669_v18 = vld [vmem:[%s13086_s19 + $0xd0] sm:$0xff] }
 0x857   :  { %v8870_v59 = vcombine.low %v12851_v44, %v12858_v19  ;;  %v8871_v60 = vcombine.high %v12851_v44, %v12858_v19  ;;  %v6673_v9 = vld [vmem:[%s13086_s19 + $0xf0] sm:$0xff]  ;;  %v6670_v44 = vld [vmem:[%s13086_s19 + $0xd8] sm:$0xff]  ;;  %v8844_v19 = vcombine.low %v6677_v40, %v6681_v41 }
 0x859   :  { %7428 = vmatpush2.bf16.msra.mxu0 %v8928_v63  ;;  %7469 = vmatpush2.bf16.msra.mxu1 %v8930_v0 }
 0x85a   :  { %7429 = vmatprep.subr.bf16.mxu0 %v8921_v1  ;;  %7470 = vmatprep.subr.bf16.mxu1 %v8923_v2 }
 0x85d   :  { %7430 = vmatpush2.bf16.msra.mxu0 %v8920_v23  ;;  %7471 = vmatpush2.bf16.msra.mxu1 %v8922_v32 }
 0x85e   :  { %7431 = vmatprep.subr.bf16.mxu0 %v8913_v33  ;;  %7472 = vmatprep.subr.bf16.mxu1 %v8915_v34 }
 0x861   :  { %7432 = vmatpush2.bf16.msra.mxu0 %v8912_v35  ;;  %7473 = vmatpush2.bf16.msra.mxu1 %v8914_v36 }
 0x862   :  { %7433 = vmatprep.subr.bf16.mxu0 %v8905_v48  ;;  %7474 = vmatprep.subr.bf16.mxu1 %v8907_v6 }
 0x865   :  { %7434 = vmatpush2.bf16.msra.mxu0 %v8904_v50  ;;  %7475 = vmatpush2.bf16.msra.mxu1 %v8906_v46 }
 0x866   :  { %7435 = vmatprep.subr.bf16.mxu0 %v8897_v24  ;;  %7476 = vmatprep.subr.bf16.mxu1 %v8899_v29  ;;  %v6697_v29 = vld [vmem:[%s13086_s19 + $0x1b0] sm:$0xff] }
 0x869   :  { %7436 = vmatpush2.bf16.msra.mxu0 %v8896_v31  ;;  %7477 = vmatpush2.bf16.msra.mxu1 %v8898_v30  ;;  %v6693_v31 = vld [vmem:[%s13086_s19 + $0x190] sm:$0xff] }
 0x86a   :  { %7437 = vmatprep.subr.bf16.mxu0 %v8889_v27  ;;  %7478 = vmatprep.subr.bf16.mxu1 %v8891_v52  ;;  %v8863_v52 = vcombine.high %v6694_v51, %v6698_v28  ;;  %v8860_v55 = vcombine.low %v6693_v31, %v6697_v29 }
 0x86d   :  { %7438 = vmatpush2.bf16.msra.mxu0 %v8888_v26  ;;  %7479 = vmatpush2.bf16.msra.mxu1 %v8890_v25  ;;  %v6685_v26 = vld [vmem:[%s13086_s19 + $0x150] sm:$0xff]  ;;  %v8861_v25 = vcombine.high %v6693_v31, %v6697_v29 }
 0x86e   :  { %7439 = vmatprep.subr.bf16.mxu0 %v8881_v13  ;;  %7480 = vmatprep.subr.bf16.mxu1 %v8883_v39  ;;  %v8855_v39 = vcombine.high %v6686_v54, %v6690_v12  ;;  %v8852_v45 = vcombine.low %v6685_v26, %v6689_v53 }
 0x871   :  { %7440 = vmatpush2.bf16.msra.mxu0 %v8880_v56  ;;  %7481 = vmatpush2.bf16.msra.mxu1 %v8882_v58  ;;  %v8862_v56 = vcombine.low %v6694_v51, %v6698_v28  ;;  %v8853_v58 = vcombine.high %v6685_v26, %v6689_v53  ;;  %v6757_v51 = vld [vmem:[%s13086_s19 + $0x390] sm:$0xff] }
 0x872   :  { %7441 = vmatprep.subr.bf16.mxu0 %v8873_v43  ;;  %7482 = vmatprep.subr.bf16.mxu1 %v8875_v15  ;;  %v6682_v43 = vld [vmem:[%s13086_s19 + $0x138] sm:$0xff]  ;;  %v6761_v28 = vld [vmem:[%s13086_s19 + $0x3b0] sm:$0xff] }
 0x873   :  { %v8847_v15 = vcombine.high %v6678_v42, %v6682_v43 }
 0x875   :  { %7442 = vmatpush2.bf16.msra.mxu0 %v8872_v14  ;;  %7483 = vmatpush2.bf16.msra.mxu1 %v8874_v17  ;;  %v8854_v14 = vcombine.low %v6686_v54, %v6690_v12  ;;  %v8845_v17 = vcombine.high %v6677_v40, %v6681_v41  ;;  %v6749_v54 = vld [vmem:[%s13086_s19 + $0x350] sm:$0xff] }
 0x876   :  { %7493 = vmatprep.subr.bf16.mxu0 %v8869_v8  ;;  %7534 = vmatprep.subr.bf16.mxu1 %v8871_v60  ;;  %v6674_v8 = vld [vmem:[%s13086_s19 + $0xf8] sm:$0xff]  ;;  %v6753_v12 = vld [vmem:[%s13086_s19 + $0x370] sm:$0xff] }
 0x877   :  { %v8839_v60 = vcombine.high %v6670_v44, %v6674_v8  ;;  %v6741_v41 = vld [vmem:[%s13086_s19 + $0x310] sm:$0xff] }
 0x8b7   :  { %v6495_v61 = vpop.f32.mrf.mxu0  ;;  %v6538_v62 = vpop.f32.mrf.mxu1 }
 0x8b8   :  { %v6539_v4 = vadd.f32 %v6538_v62, %v6495_v61  ;;  %v6661_v61 = vld [vmem:[%s13086_s19 + $0x90] sm:$0xff] }
 0x8b9   :  { %v6497_v63 = vpop.f32.mrf.mxu0  ;;  %v6540_v0 = vpop.f32.mrf.mxu1  ;;  %v6665_v62 = vld [vmem:[%s13086_s19 + $0xb0] sm:$0xff] }
 0x8ba   :  { %v6541_v32 = vadd.f32 %v6540_v0, %v6497_v63  ;;  %v6662_v63 = vld [vmem:[%s13086_s19 + $0x98] sm:$0xff] }
 0x8bb   :  { %v6499_v1 = vpop.f32.mrf.mxu0  ;;  %v6542_v2 = vpop.f32.mrf.mxu1  ;;  %v6666_v0 = vld [vmem:[%s13086_s19 + $0xb8] sm:$0xff] }
 0x8bc   :  { %v6543_v36 = vadd.f32 %v6542_v2, %v6499_v1  ;;  %v8836_v1 = vcombine.low %v6669_v18, %v6673_v9  ;;  %v8838_v2 = vcombine.low %v6670_v44, %v6674_v8  ;;  %v6737_v44 = vld [vmem:[%s13086_s19 + $0x2f0] sm:$0xff]  ;;  %v6734_v8 = vld [vmem:[%s13086_s19 + $0x2d8] sm:$0xff] }
 0x8bd   :  { %v6501_v3 = vpop.f32.mrf.mxu0  ;;  %v6544_v21 = vpop.f32.mrf.mxu1 }
 0x8be   :  { %v6545_v49 = vadd.f32 %v6544_v21, %v6501_v3  ;;  %v8829_v3 = vcombine.high %v6661_v61, %v6665_v62  ;;  %v8831_v21 = vcombine.high %v6662_v63, %v6666_v0 }
 0x8f8   :  { %v6581_v5 = vpop.f32.mrf.mxu0  ;;  %v6624_v23 = vpop.f32.mrf.mxu1 }
 0x8f9   :  { %v6582_v33 = vadd.f32 %v6581_v5, %v6539_v4  ;;  %v6653_v4 = vld [vmem:[%s13086_s19 + $0x50] sm:$0xff] }
 0x8fa   :  { %v6583_v34 = vpop.f32.mrf.mxu0  ;;  %v6626_v35 = vpop.f32.mrf.mxu1  ;;  %v6657_v5 = vld [vmem:[%s13086_s19 + $0x70] sm:$0xff] }
 0x8fb   :  { %v6625_v37 = vadd.f32 %v6624_v23, %v6582_v33  ;;  %v6584_v38 = vadd.f32 %v6583_v34, %v6541_v32  ;;  %v6654_v23 = vld [vmem:[%s13086_s19 + $0x58] sm:$0xff]  ;;  %v8828_v33 = vcombine.low %v6661_v61, %v6665_v62  ;;  %v8830_v34 = vcombine.low %v6662_v63, %v6666_v0  ;;  %v6725_v62 = vld [vmem:[%s13086_s19 + $0x290] sm:$0xff] }
 0x8fc   :  { %v6585_v57 = vpop.f32.mrf.mxu0  ;;  %v6628_v48 = vpop.f32.mrf.mxu1  ;;  %v6658_v32 = vld [vmem:[%s13086_s19 + $0x78] sm:$0xff]  ;;  %v6729_v63 = vld [vmem:[%s13086_s19 + $0x2b0] sm:$0xff] }
 0x8fd   :  { %9927 = vtanh.f32 %v6625_v37  ;;  %v6627_v50 = vadd.f32 %v6626_v35, %v6584_v38  ;;  %v6586_v46 = vadd.f32 %v6585_v57, %v6543_v36  ;;  %v8821_v35 = vcombine.high %v6653_v4, %v6657_v5  ;;  %v6645_v37 = vld [vmem:[%s13086_s19 + $0x10] sm:$0xff]  ;;  %v6646_v57 = vld [vmem:[%s13086_s19 + $0x18] sm:$0xff] }
 0x8fe   :  { %v6587_v6 = vpop.f32.mrf.mxu0  ;;  %v6630_v22 = vpop.f32.mrf.mxu1  ;;  %v8823_v36 = vcombine.high %v6654_v23, %v6658_v32  ;;  %v6649_v38 = vld [vmem:[%s13086_s19 + $0x30] sm:$0xff]  ;;  %v6726_v0 = vld [vmem:[%s13086_s19 + $0x298] sm:$0xff] }
 0x8ff   :  { %9929 = vtanh.f32 %v6627_v50  ;;  %v6629_v16 = vadd.f32 %v6628_v48, %v6586_v46  ;;  %v6588_v7 = vadd.f32 %v6587_v6, %v6545_v49  ;;  %v6650_v48 = vld [vmem:[%s13086_s19 + $0x38] sm:$0xff]  ;;  %v8820_v49 = vcombine.low %v6653_v4, %v6657_v5  ;;  %v6717_v5 = vld [vmem:[%s13086_s19 + $0x250] sm:$0xff] }
 0x900   :  { %v8822_v50 = vcombine.low %v6654_v23, %v6658_v32  ;;  %v8813_v46 = vcombine.high %v6645_v37, %v6649_v38  ;;  %v8815_v6 = vcombine.high %v6646_v57, %v6650_v48  ;;  %v8814_v31 = vcombine.low %v6646_v57, %v6650_v48  ;;  %v6721_v23 = vld [vmem:[%s13086_s19 + $0x270] sm:$0xff]  ;;  %v6718_v32 = vld [vmem:[%s13086_s19 + $0x258] sm:$0xff] }
 0x901   :  { %9931 = vtanh.f32 %v6629_v16  ;;  %v6631_v24 = vadd.f32 %v6630_v22, %v6588_v7  ;;  %v6765_v16 = vld [vmem:[%s13086_s19 + $0x3d0] sm:$0xff]  ;;  %v6766_v22 = vld [vmem:[%s13086_s19 + $0x3d8] sm:$0xff] }
 0x902   :  { %v6769_v7 = vld [vmem:[%s13086_s19 + $0x3f0] sm:$0xff]  ;;  %v6710_v48 = vld [vmem:[%s13086_s19 + $0x218] sm:$0xff] }
 0x903   :  { %9933 = vtanh.f32 %v6631_v24  ;;  %v6770_v24 = vld [vmem:[%s13086_s19 + $0x3f8] sm:$0xff]  ;;  %v8932_v26 = vcombine.low %v6765_v16, %v6769_v7  ;;  %v6713_v57 = vld [vmem:[%s13086_s19 + $0x230] sm:$0xff] }
 0x904   :  { %v8935_v29 = vcombine.high %v6766_v22, %v6770_v24 }
 0x90a   :  { %v9928_v47 = vpop.eup %9927 }
 0x90b   :  { %6637 = vst [vmem:[%s13091_s24] sm:$0xff] %v9928_v47  ;;  %v12884_v11 = vpack.c.bf16 %v9928_v47, %v9928_v47  ;;  %v8812_v47 = vcombine.low %v6645_v37, %v6649_v38  ;;  %v6709_v38 = vld [vmem:[%s13086_s19 + $0x210] sm:$0xff] }
 0x90c   :  { %v9930_v30 = vpop.eup %9929 }
 0x90d   :  { %6638 = vst [vmem:[%s13091_s24 + $0x8] sm:$0xff] %v9930_v30  ;;  %v6642_v10 = vpack.c.bf16 %v9930_v30, %v9930_v30  ;;  %v8933_v30 = vcombine.high %v6765_v16, %v6769_v7  ;;  %v8876_v7 = vcombine.low %v6709_v38, %v6713_v57 }
 0x90e   :  { %v9932_v27 = vpop.eup %9931 }
 0x90f   :  { %6639 = vst [vmem:[%s13091_s24 + $0x10] sm:$0xf] %v9932_v27  ;;  %7443 = vmatprep.mubr.bf16.mxu0 %v6642_v10  ;;  %7484 = vmatprep.mubr.bf16.mxu1 %v6642_v10  ;;  %v6762_v27 = vld [vmem:[%s13086_s19 + $0x3b8] sm:$0xff] }
 0x910   :  { %v9934_v13 = vpop.eup %9933  ;;  %7444 = vmatmul.mubr.bf16.vlgmr.msra.gmra.mxu0 %v12884_v11  ;;  %7485 = vmatmul.mubr.bf16.vlgmr.msra.gmra.mxu1 %v12884_v11 }
 0x911   :  { %6640 = vst [vmem:[%s13091_s24 + $0x18] sm:$0xf] %v9934_v13  ;;  %7494 = vmatpush1.bf16.msra.mxu0 %v8868_v20  ;;  %7535 = vmatpush1.bf16.msra.mxu1 %v8870_v59  ;;  %v8846_v20 = vcombine.low %v6678_v42, %v6682_v43  ;;  %v8837_v59 = vcombine.high %v6669_v18, %v6673_v9  ;;  %v6750_v13 = vld [vmem:[%s13086_s19 + $0x358] sm:$0xff]  ;;  %v6745_v42 = vld [vmem:[%s13086_s19 + $0x330] sm:$0xff] }
 0x912   :  { %7525 = vmatprep.mubr.bf16.mxu0 %v6642_v10  ;;  %7566 = vmatprep.mubr.bf16.mxu1 %v6642_v10  ;;  %v6758_v10 = vld [vmem:[%s13086_s19 + $0x398] sm:$0xff]  ;;  %v6733_v9 = vld [vmem:[%s13086_s19 + $0x2d0] sm:$0xff] }
 0x913   :  { %7495 = vmatprep.subr.bf16.mxu0 %v8861_v25  ;;  %7536 = vmatprep.subr.bf16.mxu1 %v8863_v52  ;;  %v8934_v25 = vcombine.low %v6766_v22, %v6770_v24  ;;  %v8925_v52 = vcombine.high %v6757_v51, %v6761_v28  ;;  %v8927_v53 = vcombine.high %v6758_v10, %v6762_v27  ;;  %v6742_v43 = vld [vmem:[%s13086_s19 + $0x318] sm:$0xff] }
 0x914   :  { %v9859_v24 = vld [vmem:[#allocation15 + $0x78] sm:$0xff]  }
 0x915   :  { %7496 = vmatpush1.bf16.msra.mxu0 %v8860_v55  ;;  %7537 = vmatpush1.bf16.msra.mxu1 %v8862_v56  ;;  %v6754_v55 = vld [vmem:[%s13086_s19 + $0x378] sm:$0xff]  ;;  %v8924_v56 = vcombine.low %v6757_v51, %v6761_v28  ;;  %v9864_v51 = vld [vmem:[#allocation15 + $0xf0] sm:$0xff]  }
 0x916   :  { %7497 = vmatprep.subr.bf16.mxu0 %v8853_v58  ;;  %7538 = vmatprep.subr.bf16.mxu1 %v8855_v39  ;;  %v8926_v58 = vcombine.low %v6758_v10, %v6762_v27  ;;  %v8917_v39 = vcombine.high %v6749_v54, %v6753_v12  ;;  %v8919_v40 = vcombine.high %v6750_v13, %v6754_v55  ;;  %v9865_v28 = vld [vmem:[#allocation15 + $0x30] sm:$0xff]   ;;  %v9867_v27 = vld [vmem:[#allocation15 + $0x68] sm:$0xff]  }
 0x917   :  { %v9866_v10 = vld [vmem:[#allocation15 + $0xb0] sm:$0xff]  }
 0x919   :  { %7498 = vmatpush1.bf16.msra.mxu0 %v8852_v45  ;;  %7539 = vmatpush1.bf16.msra.mxu1 %v8854_v14  ;;  %v6746_v45 = vld [vmem:[%s13086_s19 + $0x338] sm:$0xff]  ;;  %v8916_v14 = vcombine.low %v6749_v54, %v6753_v12 }
 0x91a   :  { %7499 = vmatprep.subr.bf16.mxu0 %v8845_v17  ;;  %7540 = vmatprep.subr.bf16.mxu1 %v8847_v15  ;;  %v8918_v17 = vcombine.low %v6750_v13, %v6754_v55  ;;  %v8909_v15 = vcombine.high %v6741_v41, %v6745_v42  ;;  %v8911_v18 = vcombine.high %v6742_v43, %v6746_v45  ;;  %v9872_v54 = vld [vmem:[#allocation15 + $0xe0] sm:$0xff]   ;;  %v9875_v13 = vld [vmem:[#allocation15 + $0x58] sm:$0xff]  }
 0x91b   :  { %v9873_v12 = vld [vmem:[#allocation15 + $0x20] sm:$0xff]   ;;  %v9876_v55 = vld [vmem:[#allocation15 + $0xd8] sm:$0xff]  }
 0x91d   :  { %7500 = vmatpush1.bf16.msra.mxu0 %v8844_v19  ;;  %7541 = vmatpush1.bf16.msra.mxu1 %v8846_v20  ;;  %v6738_v19 = vld [vmem:[%s13086_s19 + $0x2f8] sm:$0xff]  ;;  %v8908_v20 = vcombine.low %v6741_v41, %v6745_v42  ;;  %v9881_v41 = vld [vmem:[#allocation15 + $0x10] sm:$0xff]  }
 0x91e   :  { %7501 = vmatprep.subr.bf16.mxu0 %v8837_v59  ;;  %7542 = vmatprep.subr.bf16.mxu1 %v8839_v60  ;;  %v8910_v59 = vcombine.low %v6742_v43, %v6746_v45  ;;  %v8901_v60 = vcombine.high %v6733_v9, %v6737_v44  ;;  %v8903_v61 = vcombine.high %v6734_v8, %v6738_v19  ;;  %v9882_v42 = vld [vmem:[#allocation15 + $0x90] sm:$0xff]   ;;  %v9883_v43 = vld [vmem:[#allocation15 + $0x48] sm:$0xff]  }
 0x91f   :  { %v9884_v45 = vld [vmem:[#allocation15 + $0xc8] sm:$0xff]  }
 0x921   :  { %7502 = vmatpush1.bf16.msra.mxu0 %v8836_v1  ;;  %7543 = vmatpush1.bf16.msra.mxu1 %v8838_v2  ;;  %v6730_v1 = vld [vmem:[%s13086_s19 + $0x2b8] sm:$0xff]  ;;  %v8900_v2 = vcombine.low %v6733_v9, %v6737_v44 }
 0x922   :  { %7503 = vmatprep.subr.bf16.mxu0 %v8829_v3  ;;  %7544 = vmatprep.subr.bf16.mxu1 %v8831_v21  ;;  %v8902_v3 = vcombine.low %v6734_v8, %v6738_v19  ;;  %v8893_v21 = vcombine.high %v6725_v62, %v6729_v63  ;;  %v8895_v4 = vcombine.high %v6726_v0, %v6730_v1  ;;  %v9889_v9 = vld [vmem:[#allocation15] sm:$0xff]   ;;  %v9891_v8 = vld [vmem:[#allocation15 + $0x178] sm:$0xff]  }
 0x923   :  { %v9890_v44 = vld [vmem:[#allocation15 + $0x80] sm:$0xff]   ;;  %v9892_v19 = vld [vmem:[#allocation15 + $0x1f8] sm:$0xff]  }
 0x925   :  { %7504 = vmatpush1.bf16.msra.mxu0 %v8828_v33  ;;  %7545 = vmatpush1.bf16.msra.mxu1 %v8830_v34  ;;  %v6722_v33 = vld [vmem:[%s13086_s19 + $0x278] sm:$0xff]  ;;  %v8892_v34 = vcombine.low %v6725_v62, %v6729_v63 }
 0x926   :  { %7505 = vmatprep.subr.bf16.mxu0 %v8821_v35  ;;  %7546 = vmatprep.subr.bf16.mxu1 %v8823_v36  ;;  %v8894_v35 = vcombine.low %v6726_v0, %v6730_v1  ;;  %v8885_v36 = vcombine.high %v6717_v5, %v6721_v23  ;;  %v8887_v37 = vcombine.high %v6718_v32, %v6722_v33 }
 0x929   :  { %7506 = vmatpush1.bf16.msra.mxu0 %v8820_v49  ;;  %7547 = vmatpush1.bf16.msra.mxu1 %v8822_v50  ;;  %v6714_v49 = vld [vmem:[%s13086_s19 + $0x238] sm:$0xff]  ;;  %v8884_v50 = vcombine.low %v6717_v5, %v6721_v23 }
 0x92a   :  { %7507 = vmatprep.subr.bf16.mxu0 %v8813_v46  ;;  %7548 = vmatprep.subr.bf16.mxu1 %v8815_v6  ;;  %v8886_v46 = vcombine.low %v6718_v32, %v6722_v33  ;;  %v8877_v6 = vcombine.high %v6709_v38, %v6713_v57  ;;  %v8879_v16 = vcombine.high %v6710_v48, %v6714_v49 }
 0x92b   :  { %v8878_v22 = vcombine.low %v6710_v48, %v6714_v49  ;;  %v9895_v48 = vld [vmem:[#allocation15 + $0x170] sm:$0xff]  }
 0x92c   :  { %v9896_v49 = vld [vmem:[#allocation15 + $0x1f0] sm:$0xff]  }
 0x92d   :  { %7508 = vmatpush1.bf16.msra.mxu0 %v8812_v47  ;;  %7549 = vmatpush1.bf16.msra.mxu1 %v8814_v31  ;;  %v9860_v47 = vld [vmem:[#allocation15 + $0xf8] sm:$0xff]  }
 0x92e   :  { %7509 = vmatprep.subr.bf16.mxu0 %v8933_v30  ;;  %7550 = vmatprep.subr.bf16.mxu1 %v8935_v29  ;;  %v9861_v31 = vld [vmem:[#allocation15 + $0x38] sm:$0xff]   ;;  %v9863_v29 = vld [vmem:[#allocation15 + $0x70] sm:$0xff]  }
 0x92f   :  { %v9862_v30 = vld [vmem:[#allocation15 + $0xb8] sm:$0xff]  }
 0x931   :  { %7510 = vmatpush2.bf16.msra.mxu0 %v8932_v26  ;;  %7551 = vmatpush2.bf16.msra.mxu1 %v8934_v25  ;;  %v9868_v26 = vld [vmem:[#allocation15 + $0xe8] sm:$0xff]  }
 0x932   :  { %7511 = vmatprep.subr.bf16.mxu0 %v8925_v52  ;;  %7552 = vmatprep.subr.bf16.mxu1 %v8927_v53  ;;  %v9869_v25 = vld [vmem:[#allocation15 + $0x28] sm:$0xff]   ;;  %v9871_v53 = vld [vmem:[#allocation15 + $0x60] sm:$0xff]  }
 0x933   :  { %v9870_v52 = vld [vmem:[#allocation15 + $0xa8] sm:$0xff]  }
 0x935   :  { %7512 = vmatpush2.bf16.msra.mxu0 %v8924_v56  ;;  %7553 = vmatpush2.bf16.msra.mxu1 %v8926_v58  ;;  %v9877_v56 = vld [vmem:[#allocation15 + $0x18] sm:$0xff]  }
 0x936   :  { %7513 = vmatprep.subr.bf16.mxu0 %v8917_v39  ;;  %7554 = vmatprep.subr.bf16.mxu1 %v8919_v40  ;;  %v9878_v58 = vld [vmem:[#allocation15 + $0x98] sm:$0xff]   ;;  %v9879_v39 = vld [vmem:[#allocation15 + $0x50] sm:$0xff]  }
 0x937   :  { %v9880_v40 = vld [vmem:[#allocation15 + $0xd0] sm:$0xff]  }
 0x939   :  { %7514 = vmatpush2.bf16.msra.mxu0 %v8916_v14  ;;  %7555 = vmatpush2.bf16.msra.mxu1 %v8918_v17  ;;  %v9885_v14 = vld [vmem:[#allocation15 + $0x8] sm:$0xff]  }
 0x93a   :  { %7515 = vmatprep.subr.bf16.mxu0 %v8909_v15  ;;  %7556 = vmatprep.subr.bf16.mxu1 %v8911_v18  ;;  %v9886_v17 = vld [vmem:[#allocation15 + $0x88] sm:$0xff]   ;;  %v9887_v15 = vld [vmem:[#allocation15 + $0x40] sm:$0xff]  }
 0x93b   :  { %v9888_v18 = vld [vmem:[#allocation15 + $0xc0] sm:$0xff]  }
 0x93d   :  { %7516 = vmatpush2.bf16.msra.mxu0 %v8908_v20  ;;  %7557 = vmatpush2.bf16.msra.mxu1 %v8910_v59 }
 0x93e   :  { %7517 = vmatprep.subr.bf16.mxu0 %v8901_v60  ;;  %7558 = vmatprep.subr.bf16.mxu1 %v8903_v61 }
 0x941   :  { %7518 = vmatpush2.bf16.msra.mxu0 %v8900_v2  ;;  %7559 = vmatpush2.bf16.msra.mxu1 %v8902_v3 }
 0x942   :  { %7519 = vmatprep.subr.bf16.mxu0 %v8893_v21  ;;  %7560 = vmatprep.subr.bf16.mxu1 %v8895_v4 }
 0x945   :  { %7520 = vmatpush2.bf16.msra.mxu0 %v8892_v34  ;;  %7561 = vmatpush2.bf16.msra.mxu1 %v8894_v35 }
 0x946   :  { %7521 = vmatprep.subr.bf16.mxu0 %v8885_v36  ;;  %7562 = vmatprep.subr.bf16.mxu1 %v8887_v37  ;;  %v9893_v36 = vld [vmem:[#allocation15 + $0x138] sm:$0xff]  }
 0x947   :  { %v9894_v37 = vld [vmem:[#allocation15 + $0x1b8] sm:$0xff]  }
 0x949   :  { %7522 = vmatpush2.bf16.msra.mxu0 %v8884_v50  ;;  %7563 = vmatpush2.bf16.msra.mxu1 %v8886_v46  ;;  %v9897_v50 = vld [vmem:[#allocation15 + $0x130] sm:$0xff]  }
 0x94a   :  { %7523 = vmatprep.subr.bf16.mxu0 %v8877_v6  ;;  %7564 = vmatprep.subr.bf16.mxu1 %v8879_v16  ;;  %v9898_v46 = vld [vmem:[#allocation15 + $0x1b0] sm:$0xff]   ;;  %v9899_v6 = vld [vmem:[#allocation15 + $0x168] sm:$0xff]  }
 0x94b   :  { %v9900_v16 = vld [vmem:[#allocation15 + $0x1e8] sm:$0xff]  }
 0x94d   :  { %7524 = vmatpush2.bf16.msra.mxu0 %v8876_v7  ;;  %7565 = vmatpush2.bf16.msra.mxu1 %v8878_v22  ;;  %v9901_v7 = vld [vmem:[#allocation15 + $0x128] sm:$0xff]  }
 0x94e   :  { %9304 = vmatprep.subr.bf16.mxu0 %v9859_v24  ;;  %9326 = vmatprep.subr.bf16.mxu1 %v9860_v47  ;;  %v9902_v22 = vld [vmem:[#allocation15 + $0x1a8] sm:$0xff]   ;;  %v9903_v24 = vld [vmem:[#allocation15 + $0x160] sm:$0xff]  }
 0x94f   :  { %v9904_v47 = vld [vmem:[#allocation15 + $0x1e0] sm:$0xff]  }
 0x950   :  { %7526 = vmatmul.mubr.bf16.vlgmr.msra.gmra.mxu0 %v12884_v11  ;;  %7567 = vmatmul.mubr.bf16.vlgmr.msra.gmra.mxu1 %v12884_v11  ;;  %v9874_v11 = vld [vmem:[#allocation15 + $0xa0] sm:$0xff]  }
 0x951   :  { %9305 = vmatpush3.bf16.msra.mxu0 %v9861_v31  ;;  %9327 = vmatpush3.bf16.msra.mxu1 %v9862_v30  ;;  %v9905_v31 = vld [vmem:[#allocation15 + $0x120] sm:$0xff]  }
 0x952   :  { %9306 = vmatprep.subr.bf16.mxu0 %v9863_v29  ;;  %9328 = vmatprep.subr.bf16.mxu1 %v9864_v51  ;;  %v9906_v30 = vld [vmem:[#allocation15 + $0x1a0] sm:$0xff]   ;;  %v9907_v29 = vld [vmem:[#allocation15 + $0x158] sm:$0xff]  }
 0x953   :  { %v9908_v51 = vld [vmem:[#allocation15 + $0x1d8] sm:$0xff]  }
 0x955   :  { %9307 = vmatpush3.bf16.msra.mxu0 %v9865_v28  ;;  %9329 = vmatpush3.bf16.msra.mxu1 %v9866_v10  ;;  %v9909_v28 = vld [vmem:[#allocation15 + $0x118] sm:$0xff]  }
 0x956   :  { %9308 = vmatprep.subr.bf16.mxu0 %v9867_v27  ;;  %9330 = vmatprep.subr.bf16.mxu1 %v9868_v26  ;;  %v9910_v10 = vld [vmem:[#allocation15 + $0x198] sm:$0xff]   ;;  %v9911_v27 = vld [vmem:[#allocation15 + $0x150] sm:$0xff]  }
 0x957   :  { %v9912_v26 = vld [vmem:[#allocation15 + $0x1d0] sm:$0xff]  }
 0x959   :  { %9309 = vmatpush3.bf16.msra.mxu0 %v9869_v25  ;;  %9331 = vmatpush3.bf16.msra.mxu1 %v9870_v52  ;;  %v9913_v25 = vld [vmem:[#allocation15 + $0x110] sm:$0xff]  }
 0x95a   :  { %9310 = vmatprep.subr.bf16.mxu0 %v9871_v53  ;;  %9332 = vmatprep.subr.bf16.mxu1 %v9872_v54  ;;  %v9914_v52 = vld [vmem:[#allocation15 + $0x190] sm:$0xff]   ;;  %v9915_v53 = vld [vmem:[#allocation15 + $0x148] sm:$0xff]  }
 0x95b   :  { %v9916_v54 = vld [vmem:[#allocation15 + $0x1c8] sm:$0xff]  }
 0x95d   :  { %9311 = vmatpush3.bf16.msra.mxu0 %v9873_v12  ;;  %9333 = vmatpush3.bf16.msra.mxu1 %v9874_v11  ;;  %v9917_v12 = vld [vmem:[#allocation15 + $0x108] sm:$0xff]  }
 0x95e   :  { %9312 = vmatprep.subr.bf16.mxu0 %v9875_v13  ;;  %9334 = vmatprep.subr.bf16.mxu1 %v9876_v55  ;;  %v9918_v11 = vld [vmem:[#allocation15 + $0x188] sm:$0xff]   ;;  %v9919_v13 = vld [vmem:[#allocation15 + $0x140] sm:$0xff]  }
 0x95f   :  { %v9920_v55 = vld [vmem:[#allocation15 + $0x1c0] sm:$0xff]  }
 0x961   :  { %9313 = vmatpush3.bf16.msra.mxu0 %v9877_v56  ;;  %9335 = vmatpush3.bf16.msra.mxu1 %v9878_v58  ;;  %v9921_v56 = vld [vmem:[#allocation15 + $0x100] sm:$0xff]  }
 0x962   :  { %9314 = vmatprep.subr.bf16.mxu0 %v9879_v39  ;;  %9336 = vmatprep.subr.bf16.mxu1 %v9880_v40  ;;  %v9922_v58 = vld [vmem:[#allocation15 + $0x180] sm:$0xff]  }
 0x965   :  { %9315 = vmatpush3.bf16.msra.mxu0 %v9881_v41  ;;  %9337 = vmatpush3.bf16.msra.mxu1 %v9882_v42 }
 0x966   :  { %9316 = vmatprep.subr.bf16.mxu0 %v9883_v43  ;;  %9338 = vmatprep.subr.bf16.mxu1 %v9884_v45 }
 0x969   :  { %9317 = vmatpush3.bf16.msra.mxu0 %v9885_v14  ;;  %9339 = vmatpush3.bf16.msra.mxu1 %v9886_v17 }
 0x96a   :  { %9318 = vmatprep.subr.bf16.mxu0 %v9887_v15  ;;  %9340 = vmatprep.subr.bf16.mxu1 %v9888_v18 }
 0x96d   :  { %9319 = vmatpush3.bf16.msra.mxu0 %v9889_v9  ;;  %9341 = vmatpush3.bf16.msra.mxu1 %v9890_v44 }
 0x96e   :  { %9348 = vmatprep.subr.bf16.mxu0 %v9891_v8  ;;  %9370 = vmatprep.subr.bf16.mxu1 %v9892_v19 }
 0x9d0   :  { %v7445_v20 = vpop.f32.mrf.mxu0  ;;  %v7486_v59 = vpop.f32.mrf.mxu1 }
 0x9d1   :  { %v7575_v60 = vmul.f32 0.2, %v7445_v20  ;;  %v7577_v61 = vmul.f32 0.2, %v7486_v59 }
 0x9d2   :  { %v7447_v62 = vpop.f32.mrf.mxu0  ;;  %v7488_v63 = vpop.f32.mrf.mxu1 }
 0x9d3   :  { %v7576_v0 = vmul.f32 0.2, %v7447_v62  ;;  %v7578_v1 = vmul.f32 0.2, %v7488_v63  ;;  %v7583_v2 = vmax.f32 %v7445_v20, %v7575_v60  ;;  %v7585_v3 = vmax.f32 %v7486_v59, %v7577_v61 }
 0x9d4   :  { %v7449_v21 = vpop.f32.mrf.mxu0  ;;  %v7490_v4 = vpop.f32.mrf.mxu1 }
 0x9d5   :  { %v7584_v5 = vmax.f32 %v7447_v62, %v7576_v0  ;;  %v7586_v23 = vmax.f32 %v7488_v63, %v7578_v1  ;;  %v7591_v38 = vpack.c.bf16 %v7583_v2, %v7583_v2  ;;  %v7593_v57 = vpack.c.bf16 %v7585_v3, %v7585_v3 }
 0x9d6   :  { %v7450_v32 = vpop.f32.mrf.mxu0  ;;  %v7491_v33 = vpop.f32.mrf.mxu1 }
 0x9d7   :  { %v7592_v34 = vpack.c.bf16 %v7584_v5, %v7584_v5  ;;  %v7594_v35 = vpack.c.bf16 %v7586_v23, %v7586_v23 }
 0x9d9   :  { %8143 = vmatprep.mubr.bf16.mxu0 %v7592_v34  ;;  %8183 = vmatprep.mubr.bf16.mxu1 %v7594_v35 }
 0x9da   :  { %8144 = vmatmul.mubr.bf16.vlgmr.msra.gmra.mxu0 %v7591_v38  ;;  %8184 = vmatmul.mubr.bf16.vlgmr.msra.gmra.mxu1 %v7593_v57 }
 0x9db   :  { %9349 = vmatpush3.bf16.msra.mxu0 %v9893_v36  ;;  %9371 = vmatpush3.bf16.msra.mxu1 %v9894_v37 }
 0x9dc   :  { %9350 = vmatprep.subr.bf16.mxu0 %v9895_v48  ;;  %9372 = vmatprep.subr.bf16.mxu1 %v9896_v49 }
 0x9df   :  { %9351 = vmatpush3.bf16.msra.mxu0 %v9897_v50  ;;  %9373 = vmatpush3.bf16.msra.mxu1 %v9898_v46 }
 0x9e0   :  { %9352 = vmatprep.subr.bf16.mxu0 %v9899_v6  ;;  %9374 = vmatprep.subr.bf16.mxu1 %v9900_v16 }
 0x9e3   :  { %9353 = vmatpush3.bf16.msra.mxu0 %v9901_v7  ;;  %9375 = vmatpush3.bf16.msra.mxu1 %v9902_v22 }
 0x9e4   :  { %9354 = vmatprep.subr.bf16.mxu0 %v9903_v24  ;;  %9376 = vmatprep.subr.bf16.mxu1 %v9904_v47 }
 0x9e7   :  { %9355 = vmatpush3.bf16.msra.mxu0 %v9905_v31  ;;  %9377 = vmatpush3.bf16.msra.mxu1 %v9906_v30 }
 0x9e8   :  { %9356 = vmatprep.subr.bf16.mxu0 %v9907_v29  ;;  %9378 = vmatprep.subr.bf16.mxu1 %v9908_v51 }
 0x9eb   :  { %9357 = vmatpush3.bf16.msra.mxu0 %v9909_v28  ;;  %9379 = vmatpush3.bf16.msra.mxu1 %v9910_v10 }
 0x9ec   :  { %9358 = vmatprep.subr.bf16.mxu0 %v9911_v27  ;;  %9380 = vmatprep.subr.bf16.mxu1 %v9912_v26 }
 0x9ef   :  { %9359 = vmatpush3.bf16.msra.mxu0 %v9913_v25  ;;  %9381 = vmatpush3.bf16.msra.mxu1 %v9914_v52 }
 0x9f0   :  { %9360 = vmatprep.subr.bf16.mxu0 %v9915_v53  ;;  %9382 = vmatprep.subr.bf16.mxu1 %v9916_v54 }
 0x9f3   :  { %9361 = vmatpush3.bf16.msra.mxu0 %v9917_v12  ;;  %9383 = vmatpush3.bf16.msra.mxu1 %v9918_v11 }
 0x9f4   :  { %9362 = vmatprep.subr.bf16.mxu0 %v9919_v13  ;;  %9384 = vmatprep.subr.bf16.mxu1 %v9920_v55 }
 0x9f7   :  { %9363 = vmatpush3.bf16.msra.mxu0 %v9921_v56  ;;  %9385 = vmatpush3.bf16.msra.mxu1 %v9922_v58 }
 0xa10   :  { %v7527_v39 = vpop.f32.mrf.mxu0  ;;  %v7568_v40 = vpop.f32.mrf.mxu1 }
 0xa11   :  { %v7579_v41 = vmul.f32 0.2, %v7527_v39  ;;  %v7581_v42 = vmul.f32 0.2, %v7568_v40 }
 0xa12   :  { %v7529_v43 = vpop.f32.mrf.mxu0  ;;  %v7570_v45 = vpop.f32.mrf.mxu1 }
 0xa13   :  { %v7580_v14 = vmul.f32 0.2, %v7529_v43  ;;  %v7582_v17 = vmul.f32 0.2, %v7570_v45  ;;  %v7587_v15 = vmax.f32 %v7527_v39, %v7579_v41  ;;  %v7589_v18 = vmax.f32 %v7568_v40, %v7581_v42 }
 0xa14   :  { %v7531_v9 = vpop.f32.mrf.mxu0  ;;  %v7572_v44 = vpop.f32.mrf.mxu1 }
 0xa15   :  { %v7588_v8 = vmax.f32 %v7529_v43, %v7580_v14  ;;  %v7590_v19 = vmax.f32 %v7570_v45, %v7582_v17  ;;  %v7595_v62 = vpack.c.bf16 %v7587_v15, %v7587_v15  ;;  %v7597_v63 = vpack.c.bf16 %v7589_v18, %v7589_v18 }
 0xa16   :  { %v7532_v20 = vpop.f32.mrf.mxu0  ;;  %v7573_v59 = vpop.f32.mrf.mxu1 }
 0xa17   :  { %v7596_v60 = vpack.c.bf16 %v7588_v8, %v7588_v8  ;;  %v7598_v61 = vpack.c.bf16 %v7590_v19, %v7590_v19 }
 0xa19   :  { %8223 = vmatprep.mubr.bf16.mxu0 %v7596_v60  ;;  %8263 = vmatprep.mubr.bf16.mxu1 %v7598_v61 }
 0xa1a   :  { %8224 = vmatmul.mubr.bf16.vlgmr.msra.gmra.mxu0 %v7595_v62  ;;  %8264 = vmatmul.mubr.bf16.vlgmr.msra.gmra.mxu1 %v7597_v63 }
 0xa9a   :  { %v9320_v0 = vpop.f32.mrf.mxu0  ;;  %v9342_v1 = vpop.f32.mrf.mxu1 }
 0xa9c   :  { %v9321_v2 = vpop.f32.mrf.mxu0  ;;  %v9343_v3 = vpop.f32.mrf.mxu1 }
 0xa9d   :  { %v9322_v21 = vadd.f32 %v9321_v2, %v9320_v0  ;;  %v9344_v4 = vadd.f32 %v9343_v3, %v9342_v1 }
 0xa9e   :  { %v9323_v5 = vpop.f32.mrf.mxu0  ;;  %v9345_v23 = vpop.f32.mrf.mxu1 }
 0xa9f   :  { %v8186_v32 = vadd.f32 %v9344_v4, %v9322_v21 }
 0xaa0   :  { %v9324_v33 = vpop.f32.mrf.mxu0  ;;  %v9346_v34 = vpop.f32.mrf.mxu1 }
 0xada   :  { %v9364_v35 = vpop.f32.mrf.mxu0  ;;  %v9386_v36 = vpop.f32.mrf.mxu1 }
 0xadc   :  { %v9365_v37 = vpop.f32.mrf.mxu0  ;;  %v9387_v38 = vpop.f32.mrf.mxu1 }
 0xadd   :  { %v9366_v57 = vadd.f32 %v9365_v37, %v9364_v35  ;;  %v9388_v46 = vadd.f32 %v9387_v38, %v9386_v36 }
 0xade   :  { %v9367_v48 = vpop.f32.mrf.mxu0  ;;  %v9389_v49 = vpop.f32.mrf.mxu1 }
 0xadf   :  { %v8226_v50 = vadd.f32 %v9366_v57, %v8186_v32 }
 0xae0   :  { %v9368_v6 = vpop.f32.mrf.mxu0  ;;  %v9390_v16 = vpop.f32.mrf.mxu1 }
 0xae1   :  { %v8266_v7 = vadd.f32 %v9388_v46, %v8226_v50 }
 0xae3   :  { %v8271_v22 = vsub.f32 0.0, %v8266_v7 }
 0xae5   :  { %v8272_v24 = vmul.f32 1.442695, %v8271_v22 }
 0xae7   :  { %9935 = vpow2.f32 %v8272_v24 }
 0xaf4   :  { %v9936_v47 = vpop.eup %9935 }
 0xaf5   :  { %v8274_v31 = vadd.f32 1.0, %v9936_v47 }
 0xaf7   :  { %9937 = vrcp.f32 %v8274_v31 }
 0xb04   :  { %v9938_v30 = vpop.eup %9937 }
 0xb05   :  { %8277 = vst [vmem:[%s13092_s25] sm:$0xff] %v9938_v30 }
 0xb06   :  { %8298 = vsyncpa [#allocation3], 1 }
 0xb07   :  { %8299 = vsyncpa [#allocation5], 1 }
 0xb08   :  { %8300 = vsyncpa [#allocation8], 1 }
 0xb09   :  { %8301 = vsyncpa [#allocation11], 1 }
 0xb0a   :  { %8302 = vsyncpa [#allocation14], 1 }

</bundles_post_ra>
